<compile_context>
chip_gen: v7x
topology: tpu7x:2x2x1
jax: 0.10.0
libtpu: 0.0.40
codegen_flags: <defaults>
</compile_context>

<pallas_src>
import jax
import jax.numpy as jnp
from jax import lax
from jax.experimental import pallas as pl
from jax.experimental.pallas import tpu as pltpu

# ---------------- model dimensions (small, consistent with the module) ----------------
B = 2          # batch (up to 8 is free in the sublane padding; see header note)
L = 16         # sequence length
C = 16         # cnn_out_channels
H = 32         # lstm_hidden_size  (4H = 128 -> one lane-dense vreg of gates per step)
NUM_LAYERS = 2
BN_EPS = 1e-5

_VMEM_SPEC = pl.BlockSpec(memory_space=pltpu.MemorySpace.VMEM)


# ------------------------------- fused Pallas kernel -----------------------------------
def fused_forward_kernel(
    xcols_ref, w1_ref, s1_ref, t1_ref, w2_ref, s2_ref, t2_ref,
    wih0f_ref, whh0f_ref, b0f_ref, wih0b_ref, whh0b_ref, b0b_ref,
    wih1f_ref, whh1f_ref, b1f_ref, wih1b_ref, whh1b_ref, b1b_ref,
    fcw_ref, fcb_ref,
    out_ref,
    seq_scr,
):
    """Entire forward pass in one kernel.

    xcols_ref: (L*B, 3)   time-major im2col of the 1-channel input (row r = t*B + b)
    w1_ref:    (3, C)     conv1 weights, w1[k, c] == torch conv1.weight[c, 0, k]
    w2_ref:    (3C, C)    conv2 weights, row k*C+ci == torch conv2.weight[:, ci, k]
    s*/t*:     (1, C)     fused eval-mode BatchNorm scale/shift (conv bias folded in)
    wih*:      (Din, 4H)  fused-gate input weights, gate order [i, f, g, o]
    whh*:      (H, 4H)    fused-gate recurrent weights
    b*:        (1, 4H)    fused bias (b_ih + b_hh)
    fcw/fcb:   (2H, 1) / (1, 1)
    out_ref:   (B, 1)
    seq_scr:   (L*B, 2H)  layer-0 outputs, fwd h in lanes [:H], bwd h in lanes [H:2H]
    """
    n_rows, H2 = seq_scr.shape
    Ht = H2 // 2
    Bt = out_ref.shape[0]
    Lt = n_rows // Bt
    Co = w1_ref.shape[1]
    f32 = jnp.float32

    # ---------------- CNN frontend (time-major rows) ----------------
    conv1 = jnp.dot(xcols_ref[...], w1_ref[...], preferred_element_type=f32)   # (L*B, C)
    h1 = jnp.maximum(conv1 * s1_ref[...] + t1_ref[...], 0.0)

    # conv2 (k=3, pad=1): shift by one timestep == shift rows by B, zero-filled ends.
    # Three taps lane-concatenated -> a single (L*B, 3C) x (3C, C) matmul.
    zrows = jnp.zeros((Bt, Co), f32)
    h1_prev = jnp.concatenate([zrows, h1[:-Bt]], axis=0)        # x[t-1]
    h1_next = jnp.concatenate([h1[Bt:], zrows], axis=0)         # x[t+1]
    taps = jnp.concatenate([h1_prev, h1, h1_next], axis=-1)     # (L*B, 3C)
    conv2 = jnp.dot(taps, w2_ref[...], preferred_element_type=f32)
    feat = jnp.maximum(conv2 * s2_ref[...] + t2_ref[...], 0.0)                 # (L*B, C)

    # ---------------- fused-gate LSTM cell (two full-vreg EUP passes) ----------------
    def cell(pre, c_prev):
        sg = jax.nn.sigmoid(pre)       # one EUP pass over the full (B, 4H) vreg
        th = jnp.tanh(pre)             # one EUP pass over the full (B, 4H) vreg
        i_g = sg[:, 0 * Ht:1 * Ht]
        f_g = sg[:, 1 * Ht:2 * Ht]
        g_g = th[:, 2 * Ht:3 * Ht]
        o_g = sg[:, 3 * Ht:4 * Ht]
        c_new = f_g * c_prev + i_g * g_g
        h_new = o_g * jnp.tanh(c_new)
        return h_new, c_new

    # ---------------- layer 0: fwd & bwd interleaved, xw kept in registers -------------
    xw0f = jnp.dot(feat, wih0f_ref[...], preferred_element_type=f32) + b0f_ref[...]
    xw0b = jnp.dot(feat, wih0b_ref[...], preferred_element_type=f32) + b0b_ref[...]
    whh0f = whh0f_ref[...]
    whh0b = whh0b_ref[...]

    hf = jnp.zeros((Bt, Ht), f32); cf = jnp.zeros((Bt, Ht), f32)
    hb = jnp.zeros((Bt, Ht), f32); cb = jnp.zeros((Bt, Ht), f32)
    for s in range(Lt):                       # fully unrolled; two independent chains
        tf = s
        tb = Lt - 1 - s
        pre_f = xw0f[tf * Bt:(tf + 1) * Bt, :] + jnp.dot(hf, whh0f,
                                                         preferred_element_type=f32)
        pre_b = xw0b[tb * Bt:(tb + 1) * Bt, :] + jnp.dot(hb, whh0b,
                                                         preferred_element_type=f32)
        hf, cf = cell(pre_f, cf)
        hb, cb = cell(pre_b, cb)
        seq_scr[tf * Bt:(tf + 1) * Bt, 0:Ht] = hf          # fwd output at time tf
        seq_scr[tb * Bt:(tb + 1) * Bt, Ht:2 * Ht] = hb     # bwd output at time tb

    seq = seq_scr[...]                                      # (L*B, 2H), lane-concatenated

    # ---------------- layer 1, forward (only the final hidden state is consumed) -------
    xw1f = jnp.dot(seq, wih1f_ref[...], preferred_element_type=f32) + b1f_ref[...]
    whh1f = whh1f_ref[...]
    h1f = jnp.zeros((Bt, Ht), f32); c1f = jnp.zeros((Bt, Ht), f32)
    for s in range(Lt):
        pre = xw1f[s * Bt:(s + 1) * Bt, :] + jnp.dot(h1f, whh1f,
                                                     preferred_element_type=f32)
        h1f, c1f = cell(pre, c1f)

    # ---------------- layer 1, backward: only its output at t = L-1 is consumed,
    # which is exactly one cell step from the zero state on input x_{L-1}. ------------
    pre_b = (jnp.dot(seq[(Lt - 1) * Bt:Lt * Bt, :], wih1b_ref[...],
                     preferred_element_type=f32) + b1b_ref[...])
    h1b, _ = cell(pre_b, jnp.zeros((Bt, Ht), f32))

    # ---------------- FC + sigmoid ----------------
    y = (jnp.dot(h1f, fcw_ref[0:Ht, :], preferred_element_type=f32)
         + jnp.dot(h1b, fcw_ref[Ht:2 * Ht, :], preferred_element_type=f32)
         + fcb_ref[...])
    out_ref[...] = jax.nn.sigmoid(y)


# ------------------------------- wrapper -----------------------------------------------
def model_forward(x, p):
    # x: (B, 1, L)  PyTorch NCL input
    Bo, _, Lo = x.shape
    xs = x[:, 0, :]                                        # (B, L)
    xpad = jnp.pad(xs, ((0, 0), (1, 1)))                   # (B, L+2)
    # time-major im2col: row r = t*B + b, columns [x[t-1], x[t], x[t+1]]
    cols = jnp.stack([xpad[:, k:k + Lo] for k in range(3)], axis=-1)   # (B, L, 3)
    xcols = jnp.transpose(cols, (1, 0, 2)).reshape(Lo * Bo, 3)
    # conv2 weights pre-reshaped to (3C, C) so the kernel does one tap matmul.
    w2cat = p["w2"].reshape(3 * p["w2"].shape[1], p["w2"].shape[2])

    return pl.pallas_call(
        fused_forward_kernel,
        out_shape=jax.ShapeDtypeStruct((Bo, 1), jnp.float32),
        in_specs=[_VMEM_SPEC] * 21,
        out_specs=_VMEM_SPEC,
        scratch_shapes=[
            pltpu.VMEM((Lo * Bo, 2 * H), jnp.float32),   # layer-0 outputs, lane-concat
        ],
    )(xcols, p["w1"], p["s1"], p["t1"], w2cat, p["s2"], p["t2"],
      p["wih_0_fwd"], p["whh_0_fwd"], p["b_0_fwd"],
      p["wih_0_bwd"], p["whh_0_bwd"], p["b_0_bwd"],
      p["wih_1_fwd"], p["whh_1_fwd"], p["b_1_fwd"],
      p["wih_1_bwd"], p["whh_1_bwd"], p["b_1_bwd"],
      p["fc_w"], p["fc_b"])


# ------------------------------ pure-JAX reference -------------------------------------
def reference_forward(x, p):
    HI = lax.Precision.HIGHEST
    Bo, _, Lo = x.shape
    xs = x[:, 0, :]
    xpad = jnp.pad(xs, ((0, 0), (1, 1)))
    conv1 = sum(xpad[:, k:k + Lo, None] * p["w1"][k][None, None, :] for k in range(3))
    h1 = jnp.maximum(conv1 * p["s1"] + p["t1"], 0.0)
    h1p = jnp.pad(h1, ((0, 0), (1, 1), (0, 0)))
    conv2 = sum(jnp.einsum("blc,cd->bld", h1p[:, k:k + Lo, :], p["w2"][k],
                           precision=HI) for k in range(3))
    h2 = jnp.maximum(conv2 * p["s2"] + p["t2"], 0.0)
    seq = jnp.transpose(h2, (1, 0, 2))                     # (L, B, C) time-major

    def lstm_ref(x_tbd, wih, whh, b):
        Ht = whh.shape[0]
        Bt = x_tbd.shape[1]

        def step(carry, xt):
            h, c = carry
            pre = (jnp.dot(xt, wih, precision=HI) + jnp.dot(h, whh, precision=HI) + b)
            i = jax.nn.sigmoid(pre[:, 0 * Ht:1 * Ht])
            f = jax.nn.sigmoid(pre[:, 1 * Ht:2 * Ht])
            g = jnp.tanh(pre[:, 2 * Ht:3 * Ht])
            o = jax.nn.sigmoid(pre[:, 3 * Ht:4 * Ht])
            c = f * c + i * g
            h = o * jnp.tanh(c)
            return (h, c), h

        init = (jnp.zeros((Bt, Ht), jnp.float32), jnp.zeros((Bt, Ht), jnp.float32))
        _, hs = lax.scan(step, init, x_tbd)
        return hs

    inp = seq
    for layer in range(NUM_LAYERS):
        fwd = lstm_ref(inp, p[f"wih_{layer}_fwd"], p[f"whh_{layer}_fwd"], p[f"b_{layer}_fwd"])
        bwd = lstm_ref(inp[::-1], p[f"wih_{layer}_bwd"], p[f"whh_{layer}_bwd"],
                       p[f"b_{layer}_bwd"])[::-1]
        inp = jnp.concatenate([fwd, bwd], axis=-1)
    last = inp[-1]
    return jax.nn.sigmoid(jnp.dot(last, p["fc_w"], precision=HI) + p["fc_b"])


# ------------------------------ parameter init -----------------------------------------
def init_params(key):
    def u(k, shape, scale):
        return jax.random.uniform(k, shape, jnp.float32, -scale, scale)

    keys = iter(jax.random.split(key, 32))
    p = {}

    # conv1 + bn1 (eval) fused to scale/shift
    p["w1"] = u(next(keys), (3, C), 0.3)
    b1 = u(next(keys), (C,), 0.1)
    g1 = 1.0 + u(next(keys), (C,), 0.1)
    be1 = u(next(keys), (C,), 0.1)
    m1 = u(next(keys), (C,), 0.1)
    v1 = 1.0 + u(next(keys), (C,), 0.1)
    s1 = g1 / jnp.sqrt(v1 + BN_EPS)
    p["s1"] = s1.reshape(1, C)
    p["t1"] = (be1 + (b1 - m1) * s1).reshape(1, C)

    # conv2 + bn2
    p["w2"] = u(next(keys), (3, C, C), 0.15)
    b2 = u(next(keys), (C,), 0.1)
    g2 = 1.0 + u(next(keys), (C,), 0.1)
    be2 = u(next(keys), (C,), 0.1)
    m2 = u(next(keys), (C,), 0.1)
    v2 = 1.0 + u(next(keys), (C,), 0.1)
    s2 = g2 / jnp.sqrt(v2 + BN_EPS)
    p["s2"] = s2.reshape(1, C)
    p["t2"] = (be2 + (b2 - m2) * s2).reshape(1, C)

    # bidirectional 2-layer LSTM, fused gates [i, f, g, o] along the 4H axis;
    # b = b_ih + b_hh.
    for layer, din in ((0, C), (1, 2 * H)):
        for d in ("fwd", "bwd"):
            p[f"wih_{layer}_{d}"] = u(next(keys), (din, 4 * H), 0.2)
            p[f"whh_{layer}_{d}"] = u(next(keys), (H, 4 * H), 0.2)
            p[f"b_{layer}_{d}"] = u(next(keys), (1, 4 * H), 0.1)

    # final Linear(2H -> 1)
    p["fc_w"] = u(next(keys), (2 * H, 1), 0.2)
    p["fc_b"] = u(next(keys), (1, 1), 0.1)
    return p


# ----------------------------------- main -----------------------------------------------
if __name__ == "__main__":
    root = jax.random.PRNGKey(0)
    k_params, k_x = jax.random.split(root)
    params = init_params(k_params)
    x = jax.random.normal(k_x, (B, 1, L), jnp.float32)    # PyTorch NCL input

    fwd = jax.jit(model_forward)
    out = jax.block_until_ready(fwd(x, params))           # (B, 1)

    ref = reference_forward(x, params)
    assert out.shape == (B, 1)
    err = float(jnp.max(jnp.abs(out - ref)))
    assert err < 1e-3, f"max abs err {err}"

    print("KERNEL_OK")
</pallas_src>

<mosaic_0001>
module attributes {stable_mosaic.version = 11 : i64} {
  func.func @fused_forward_kernel(%arg0: memref<32x3xf32, #tpu.memory_space<vmem>>, %arg1: memref<3x16xf32, #tpu.memory_space<vmem>>, %arg2: memref<1x16xf32, #tpu.memory_space<vmem>>, %arg3: memref<1x16xf32, #tpu.memory_space<vmem>>, %arg4: memref<48x16xf32, #tpu.memory_space<vmem>>, %arg5: memref<1x16xf32, #tpu.memory_space<vmem>>, %arg6: memref<1x16xf32, #tpu.memory_space<vmem>>, %arg7: memref<16x128xf32, #tpu.memory_space<vmem>>, %arg8: memref<32x128xf32, #tpu.memory_space<vmem>>, %arg9: memref<1x128xf32, #tpu.memory_space<vmem>>, %arg10: memref<16x128xf32, #tpu.memory_space<vmem>>, %arg11: memref<32x128xf32, #tpu.memory_space<vmem>>, %arg12: memref<1x128xf32, #tpu.memory_space<vmem>>, %arg13: memref<64x128xf32, #tpu.memory_space<vmem>>, %arg14: memref<32x128xf32, #tpu.memory_space<vmem>>, %arg15: memref<1x128xf32, #tpu.memory_space<vmem>>, %arg16: memref<64x128xf32, #tpu.memory_space<vmem>>, %arg17: memref<32x128xf32, #tpu.memory_space<vmem>>, %arg18: memref<1x128xf32, #tpu.memory_space<vmem>>, %arg19: memref<64x1xf32, #tpu.memory_space<vmem>>, %arg20: memref<1x1xf32, #tpu.memory_space<vmem>>, %arg21: memref<2x1xf32, #tpu.memory_space<vmem>>, %arg22: memref<32x64xf32, #tpu.memory_space<vmem>>) attributes {dimension_semantics = [], scalar_prefetch = 0 : i64, scratch_operands = 1 : i64, tpu.core_type = #tpu.core_type<tc>} {
    %c0 = arith.constant 0 : index
    %c0_0 = arith.constant 0 : index
    %0 = vector.load %arg0[%c0, %c0_0] : memref<32x3xf32, #tpu.memory_space<vmem>>, vector<32x3xf32>
    %c0_1 = arith.constant 0 : index
    %c0_2 = arith.constant 0 : index
    %1 = vector.load %arg1[%c0_1, %c0_2] : memref<3x16xf32, #tpu.memory_space<vmem>>, vector<3x16xf32>
    %cst = arith.constant dense<0.000000e+00> : vector<32x16xf32>
    %2 = tpu.matmul %0, %1, %cst {dimension_numbers = #tpu.dot_dimension_numbers<[1], [0], [0], [1], [0, 0, 1, 1], [], []>} : vector<32x3xf32>, vector<3x16xf32>, vector<32x16xf32> -> vector<32x16xf32>
    %c0_3 = arith.constant 0 : index
    %c0_4 = arith.constant 0 : index
    %3 = vector.load %arg2[%c0_3, %c0_4] : memref<1x16xf32, #tpu.memory_space<vmem>>, vector<1x16xf32>
    %4 = vector.broadcast %3 : vector<1x16xf32> to vector<32x16xf32>
    %5 = arith.mulf %2, %4 : vector<32x16xf32>
    %c0_5 = arith.constant 0 : index
    %c0_6 = arith.constant 0 : index
    %6 = vector.load %arg3[%c0_5, %c0_6] : memref<1x16xf32, #tpu.memory_space<vmem>>, vector<1x16xf32>
    %7 = vector.broadcast %6 : vector<1x16xf32> to vector<32x16xf32>
    %8 = arith.addf %5, %7 : vector<32x16xf32>
    %cst_7 = arith.constant 0.000000e+00 : f32
    %9 = vector.broadcast %cst_7 : f32 to vector<32x16xf32>
    %10 = arith.maximumf %8, %9 : vector<32x16xf32>
    %cst_8 = arith.constant 0.000000e+00 : f32
    %11 = vector.broadcast %cst_8 : f32 to vector<2x16xf32>
    %12 = vector.extract_strided_slice %10 {offsets = [0, 0], sizes = [30, 16], strides = [1, 1]} : vector<32x16xf32> to vector<30x16xf32>
    %13 = tpu.concatenate %11, %12 in 0 : vector<2x16xf32>, vector<30x16xf32> -> vector<32x16xf32>
    %14 = vector.extract_strided_slice %10 {offsets = [2, 0], sizes = [30, 16], strides = [1, 1]} : vector<32x16xf32> to vector<30x16xf32>
    %15 = tpu.concatenate %14, %11 in 0 : vector<30x16xf32>, vector<2x16xf32> -> vector<32x16xf32>
    %16 = tpu.concatenate %13, %10, %15 in 1 : vector<32x16xf32>, vector<32x16xf32>, vector<32x16xf32> -> vector<32x48xf32>
    %c0_9 = arith.constant 0 : index
    %c0_10 = arith.constant 0 : index
    %17 = vector.load %arg4[%c0_9, %c0_10] : memref<48x16xf32, #tpu.memory_space<vmem>>, vector<48x16xf32>
    %cst_11 = arith.constant dense<0.000000e+00> : vector<32x16xf32>
    %18 = tpu.matmul %16, %17, %cst_11 {dimension_numbers = #tpu.dot_dimension_numbers<[1], [0], [0], [1], [0, 0, 1, 1], [], []>} : vector<32x48xf32>, vector<48x16xf32>, vector<32x16xf32> -> vector<32x16xf32>
    %c0_12 = arith.constant 0 : index
    %c0_13 = arith.constant 0 : index
    %19 = vector.load %arg5[%c0_12, %c0_13] : memref<1x16xf32, #tpu.memory_space<vmem>>, vector<1x16xf32>
    %20 = vector.broadcast %19 : vector<1x16xf32> to vector<32x16xf32>
    %21 = arith.mulf %18, %20 : vector<32x16xf32>
    %c0_14 = arith.constant 0 : index
    %c0_15 = arith.constant 0 : index
    %22 = vector.load %arg6[%c0_14, %c0_15] : memref<1x16xf32, #tpu.memory_space<vmem>>, vector<1x16xf32>
    %23 = vector.broadcast %22 : vector<1x16xf32> to vector<32x16xf32>
    %24 = arith.addf %21, %23 : vector<32x16xf32>
    %cst_16 = arith.constant 0.000000e+00 : f32
    %25 = vector.broadcast %cst_16 : f32 to vector<32x16xf32>
    %26 = arith.maximumf %24, %25 : vector<32x16xf32>
    %c0_17 = arith.constant 0 : index
    %c0_18 = arith.constant 0 : index
    %27 = vector.load %arg7[%c0_17, %c0_18] : memref<16x128xf32, #tpu.memory_space<vmem>>, vector<16x128xf32>
    %cst_19 = arith.constant dense<0.000000e+00> : vector<32x128xf32>
    %28 = tpu.matmul %26, %27, %cst_19 {dimension_numbers = #tpu.dot_dimension_numbers<[1], [0], [0], [1], [0, 0, 1, 1], [], []>} : vector<32x16xf32>, vector<16x128xf32>, vector<32x128xf32> -> vector<32x128xf32>
    %c0_20 = arith.constant 0 : index
    %c0_21 = arith.constant 0 : index
    %29 = vector.load %arg9[%c0_20, %c0_21] : memref<1x128xf32, #tpu.memory_space<vmem>>, vector<1x128xf32>
    %30 = vector.broadcast %29 : vector<1x128xf32> to vector<32x128xf32>
    %31 = arith.addf %28, %30 : vector<32x128xf32>
    %c0_22 = arith.constant 0 : index
    %c0_23 = arith.constant 0 : index
    %32 = vector.load %arg10[%c0_22, %c0_23] : memref<16x128xf32, #tpu.memory_space<vmem>>, vector<16x128xf32>
    %cst_24 = arith.constant dense<0.000000e+00> : vector<32x128xf32>
    %33 = tpu.matmul %26, %32, %cst_24 {dimension_numbers = #tpu.dot_dimension_numbers<[1], [0], [0], [1], [0, 0, 1, 1], [], []>} : vector<32x16xf32>, vector<16x128xf32>, vector<32x128xf32> -> vector<32x128xf32>
    %c0_25 = arith.constant 0 : index
    %c0_26 = arith.constant 0 : index
    %34 = vector.load %arg12[%c0_25, %c0_26] : memref<1x128xf32, #tpu.memory_space<vmem>>, vector<1x128xf32>
    %35 = vector.broadcast %34 : vector<1x128xf32> to vector<32x128xf32>
    %36 = arith.addf %33, %35 : vector<32x128xf32>
    %c0_27 = arith.constant 0 : index
    %c0_28 = arith.constant 0 : index
    %37 = vector.load %arg8[%c0_27, %c0_28] : memref<32x128xf32, #tpu.memory_space<vmem>>, vector<32x128xf32>
    %c0_29 = arith.constant 0 : index
    %c0_30 = arith.constant 0 : index
    %38 = vector.load %arg11[%c0_29, %c0_30] : memref<32x128xf32, #tpu.memory_space<vmem>>, vector<32x128xf32>
    %cst_31 = arith.constant 0.000000e+00 : f32
    %39 = vector.broadcast %cst_31 : f32 to vector<2x32xf32>
    %cst_32 = arith.constant 0.000000e+00 : f32
    %40 = vector.broadcast %cst_32 : f32 to vector<2x32xf32>
    %cst_33 = arith.constant 0.000000e+00 : f32
    %41 = vector.broadcast %cst_33 : f32 to vector<2x32xf32>
    %cst_34 = arith.constant 0.000000e+00 : f32
    %42 = vector.broadcast %cst_34 : f32 to vector<2x32xf32>
    %43 = vector.extract_strided_slice %31 {offsets = [0, 0], sizes = [2, 128], strides = [1, 1]} : vector<32x128xf32> to vector<2x128xf32>
    %cst_35 = arith.constant dense<0.000000e+00> : vector<2x128xf32>
    %44 = tpu.matmul %39, %37, %cst_35 {dimension_numbers = #tpu.dot_dimension_numbers<[1], [0], [0], [1], [0, 0, 1, 1], [], []>} : vector<2x32xf32>, vector<32x128xf32>, vector<2x128xf32> -> vector<2x128xf32>
    %45 = arith.addf %43, %44 : vector<2x128xf32>
    %46 = vector.extract_strided_slice %36 {offsets = [30, 0], sizes = [2, 128], strides = [1, 1]} : vector<32x128xf32> to vector<2x128xf32>
    %cst_36 = arith.constant dense<0.000000e+00> : vector<2x128xf32>
    %47 = tpu.matmul %41, %38, %cst_36 {dimension_numbers = #tpu.dot_dimension_numbers<[1], [0], [0], [1], [0, 0, 1, 1], [], []>} : vector<2x32xf32>, vector<32x128xf32>, vector<2x128xf32> -> vector<2x128xf32>
    %48 = arith.addf %46, %47 : vector<2x128xf32>
    %49 = arith.negf %45 : vector<2x128xf32>
    %50 = math.exp %49 : vector<2x128xf32>
    %cst_37 = arith.constant 1.000000e+00 : f32
    %51 = vector.broadcast %cst_37 : f32 to vector<2x128xf32>
    %52 = arith.addf %51, %50 : vector<2x128xf32>
    %53 = arith.divf %51, %52 : vector<2x128xf32>
    %54 = math.tanh %45 : vector<2x128xf32>
    %55 = vector.extract_strided_slice %53 {offsets = [0, 0], sizes = [2, 32], strides = [1, 1]} : vector<2x128xf32> to vector<2x32xf32>
    %56 = vector.extract_strided_slice %53 {offsets = [0, 32], sizes = [2, 32], strides = [1, 1]} : vector<2x128xf32> to vector<2x32xf32>
    %57 = vector.extract_strided_slice %54 {offsets = [0, 64], sizes = [2, 32], strides = [1, 1]} : vector<2x128xf32> to vector<2x32xf32>
    %58 = vector.extract_strided_slice %53 {offsets = [0, 96], sizes = [2, 32], strides = [1, 1]} : vector<2x128xf32> to vector<2x32xf32>
    %59 = arith.mulf %56, %40 : vector<2x32xf32>
    %60 = arith.mulf %55, %57 : vector<2x32xf32>
    %61 = arith.addf %59, %60 : vector<2x32xf32>
    %62 = math.tanh %61 : vector<2x32xf32>
    %63 = arith.mulf %58, %62 : vector<2x32xf32>
    %64 = arith.negf %48 : vector<2x128xf32>
    %65 = math.exp %64 : vector<2x128xf32>
    %cst_38 = arith.constant 1.000000e+00 : f32
    %66 = vector.broadcast %cst_38 : f32 to vector<2x128xf32>
    %67 = arith.addf %66, %65 : vector<2x128xf32>
    %68 = arith.divf %66, %67 : vector<2x128xf32>
    %69 = math.tanh %48 : vector<2x128xf32>
    %70 = vector.extract_strided_slice %68 {offsets = [0, 0], sizes = [2, 32], strides = [1, 1]} : vector<2x128xf32> to vector<2x32xf32>
    %71 = vector.extract_strided_slice %68 {offsets = [0, 32], sizes = [2, 32], strides = [1, 1]} : vector<2x128xf32> to vector<2x32xf32>
    %72 = vector.extract_strided_slice %69 {offsets = [0, 64], sizes = [2, 32], strides = [1, 1]} : vector<2x128xf32> to vector<2x32xf32>
    %73 = vector.extract_strided_slice %68 {offsets = [0, 96], sizes = [2, 32], strides = [1, 1]} : vector<2x128xf32> to vector<2x32xf32>
    %74 = arith.mulf %71, %42 : vector<2x32xf32>
    %75 = arith.mulf %70, %72 : vector<2x32xf32>
    %76 = arith.addf %74, %75 : vector<2x32xf32>
    %77 = math.tanh %76 : vector<2x32xf32>
    %78 = arith.mulf %73, %77 : vector<2x32xf32>
    %c0_39 = arith.constant 0 : index
    %c0_40 = arith.constant 0 : index
    %79 = vector.load %arg22[%c0_39, %c0_40] : memref<32x64xf32, #tpu.memory_space<vmem>>, vector<2x32xf32>
    tpu.vector_store %arg22[%c0_39, %c0_40], %63 {strides = array<i32>} : memref<32x64xf32, #tpu.memory_space<vmem>>, vector<2x32xf32>,
    %c30 = arith.constant 30 : index
    %c32 = arith.constant 32 : index
    %80 = vector.load %arg22[%c30, %c32] : memref<32x64xf32, #tpu.memory_space<vmem>>, vector<2x32xf32>
    tpu.vector_store %arg22[%c30, %c32], %78 {strides = array<i32>} : memref<32x64xf32, #tpu.memory_space<vmem>>, vector<2x32xf32>,
    %81 = vector.extract_strided_slice %31 {offsets = [2, 0], sizes = [2, 128], strides = [1, 1]} : vector<32x128xf32> to vector<2x128xf32>
    %cst_41 = arith.constant dense<0.000000e+00> : vector<2x128xf32>
    %82 = tpu.matmul %63, %37, %cst_41 {dimension_numbers = #tpu.dot_dimension_numbers<[1], [0], [0], [1], [0, 0, 1, 1], [], []>} : vector<2x32xf32>, vector<32x128xf32>, vector<2x128xf32> -> vector<2x128xf32>
    %83 = arith.addf %81, %82 : vector<2x128xf32>
    %84 = vector.extract_strided_slice %36 {offsets = [28, 0], sizes = [2, 128], strides = [1, 1]} : vector<32x128xf32> to vector<2x128xf32>
    %cst_42 = arith.constant dense<0.000000e+00> : vector<2x128xf32>
    %85 = tpu.matmul %78, %38, %cst_42 {dimension_numbers = #tpu.dot_dimension_numbers<[1], [0], [0], [1], [0, 0, 1, 1], [], []>} : vector<2x32xf32>, vector<32x128xf32>, vector<2x128xf32> -> vector<2x128xf32>
    %86 = arith.addf %84, %85 : vector<2x128xf32>
    %87 = arith.negf %83 : vector<2x128xf32>
    %88 = math.exp %87 : vector<2x128xf32>
    %cst_43 = arith.constant 1.000000e+00 : f32
    %89 = vector.broadcast %cst_43 : f32 to vector<2x128xf32>
    %90 = arith.addf %89, %88 : vector<2x128xf32>
    %91 = arith.divf %89, %90 : vector<2x128xf32>
    %92 = math.tanh %83 : vector<2x128xf32>
    %93 = vector.extract_strided_slice %91 {offsets = [0, 0], sizes = [2, 32], strides = [1, 1]} : vector<2x128xf32> to vector<2x32xf32>
    %94 = vector.extract_strided_slice %91 {offsets = [0, 32], sizes = [2, 32], strides = [1, 1]} : vector<2x128xf32> to vector<2x32xf32>
    %95 = vector.extract_strided_slice %92 {offsets = [0, 64], sizes = [2, 32], strides = [1, 1]} : vector<2x128xf32> to vector<2x32xf32>
    %96 = vector.extract_strided_slice %91 {offsets = [0, 96], sizes = [2, 32], strides = [1, 1]} : vector<2x128xf32> to vector<2x32xf32>
    %97 = arith.mulf %94, %61 : vector<2x32xf32>
    %98 = arith.mulf %93, %95 : vector<2x32xf32>
    %99 = arith.addf %97, %98 : vector<2x32xf32>
    %100 = math.tanh %99 : vector<2x32xf32>
    %101 = arith.mulf %96, %100 : vector<2x32xf32>
    %102 = arith.negf %86 : vector<2x128xf32>
    %103 = math.exp %102 : vector<2x128xf32>
    %cst_44 = arith.constant 1.000000e+00 : f32
    %104 = vector.broadcast %cst_44 : f32 to vector<2x128xf32>
    %105 = arith.addf %104, %103 : vector<2x128xf32>
    %106 = arith.divf %104, %105 : vector<2x128xf32>
    %107 = math.tanh %86 : vector<2x128xf32>
    %108 = vector.extract_strided_slice %106 {offsets = [0, 0], sizes = [2, 32], strides = [1, 1]} : vector<2x128xf32> to vector<2x32xf32>
    %109 = vector.extract_strided_slice %106 {offsets = [0, 32], sizes = [2, 32], strides = [1, 1]} : vector<2x128xf32> to vector<2x32xf32>
    %110 = vector.extract_strided_slice %107 {offsets = [0, 64], sizes = [2, 32], strides = [1, 1]} : vector<2x128xf32> to vector<2x32xf32>
    %111 = vector.extract_strided_slice %106 {offsets = [0, 96], sizes = [2, 32], strides = [1, 1]} : vector<2x128xf32> to vector<2x32xf32>
    %112 = arith.mulf %109, %76 : vector<2x32xf32>
    %113 = arith.mulf %108, %110 : vector<2x32xf32>
    %114 = arith.addf %112, %113 : vector<2x32xf32>
    %115 = math.tanh %114 : vector<2x32xf32>
    %116 = arith.mulf %111, %115 : vector<2x32xf32>
    %c2 = arith.constant 2 : index
    %c0_45 = arith.constant 0 : index
    %117 = vector.load %arg22[%c2, %c0_45] : memref<32x64xf32, #tpu.memory_space<vmem>>, vector<2x32xf32>
    tpu.vector_store %arg22[%c2, %c0_45], %101 {strides = array<i32>} : memref<32x64xf32, #tpu.memory_space<vmem>>, vector<2x32xf32>,
    %c28 = arith.constant 28 : index
    %c32_46 = arith.constant 32 : index
    %118 = vector.load %arg22[%c28, %c32_46] : memref<32x64xf32, #tpu.memory_space<vmem>>, vector<2x32xf32>
    tpu.vector_store %arg22[%c28, %c32_46], %116 {strides = array<i32>} : memref<32x64xf32, #tpu.memory_space<vmem>>, vector<2x32xf32>,
    %119 = vector.extract_strided_slice %31 {offsets = [4, 0], sizes = [2, 128], strides = [1, 1]} : vector<32x128xf32> to vector<2x128xf32>
    %cst_47 = arith.constant dense<0.000000e+00> : vector<2x128xf32>
    %120 = tpu.matmul %101, %37, %cst_47 {dimension_numbers = #tpu.dot_dimension_numbers<[1], [0], [0], [1], [0, 0, 1, 1], [], []>} : vector<2x32xf32>, vector<32x128xf32>, vector<2x128xf32> -> vector<2x128xf32>
    %121 = arith.addf %119, %120 : vector<2x128xf32>
    %122 = vector.extract_strided_slice %36 {offsets = [26, 0], sizes = [2, 128], strides = [1, 1]} : vector<32x128xf32> to vector<2x128xf32>
    %cst_48 = arith.constant dense<0.000000e+00> : vector<2x128xf32>
    %123 = tpu.matmul %116, %38, %cst_48 {dimension_numbers = #tpu.dot_dimension_numbers<[1], [0], [0], [1], [0, 0, 1, 1], [], []>} : vector<2x32xf32>, vector<32x128xf32>, vector<2x128xf32> -> vector<2x128xf32>
    %124 = arith.addf %122, %123 : vector<2x128xf32>
    %125 = arith.negf %121 : vector<2x128xf32>
    %126 = math.exp %125 : vector<2x128xf32>
    %cst_49 = arith.constant 1.000000e+00 : f32
    %127 = vector.broadcast %cst_49 : f32 to vector<2x128xf32>
    %128 = arith.addf %127, %126 : vector<2x128xf32>
    %129 = arith.divf %127, %128 : vector<2x128xf32>
    %130 = math.tanh %121 : vector<2x128xf32>
    %131 = vector.extract_strided_slice %129 {offsets = [0, 0], sizes = [2, 32], strides = [1, 1]} : vector<2x128xf32> to vector<2x32xf32>
    %132 = vector.extract_strided_slice %129 {offsets = [0, 32], sizes = [2, 32], strides = [1, 1]} : vector<2x128xf32> to vector<2x32xf32>
    %133 = vector.extract_strided_slice %130 {offsets = [0, 64], sizes = [2, 32], strides = [1, 1]} : vector<2x128xf32> to vector<2x32xf32>
    %134 = vector.extract_strided_slice %129 {offsets = [0, 96], sizes = [2, 32], strides = [1, 1]} : vector<2x128xf32> to vector<2x32xf32>
    %135 = arith.mulf %132, %99 : vector<2x32xf32>
    %136 = arith.mulf %131, %133 : vector<2x32xf32>
    %137 = arith.addf %135, %136 : vector<2x32xf32>
    %138 = math.tanh %137 : vector<2x32xf32>
    %139 = arith.mulf %134, %138 : vector<2x32xf32>
    %140 = arith.negf %124 : vector<2x128xf32>
    %141 = math.exp %140 : vector<2x128xf32>
    %cst_50 = arith.constant 1.000000e+00 : f32
    %142 = vector.broadcast %cst_50 : f32 to vector<2x128xf32>
    %143 = arith.addf %142, %141 : vector<2x128xf32>
    %144 = arith.divf %142, %143 : vector<2x128xf32>
    %145 = math.tanh %124 : vector<2x128xf32>
    %146 = vector.extract_strided_slice %144 {offsets = [0, 0], sizes = [2, 32], strides = [1, 1]} : vector<2x128xf32> to vector<2x32xf32>
    %147 = vector.extract_strided_slice %144 {offsets = [0, 32], sizes = [2, 32], strides = [1, 1]} : vector<2x128xf32> to vector<2x32xf32>
    %148 = vector.extract_strided_slice %145 {offsets = [0, 64], sizes = [2, 32], strides = [1, 1]} : vector<2x128xf32> to vector<2x32xf32>
    %149 = vector.extract_strided_slice %144 {offsets = [0, 96], sizes = [2, 32], strides = [1, 1]} : vector<2x128xf32> to vector<2x32xf32>
    %150 = arith.mulf %147, %114 : vector<2x32xf32>
    %151 = arith.mulf %146, %148 : vector<2x32xf32>
    %152 = arith.addf %150, %151 : vector<2x32xf32>
    %153 = math.tanh %152 : vector<2x32xf32>
    %154 = arith.mulf %149, %153 : vector<2x32xf32>
    %c4 = arith.constant 4 : index
    %c0_51 = arith.constant 0 : index
    %155 = vector.load %arg22[%c4, %c0_51] : memref<32x64xf32, #tpu.memory_space<vmem>>, vector<2x32xf32>
    tpu.vector_store %arg22[%c4, %c0_51], %139 {strides = array<i32>} : memref<32x64xf32, #tpu.memory_space<vmem>>, vector<2x32xf32>,
    %c26 = arith.constant 26 : index
    %c32_52 = arith.constant 32 : index
    %156 = vector.load %arg22[%c26, %c32_52] : memref<32x64xf32, #tpu.memory_space<vmem>>, vector<2x32xf32>
    tpu.vector_store %arg22[%c26, %c32_52], %154 {strides = array<i32>} : memref<32x64xf32, #tpu.memory_space<vmem>>, vector<2x32xf32>,
    %157 = vector.extract_strided_slice %31 {offsets = [6, 0], sizes = [2, 128], strides = [1, 1]} : vector<32x128xf32> to vector<2x128xf32>
    %cst_53 = arith.constant dense<0.000000e+00> : vector<2x128xf32>
    %158 = tpu.matmul %139, %37, %cst_53 {dimension_numbers = #tpu.dot_dimension_numbers<[1], [0], [0], [1], [0, 0, 1, 1], [], []>} : vector<2x32xf32>, vector<32x128xf32>, vector<2x128xf32> -> vector<2x128xf32>
    %159 = arith.addf %157, %158 : vector<2x128xf32>
    %160 = vector.extract_strided_slice %36 {offsets = [24, 0], sizes = [2, 128], strides = [1, 1]} : vector<32x128xf32> to vector<2x128xf32>
    %cst_54 = arith.constant dense<0.000000e+00> : vector<2x128xf32>
    %161 = tpu.matmul %154, %38, %cst_54 {dimension_numbers = #tpu.dot_dimension_numbers<[1], [0], [0], [1], [0, 0, 1, 1], [], []>} : vector<2x32xf32>, vector<32x128xf32>, vector<2x128xf32> -> vector<2x128xf32>
    %162 = arith.addf %160, %161 : vector<2x128xf32>
    %163 = arith.negf %159 : vector<2x128xf32>
    %164 = math.exp %163 : vector<2x128xf32>
    %cst_55 = arith.constant 1.000000e+00 : f32
    %165 = vector.broadcast %cst_55 : f32 to vector<2x128xf32>
    %166 = arith.addf %165, %164 : vector<2x128xf32>
    %167 = arith.divf %165, %166 : vector<2x128xf32>
    %168 = math.tanh %159 : vector<2x128xf32>
    %169 = vector.extract_strided_slice %167 {offsets = [0, 0], sizes = [2, 32], strides = [1, 1]} : vector<2x128xf32> to vector<2x32xf32>
    %170 = vector.extract_strided_slice %167 {offsets = [0, 32], sizes = [2, 32], strides = [1, 1]} : vector<2x128xf32> to vector<2x32xf32>
    %171 = vector.extract_strided_slice %168 {offsets = [0, 64], sizes = [2, 32], strides = [1, 1]} : vector<2x128xf32> to vector<2x32xf32>
    %172 = vector.extract_strided_slice %167 {offsets = [0, 96], sizes = [2, 32], strides = [1, 1]} : vector<2x128xf32> to vector<2x32xf32>
    %173 = arith.mulf %170, %137 : vector<2x32xf32>
    %174 = arith.mulf %169, %171 : vector<2x32xf32>
    %175 = arith.addf %173, %174 : vector<2x32xf32>
    %176 = math.tanh %175 : vector<2x32xf32>
    %177 = arith.mulf %172, %176 : vector<2x32xf32>
    %178 = arith.negf %162 : vector<2x128xf32>
    %179 = math.exp %178 : vector<2x128xf32>
    %cst_56 = arith.constant 1.000000e+00 : f32
    %180 = vector.broadcast %cst_56 : f32 to vector<2x128xf32>
    %181 = arith.addf %180, %179 : vector<2x128xf32>
    %182 = arith.divf %180, %181 : vector<2x128xf32>
    %183 = math.tanh %162 : vector<2x128xf32>
    %184 = vector.extract_strided_slice %182 {offsets = [0, 0], sizes = [2, 32], strides = [1, 1]} : vector<2x128xf32> to vector<2x32xf32>
    %185 = vector.extract_strided_slice %182 {offsets = [0, 32], sizes = [2, 32], strides = [1, 1]} : vector<2x128xf32> to vector<2x32xf32>
    %186 = vector.extract_strided_slice %183 {offsets = [0, 64], sizes = [2, 32], strides = [1, 1]} : vector<2x128xf32> to vector<2x32xf32>
    %187 = vector.extract_strided_slice %182 {offsets = [0, 96], sizes = [2, 32], strides = [1, 1]} : vector<2x128xf32> to vector<2x32xf32>
    %188 = arith.mulf %185, %152 : vector<2x32xf32>
    %189 = arith.mulf %184, %186 : vector<2x32xf32>
    %190 = arith.addf %188, %189 : vector<2x32xf32>
    %191 = math.tanh %190 : vector<2x32xf32>
    %192 = arith.mulf %187, %191 : vector<2x32xf32>
    %c6 = arith.constant 6 : index
    %c0_57 = arith.constant 0 : index
    %193 = vector.load %arg22[%c6, %c0_57] : memref<32x64xf32, #tpu.memory_space<vmem>>, vector<2x32xf32>
    tpu.vector_store %arg22[%c6, %c0_57], %177 {strides = array<i32>} : memref<32x64xf32, #tpu.memory_space<vmem>>, vector<2x32xf32>,
    %c24 = arith.constant 24 : index
    %c32_58 = arith.constant 32 : index
    %194 = vector.load %arg22[%c24, %c32_58] : memref<32x64xf32, #tpu.memory_space<vmem>>, vector<2x32xf32>
    tpu.vector_store %arg22[%c24, %c32_58], %192 {strides = array<i32>} : memref<32x64xf32, #tpu.memory_space<vmem>>, vector<2x32xf32>,
    %195 = vector.extract_strided_slice %31 {offsets = [8, 0], sizes = [2, 128], strides = [1, 1]} : vector<32x128xf32> to vector<2x128xf32>
    %cst_59 = arith.constant dense<0.000000e+00> : vector<2x128xf32>
    %196 = tpu.matmul %177, %37, %cst_59 {dimension_numbers = #tpu.dot_dimension_numbers<[1], [0], [0], [1], [0, 0, 1, 1], [], []>} : vector<2x32xf32>, vector<32x128xf32>, vector<2x128xf32> -> vector<2x128xf32>
    %197 = arith.addf %195, %196 : vector<2x128xf32>
    %198 = vector.extract_strided_slice %36 {offsets = [22, 0], sizes = [2, 128], strides = [1, 1]} : vector<32x128xf32> to vector<2x128xf32>
    %cst_60 = arith.constant dense<0.000000e+00> : vector<2x128xf32>
    %199 = tpu.matmul %192, %38, %cst_60 {dimension_numbers = #tpu.dot_dimension_numbers<[1], [0], [0], [1], [0, 0, 1, 1], [], []>} : vector<2x32xf32>, vector<32x128xf32>, vector<2x128xf32> -> vector<2x128xf32>
    %200 = arith.addf %198, %199 : vector<2x128xf32>
    %201 = arith.negf %197 : vector<2x128xf32>
    %202 = math.exp %201 : vector<2x128xf32>
    %cst_61 = arith.constant 1.000000e+00 : f32
    %203 = vector.broadcast %cst_61 : f32 to vector<2x128xf32>
    %204 = arith.addf %203, %202 : vector<2x128xf32>
    %205 = arith.divf %203, %204 : vector<2x128xf32>
    %206 = math.tanh %197 : vector<2x128xf32>
    %207 = vector.extract_strided_slice %205 {offsets = [0, 0], sizes = [2, 32], strides = [1, 1]} : vector<2x128xf32> to vector<2x32xf32>
    %208 = vector.extract_strided_slice %205 {offsets = [0, 32], sizes = [2, 32], strides = [1, 1]} : vector<2x128xf32> to vector<2x32xf32>
    %209 = vector.extract_strided_slice %206 {offsets = [0, 64], sizes = [2, 32], strides = [1, 1]} : vector<2x128xf32> to vector<2x32xf32>
    %210 = vector.extract_strided_slice %205 {offsets = [0, 96], sizes = [2, 32], strides = [1, 1]} : vector<2x128xf32> to vector<2x32xf32>
    %211 = arith.mulf %208, %175 : vector<2x32xf32>
    %212 = arith.mulf %207, %209 : vector<2x32xf32>
    %213 = arith.addf %211, %212 : vector<2x32xf32>
    %214 = math.tanh %213 : vector<2x32xf32>
    %215 = arith.mulf %210, %214 : vector<2x32xf32>
    %216 = arith.negf %200 : vector<2x128xf32>
    %217 = math.exp %216 : vector<2x128xf32>
    %cst_62 = arith.constant 1.000000e+00 : f32
    %218 = vector.broadcast %cst_62 : f32 to vector<2x128xf32>
    %219 = arith.addf %218, %217 : vector<2x128xf32>
    %220 = arith.divf %218, %219 : vector<2x128xf32>
    %221 = math.tanh %200 : vector<2x128xf32>
    %222 = vector.extract_strided_slice %220 {offsets = [0, 0], sizes = [2, 32], strides = [1, 1]} : vector<2x128xf32> to vector<2x32xf32>
    %223 = vector.extract_strided_slice %220 {offsets = [0, 32], sizes = [2, 32], strides = [1, 1]} : vector<2x128xf32> to vector<2x32xf32>
    %224 = vector.extract_strided_slice %221 {offsets = [0, 64], sizes = [2, 32], strides = [1, 1]} : vector<2x128xf32> to vector<2x32xf32>
    %225 = vector.extract_strided_slice %220 {offsets = [0, 96], sizes = [2, 32], strides = [1, 1]} : vector<2x128xf32> to vector<2x32xf32>
    %226 = arith.mulf %223, %190 : vector<2x32xf32>
    %227 = arith.mulf %222, %224 : vector<2x32xf32>
    %228 = arith.addf %226, %227 : vector<2x32xf32>
    %229 = math.tanh %228 : vector<2x32xf32>
    %230 = arith.mulf %225, %229 : vector<2x32xf32>
    %c8 = arith.constant 8 : index
    %c0_63 = arith.constant 0 : index
    %231 = vector.load %arg22[%c8, %c0_63] : memref<32x64xf32, #tpu.memory_space<vmem>>, vector<2x32xf32>
    tpu.vector_store %arg22[%c8, %c0_63], %215 {strides = array<i32>} : memref<32x64xf32, #tpu.memory_space<vmem>>, vector<2x32xf32>,
    %c22 = arith.constant 22 : index
    %c32_64 = arith.constant 32 : index
    %232 = vector.load %arg22[%c22, %c32_64] : memref<32x64xf32, #tpu.memory_space<vmem>>, vector<2x32xf32>
    tpu.vector_store %arg22[%c22, %c32_64], %230 {strides = array<i32>} : memref<32x64xf32, #tpu.memory_space<vmem>>, vector<2x32xf32>,
    %233 = vector.extract_strided_slice %31 {offsets = [10, 0], sizes = [2, 128], strides = [1, 1]} : vector<32x128xf32> to vector<2x128xf32>
    %cst_65 = arith.constant dense<0.000000e+00> : vector<2x128xf32>
    %234 = tpu.matmul %215, %37, %cst_65 {dimension_numbers = #tpu.dot_dimension_numbers<[1], [0], [0], [1], [0, 0, 1, 1], [], []>} : vector<2x32xf32>, vector<32x128xf32>, vector<2x128xf32> -> vector<2x128xf32>
    %235 = arith.addf %233, %234 : vector<2x128xf32>
    %236 = vector.extract_strided_slice %36 {offsets = [20, 0], sizes = [2, 128], strides = [1, 1]} : vector<32x128xf32> to vector<2x128xf32>
    %cst_66 = arith.constant dense<0.000000e+00> : vector<2x128xf32>
    %237 = tpu.matmul %230, %38, %cst_66 {dimension_numbers = #tpu.dot_dimension_numbers<[1], [0], [0], [1], [0, 0, 1, 1], [], []>} : vector<2x32xf32>, vector<32x128xf32>, vector<2x128xf32> -> vector<2x128xf32>
    %238 = arith.addf %236, %237 : vector<2x128xf32>
    %239 = arith.negf %235 : vector<2x128xf32>
    %240 = math.exp %239 : vector<2x128xf32>
    %cst_67 = arith.constant 1.000000e+00 : f32
    %241 = vector.broadcast %cst_67 : f32 to vector<2x128xf32>
    %242 = arith.addf %241, %240 : vector<2x128xf32>
    %243 = arith.divf %241, %242 : vector<2x128xf32>
    %244 = math.tanh %235 : vector<2x128xf32>
    %245 = vector.extract_strided_slice %243 {offsets = [0, 0], sizes = [2, 32], strides = [1, 1]} : vector<2x128xf32> to vector<2x32xf32>
    %246 = vector.extract_strided_slice %243 {offsets = [0, 32], sizes = [2, 32], strides = [1, 1]} : vector<2x128xf32> to vector<2x32xf32>
    %247 = vector.extract_strided_slice %244 {offsets = [0, 64], sizes = [2, 32], strides = [1, 1]} : vector<2x128xf32> to vector<2x32xf32>
    %248 = vector.extract_strided_slice %243 {offsets = [0, 96], sizes = [2, 32], strides = [1, 1]} : vector<2x128xf32> to vector<2x32xf32>
    %249 = arith.mulf %246, %213 : vector<2x32xf32>
    %250 = arith.mulf %245, %247 : vector<2x32xf32>
    %251 = arith.addf %249, %250 : vector<2x32xf32>
    %252 = math.tanh %251 : vector<2x32xf32>
    %253 = arith.mulf %248, %252 : vector<2x32xf32>
    %254 = arith.negf %238 : vector<2x128xf32>
    %255 = math.exp %254 : vector<2x128xf32>
    %cst_68 = arith.constant 1.000000e+00 : f32
    %256 = vector.broadcast %cst_68 : f32 to vector<2x128xf32>
    %257 = arith.addf %256, %255 : vector<2x128xf32>
    %258 = arith.divf %256, %257 : vector<2x128xf32>
    %259 = math.tanh %238 : vector<2x128xf32>
    %260 = vector.extract_strided_slice %258 {offsets = [0, 0], sizes = [2, 32], strides = [1, 1]} : vector<2x128xf32> to vector<2x32xf32>
    %261 = vector.extract_strided_slice %258 {offsets = [0, 32], sizes = [2, 32], strides = [1, 1]} : vector<2x128xf32> to vector<2x32xf32>
    %262 = vector.extract_strided_slice %259 {offsets = [0, 64], sizes = [2, 32], strides = [1, 1]} : vector<2x128xf32> to vector<2x32xf32>
    %263 = vector.extract_strided_slice %258 {offsets = [0, 96], sizes = [2, 32], strides = [1, 1]} : vector<2x128xf32> to vector<2x32xf32>
    %264 = arith.mulf %261, %228 : vector<2x32xf32>
    %265 = arith.mulf %260, %262 : vector<2x32xf32>
    %266 = arith.addf %264, %265 : vector<2x32xf32>
    %267 = math.tanh %266 : vector<2x32xf32>
    %268 = arith.mulf %263, %267 : vector<2x32xf32>
    %c10 = arith.constant 10 : index
    %c0_69 = arith.constant 0 : index
    %269 = vector.load %arg22[%c10, %c0_69] : memref<32x64xf32, #tpu.memory_space<vmem>>, vector<2x32xf32>
    tpu.vector_store %arg22[%c10, %c0_69], %253 {strides = array<i32>} : memref<32x64xf32, #tpu.memory_space<vmem>>, vector<2x32xf32>,
    %c20 = arith.constant 20 : index
    %c32_70 = arith.constant 32 : index
    %270 = vector.load %arg22[%c20, %c32_70] : memref<32x64xf32, #tpu.memory_space<vmem>>, vector<2x32xf32>
    tpu.vector_store %arg22[%c20, %c32_70], %268 {strides = array<i32>} : memref<32x64xf32, #tpu.memory_space<vmem>>, vector<2x32xf32>,
    %271 = vector.extract_strided_slice %31 {offsets = [12, 0], sizes = [2, 128], strides = [1, 1]} : vector<32x128xf32> to vector<2x128xf32>
    %cst_71 = arith.constant dense<0.000000e+00> : vector<2x128xf32>
    %272 = tpu.matmul %253, %37, %cst_71 {dimension_numbers = #tpu.dot_dimension_numbers<[1], [0], [0], [1], [0, 0, 1, 1], [], []>} : vector<2x32xf32>, vector<32x128xf32>, vector<2x128xf32> -> vector<2x128xf32>
    %273 = arith.addf %271, %272 : vector<2x128xf32>
    %274 = vector.extract_strided_slice %36 {offsets = [18, 0], sizes = [2, 128], strides = [1, 1]} : vector<32x128xf32> to vector<2x128xf32>
    %cst_72 = arith.constant dense<0.000000e+00> : vector<2x128xf32>
    %275 = tpu.matmul %268, %38, %cst_72 {dimension_numbers = #tpu.dot_dimension_numbers<[1], [0], [0], [1], [0, 0, 1, 1], [], []>} : vector<2x32xf32>, vector<32x128xf32>, vector<2x128xf32> -> vector<2x128xf32>
    %276 = arith.addf %274, %275 : vector<2x128xf32>
    %277 = arith.negf %273 : vector<2x128xf32>
    %278 = math.exp %277 : vector<2x128xf32>
    %cst_73 = arith.constant 1.000000e+00 : f32
    %279 = vector.broadcast %cst_73 : f32 to vector<2x128xf32>
    %280 = arith.addf %279, %278 : vector<2x128xf32>
    %281 = arith.divf %279, %280 : vector<2x128xf32>
    %282 = math.tanh %273 : vector<2x128xf32>
    %283 = vector.extract_strided_slice %281 {offsets = [0, 0], sizes = [2, 32], strides = [1, 1]} : vector<2x128xf32> to vector<2x32xf32>
    %284 = vector.extract_strided_slice %281 {offsets = [0, 32], sizes = [2, 32], strides = [1, 1]} : vector<2x128xf32> to vector<2x32xf32>
    %285 = vector.extract_strided_slice %282 {offsets = [0, 64], sizes = [2, 32], strides = [1, 1]} : vector<2x128xf32> to vector<2x32xf32>
    %286 = vector.extract_strided_slice %281 {offsets = [0, 96], sizes = [2, 32], strides = [1, 1]} : vector<2x128xf32> to vector<2x32xf32>
    %287 = arith.mulf %284, %251 : vector<2x32xf32>
    %288 = arith.mulf %283, %285 : vector<2x32xf32>
    %289 = arith.addf %287, %288 : vector<2x32xf32>
    %290 = math.tanh %289 : vector<2x32xf32>
    %291 = arith.mulf %286, %290 : vector<2x32xf32>
    %292 = arith.negf %276 : vector<2x128xf32>
    %293 = math.exp %292 : vector<2x128xf32>
    %cst_74 = arith.constant 1.000000e+00 : f32
    %294 = vector.broadcast %cst_74 : f32 to vector<2x128xf32>
    %295 = arith.addf %294, %293 : vector<2x128xf32>
    %296 = arith.divf %294, %295 : vector<2x128xf32>
    %297 = math.tanh %276 : vector<2x128xf32>
    %298 = vector.extract_strided_slice %296 {offsets = [0, 0], sizes = [2, 32], strides = [1, 1]} : vector<2x128xf32> to vector<2x32xf32>
    %299 = vector.extract_strided_slice %296 {offsets = [0, 32], sizes = [2, 32], strides = [1, 1]} : vector<2x128xf32> to vector<2x32xf32>
    %300 = vector.extract_strided_slice %297 {offsets = [0, 64], sizes = [2, 32], strides = [1, 1]} : vector<2x128xf32> to vector<2x32xf32>
    %301 = vector.extract_strided_slice %296 {offsets = [0, 96], sizes = [2, 32], strides = [1, 1]} : vector<2x128xf32> to vector<2x32xf32>
    %302 = arith.mulf %299, %266 : vector<2x32xf32>
    %303 = arith.mulf %298, %300 : vector<2x32xf32>
    %304 = arith.addf %302, %303 : vector<2x32xf32>
    %305 = math.tanh %304 : vector<2x32xf32>
    %306 = arith.mulf %301, %305 : vector<2x32xf32>
    %c12 = arith.constant 12 : index
    %c0_75 = arith.constant 0 : index
    %307 = vector.load %arg22[%c12, %c0_75] : memref<32x64xf32, #tpu.memory_space<vmem>>, vector<2x32xf32>
    tpu.vector_store %arg22[%c12, %c0_75], %291 {strides = array<i32>} : memref<32x64xf32, #tpu.memory_space<vmem>>, vector<2x32xf32>,
    %c18 = arith.constant 18 : index
    %c32_76 = arith.constant 32 : index
    %308 = vector.load %arg22[%c18, %c32_76] : memref<32x64xf32, #tpu.memory_space<vmem>>, vector<2x32xf32>
    tpu.vector_store %arg22[%c18, %c32_76], %306 {strides = array<i32>} : memref<32x64xf32, #tpu.memory_space<vmem>>, vector<2x32xf32>,
    %309 = vector.extract_strided_slice %31 {offsets = [14, 0], sizes = [2, 128], strides = [1, 1]} : vector<32x128xf32> to vector<2x128xf32>
    %cst_77 = arith.constant dense<0.000000e+00> : vector<2x128xf32>
    %310 = tpu.matmul %291, %37, %cst_77 {dimension_numbers = #tpu.dot_dimension_numbers<[1], [0], [0], [1], [0, 0, 1, 1], [], []>} : vector<2x32xf32>, vector<32x128xf32>, vector<2x128xf32> -> vector<2x128xf32>
    %311 = arith.addf %309, %310 : vector<2x128xf32>
    %312 = vector.extract_strided_slice %36 {offsets = [16, 0], sizes = [2, 128], strides = [1, 1]} : vector<32x128xf32> to vector<2x128xf32>
    %cst_78 = arith.constant dense<0.000000e+00> : vector<2x128xf32>
    %313 = tpu.matmul %306, %38, %cst_78 {dimension_numbers = #tpu.dot_dimension_numbers<[1], [0], [0], [1], [0, 0, 1, 1], [], []>} : vector<2x32xf32>, vector<32x128xf32>, vector<2x128xf32> -> vector<2x128xf32>
    %314 = arith.addf %312, %313 : vector<2x128xf32>
    %315 = arith.negf %311 : vector<2x128xf32>
    %316 = math.exp %315 : vector<2x128xf32>
    %cst_79 = arith.constant 1.000000e+00 : f32
    %317 = vector.broadcast %cst_79 : f32 to vector<2x128xf32>
    %318 = arith.addf %317, %316 : vector<2x128xf32>
    %319 = arith.divf %317, %318 : vector<2x128xf32>
    %320 = math.tanh %311 : vector<2x128xf32>
    %321 = vector.extract_strided_slice %319 {offsets = [0, 0], sizes = [2, 32], strides = [1, 1]} : vector<2x128xf32> to vector<2x32xf32>
    %322 = vector.extract_strided_slice %319 {offsets = [0, 32], sizes = [2, 32], strides = [1, 1]} : vector<2x128xf32> to vector<2x32xf32>
    %323 = vector.extract_strided_slice %320 {offsets = [0, 64], sizes = [2, 32], strides = [1, 1]} : vector<2x128xf32> to vector<2x32xf32>
    %324 = vector.extract_strided_slice %319 {offsets = [0, 96], sizes = [2, 32], strides = [1, 1]} : vector<2x128xf32> to vector<2x32xf32>
    %325 = arith.mulf %322, %289 : vector<2x32xf32>
    %326 = arith.mulf %321, %323 : vector<2x32xf32>
    %327 = arith.addf %325, %326 : vector<2x32xf32>
    %328 = math.tanh %327 : vector<2x32xf32>
    %329 = arith.mulf %324, %328 : vector<2x32xf32>
    %330 = arith.negf %314 : vector<2x128xf32>
    %331 = math.exp %330 : vector<2x128xf32>
    %cst_80 = arith.constant 1.000000e+00 : f32
    %332 = vector.broadcast %cst_80 : f32 to vector<2x128xf32>
    %333 = arith.addf %332, %331 : vector<2x128xf32>
    %334 = arith.divf %332, %333 : vector<2x128xf32>
    %335 = math.tanh %314 : vector<2x128xf32>
    %336 = vector.extract_strided_slice %334 {offsets = [0, 0], sizes = [2, 32], strides = [1, 1]} : vector<2x128xf32> to vector<2x32xf32>
    %337 = vector.extract_strided_slice %334 {offsets = [0, 32], sizes = [2, 32], strides = [1, 1]} : vector<2x128xf32> to vector<2x32xf32>
    %338 = vector.extract_strided_slice %335 {offsets = [0, 64], sizes = [2, 32], strides = [1, 1]} : vector<2x128xf32> to vector<2x32xf32>
    %339 = vector.extract_strided_slice %334 {offsets = [0, 96], sizes = [2, 32], strides = [1, 1]} : vector<2x128xf32> to vector<2x32xf32>
    %340 = arith.mulf %337, %304 : vector<2x32xf32>
    %341 = arith.mulf %336, %338 : vector<2x32xf32>
    %342 = arith.addf %340, %341 : vector<2x32xf32>
    %343 = math.tanh %342 : vector<2x32xf32>
    %344 = arith.mulf %339, %343 : vector<2x32xf32>
    %c14 = arith.constant 14 : index
    %c0_81 = arith.constant 0 : index
    %345 = vector.load %arg22[%c14, %c0_81] : memref<32x64xf32, #tpu.memory_space<vmem>>, vector<2x32xf32>
    tpu.vector_store %arg22[%c14, %c0_81], %329 {strides = array<i32>} : memref<32x64xf32, #tpu.memory_space<vmem>>, vector<2x32xf32>,
    %c16 = arith.constant 16 : index
    %c32_82 = arith.constant 32 : index
    %346 = vector.load %arg22[%c16, %c32_82] : memref<32x64xf32, #tpu.memory_space<vmem>>, vector<2x32xf32>
    tpu.vector_store %arg22[%c16, %c32_82], %344 {strides = array<i32>} : memref<32x64xf32, #tpu.memory_space<vmem>>, vector<2x32xf32>,
    %347 = vector.extract_strided_slice %31 {offsets = [16, 0], sizes = [2, 128], strides = [1, 1]} : vector<32x128xf32> to vector<2x128xf32>
    %cst_83 = arith.constant dense<0.000000e+00> : vector<2x128xf32>
    %348 = tpu.matmul %329, %37, %cst_83 {dimension_numbers = #tpu.dot_dimension_numbers<[1], [0], [0], [1], [0, 0, 1, 1], [], []>} : vector<2x32xf32>, vector<32x128xf32>, vector<2x128xf32> -> vector<2x128xf32>
    %349 = arith.addf %347, %348 : vector<2x128xf32>
    %350 = vector.extract_strided_slice %36 {offsets = [14, 0], sizes = [2, 128], strides = [1, 1]} : vector<32x128xf32> to vector<2x128xf32>
    %cst_84 = arith.constant dense<0.000000e+00> : vector<2x128xf32>
    %351 = tpu.matmul %344, %38, %cst_84 {dimension_numbers = #tpu.dot_dimension_numbers<[1], [0], [0], [1], [0, 0, 1, 1], [], []>} : vector<2x32xf32>, vector<32x128xf32>, vector<2x128xf32> -> vector<2x128xf32>
    %352 = arith.addf %350, %351 : vector<2x128xf32>
    %353 = arith.negf %349 : vector<2x128xf32>
    %354 = math.exp %353 : vector<2x128xf32>
    %cst_85 = arith.constant 1.000000e+00 : f32
    %355 = vector.broadcast %cst_85 : f32 to vector<2x128xf32>
    %356 = arith.addf %355, %354 : vector<2x128xf32>
    %357 = arith.divf %355, %356 : vector<2x128xf32>
    %358 = math.tanh %349 : vector<2x128xf32>
    %359 = vector.extract_strided_slice %357 {offsets = [0, 0], sizes = [2, 32], strides = [1, 1]} : vector<2x128xf32> to vector<2x32xf32>
    %360 = vector.extract_strided_slice %357 {offsets = [0, 32], sizes = [2, 32], strides = [1, 1]} : vector<2x128xf32> to vector<2x32xf32>
    %361 = vector.extract_strided_slice %358 {offsets = [0, 64], sizes = [2, 32], strides = [1, 1]} : vector<2x128xf32> to vector<2x32xf32>
    %362 = vector.extract_strided_slice %357 {offsets = [0, 96], sizes = [2, 32], strides = [1, 1]} : vector<2x128xf32> to vector<2x32xf32>
    %363 = arith.mulf %360, %327 : vector<2x32xf32>
    %364 = arith.mulf %359, %361 : vector<2x32xf32>
    %365 = arith.addf %363, %364 : vector<2x32xf32>
    %366 = math.tanh %365 : vector<2x32xf32>
    %367 = arith.mulf %362, %366 : vector<2x32xf32>
    %368 = arith.negf %352 : vector<2x128xf32>
    %369 = math.exp %368 : vector<2x128xf32>
    %cst_86 = arith.constant 1.000000e+00 : f32
    %370 = vector.broadcast %cst_86 : f32 to vector<2x128xf32>
    %371 = arith.addf %370, %369 : vector<2x128xf32>
    %372 = arith.divf %370, %371 : vector<2x128xf32>
    %373 = math.tanh %352 : vector<2x128xf32>
    %374 = vector.extract_strided_slice %372 {offsets = [0, 0], sizes = [2, 32], strides = [1, 1]} : vector<2x128xf32> to vector<2x32xf32>
    %375 = vector.extract_strided_slice %372 {offsets = [0, 32], sizes = [2, 32], strides = [1, 1]} : vector<2x128xf32> to vector<2x32xf32>
    %376 = vector.extract_strided_slice %373 {offsets = [0, 64], sizes = [2, 32], strides = [1, 1]} : vector<2x128xf32> to vector<2x32xf32>
    %377 = vector.extract_strided_slice %372 {offsets = [0, 96], sizes = [2, 32], strides = [1, 1]} : vector<2x128xf32> to vector<2x32xf32>
    %378 = arith.mulf %375, %342 : vector<2x32xf32>
    %379 = arith.mulf %374, %376 : vector<2x32xf32>
    %380 = arith.addf %378, %379 : vector<2x32xf32>
    %381 = math.tanh %380 : vector<2x32xf32>
    %382 = arith.mulf %377, %381 : vector<2x32xf32>
    %c16_87 = arith.constant 16 : index
    %c0_88 = arith.constant 0 : index
    %383 = vector.load %arg22[%c16_87, %c0_88] : memref<32x64xf32, #tpu.memory_space<vmem>>, vector<2x32xf32>
    tpu.vector_store %arg22[%c16_87, %c0_88], %367 {strides = array<i32>} : memref<32x64xf32, #tpu.memory_space<vmem>>, vector<2x32xf32>,
    %c14_89 = arith.constant 14 : index
    %c32_90 = arith.constant 32 : index
    %384 = vector.load %arg22[%c14_89, %c32_90] : memref<32x64xf32, #tpu.memory_space<vmem>>, vector<2x32xf32>
    tpu.vector_store %arg22[%c14_89, %c32_90], %382 {strides = array<i32>} : memref<32x64xf32, #tpu.memory_space<vmem>>, vector<2x32xf32>,
    %385 = vector.extract_strided_slice %31 {offsets = [18, 0], sizes = [2, 128], strides = [1, 1]} : vector<32x128xf32> to vector<2x128xf32>
    %cst_91 = arith.constant dense<0.000000e+00> : vector<2x128xf32>
    %386 = tpu.matmul %367, %37, %cst_91 {dimension_numbers = #tpu.dot_dimension_numbers<[1], [0], [0], [1], [0, 0, 1, 1], [], []>} : vector<2x32xf32>, vector<32x128xf32>, vector<2x128xf32> -> vector<2x128xf32>
    %387 = arith.addf %385, %386 : vector<2x128xf32>
    %388 = vector.extract_strided_slice %36 {offsets = [12, 0], sizes = [2, 128], strides = [1, 1]} : vector<32x128xf32> to vector<2x128xf32>
    %cst_92 = arith.constant dense<0.000000e+00> : vector<2x128xf32>
    %389 = tpu.matmul %382, %38, %cst_92 {dimension_numbers = #tpu.dot_dimension_numbers<[1], [0], [0], [1], [0, 0, 1, 1], [], []>} : vector<2x32xf32>, vector<32x128xf32>, vector<2x128xf32> -> vector<2x128xf32>
    %390 = arith.addf %388, %389 : vector<2x128xf32>
    %391 = arith.negf %387 : vector<2x128xf32>
    %392 = math.exp %391 : vector<2x128xf32>
    %cst_93 = arith.constant 1.000000e+00 : f32
    %393 = vector.broadcast %cst_93 : f32 to vector<2x128xf32>
    %394 = arith.addf %393, %392 : vector<2x128xf32>
    %395 = arith.divf %393, %394 : vector<2x128xf32>
    %396 = math.tanh %387 : vector<2x128xf32>
    %397 = vector.extract_strided_slice %395 {offsets = [0, 0], sizes = [2, 32], strides = [1, 1]} : vector<2x128xf32> to vector<2x32xf32>
    %398 = vector.extract_strided_slice %395 {offsets = [0, 32], sizes = [2, 32], strides = [1, 1]} : vector<2x128xf32> to vector<2x32xf32>
    %399 = vector.extract_strided_slice %396 {offsets = [0, 64], sizes = [2, 32], strides = [1, 1]} : vector<2x128xf32> to vector<2x32xf32>
    %400 = vector.extract_strided_slice %395 {offsets = [0, 96], sizes = [2, 32], strides = [1, 1]} : vector<2x128xf32> to vector<2x32xf32>
    %401 = arith.mulf %398, %365 : vector<2x32xf32>
    %402 = arith.mulf %397, %399 : vector<2x32xf32>
    %403 = arith.addf %401, %402 : vector<2x32xf32>
    %404 = math.tanh %403 : vector<2x32xf32>
    %405 = arith.mulf %400, %404 : vector<2x32xf32>
    %406 = arith.negf %390 : vector<2x128xf32>
    %407 = math.exp %406 : vector<2x128xf32>
    %cst_94 = arith.constant 1.000000e+00 : f32
    %408 = vector.broadcast %cst_94 : f32 to vector<2x128xf32>
    %409 = arith.addf %408, %407 : vector<2x128xf32>
    %410 = arith.divf %408, %409 : vector<2x128xf32>
    %411 = math.tanh %390 : vector<2x128xf32>
    %412 = vector.extract_strided_slice %410 {offsets = [0, 0], sizes = [2, 32], strides = [1, 1]} : vector<2x128xf32> to vector<2x32xf32>
    %413 = vector.extract_strided_slice %410 {offsets = [0, 32], sizes = [2, 32], strides = [1, 1]} : vector<2x128xf32> to vector<2x32xf32>
    %414 = vector.extract_strided_slice %411 {offsets = [0, 64], sizes = [2, 32], strides = [1, 1]} : vector<2x128xf32> to vector<2x32xf32>
    %415 = vector.extract_strided_slice %410 {offsets = [0, 96], sizes = [2, 32], strides = [1, 1]} : vector<2x128xf32> to vector<2x32xf32>
    %416 = arith.mulf %413, %380 : vector<2x32xf32>
    %417 = arith.mulf %412, %414 : vector<2x32xf32>
    %418 = arith.addf %416, %417 : vector<2x32xf32>
    %419 = math.tanh %418 : vector<2x32xf32>
    %420 = arith.mulf %415, %419 : vector<2x32xf32>
    %c18_95 = arith.constant 18 : index
    %c0_96 = arith.constant 0 : index
    %421 = vector.load %arg22[%c18_95, %c0_96] : memref<32x64xf32, #tpu.memory_space<vmem>>, vector<2x32xf32>
    tpu.vector_store %arg22[%c18_95, %c0_96], %405 {strides = array<i32>} : memref<32x64xf32, #tpu.memory_space<vmem>>, vector<2x32xf32>,
    %c12_97 = arith.constant 12 : index
    %c32_98 = arith.constant 32 : index
    %422 = vector.load %arg22[%c12_97, %c32_98] : memref<32x64xf32, #tpu.memory_space<vmem>>, vector<2x32xf32>
    tpu.vector_store %arg22[%c12_97, %c32_98], %420 {strides = array<i32>} : memref<32x64xf32, #tpu.memory_space<vmem>>, vector<2x32xf32>,
    %423 = vector.extract_strided_slice %31 {offsets = [20, 0], sizes = [2, 128], strides = [1, 1]} : vector<32x128xf32> to vector<2x128xf32>
    %cst_99 = arith.constant dense<0.000000e+00> : vector<2x128xf32>
    %424 = tpu.matmul %405, %37, %cst_99 {dimension_numbers = #tpu.dot_dimension_numbers<[1], [0], [0], [1], [0, 0, 1, 1], [], []>} : vector<2x32xf32>, vector<32x128xf32>, vector<2x128xf32> -> vector<2x128xf32>
    %425 = arith.addf %423, %424 : vector<2x128xf32>
    %426 = vector.extract_strided_slice %36 {offsets = [10, 0], sizes = [2, 128], strides = [1, 1]} : vector<32x128xf32> to vector<2x128xf32>
    %cst_100 = arith.constant dense<0.000000e+00> : vector<2x128xf32>
    %427 = tpu.matmul %420, %38, %cst_100 {dimension_numbers = #tpu.dot_dimension_numbers<[1], [0], [0], [1], [0, 0, 1, 1], [], []>} : vector<2x32xf32>, vector<32x128xf32>, vector<2x128xf32> -> vector<2x128xf32>
    %428 = arith.addf %426, %427 : vector<2x128xf32>
    %429 = arith.negf %425 : vector<2x128xf32>
    %430 = math.exp %429 : vector<2x128xf32>
    %cst_101 = arith.constant 1.000000e+00 : f32
    %431 = vector.broadcast %cst_101 : f32 to vector<2x128xf32>
    %432 = arith.addf %431, %430 : vector<2x128xf32>
    %433 = arith.divf %431, %432 : vector<2x128xf32>
    %434 = math.tanh %425 : vector<2x128xf32>
    %435 = vector.extract_strided_slice %433 {offsets = [0, 0], sizes = [2, 32], strides = [1, 1]} : vector<2x128xf32> to vector<2x32xf32>
    %436 = vector.extract_strided_slice %433 {offsets = [0, 32], sizes = [2, 32], strides = [1, 1]} : vector<2x128xf32> to vector<2x32xf32>
    %437 = vector.extract_strided_slice %434 {offsets = [0, 64], sizes = [2, 32], strides = [1, 1]} : vector<2x128xf32> to vector<2x32xf32>
    %438 = vector.extract_strided_slice %433 {offsets = [0, 96], sizes = [2, 32], strides = [1, 1]} : vector<2x128xf32> to vector<2x32xf32>
    %439 = arith.mulf %436, %403 : vector<2x32xf32>
    %440 = arith.mulf %435, %437 : vector<2x32xf32>
    %441 = arith.addf %439, %440 : vector<2x32xf32>
    %442 = math.tanh %441 : vector<2x32xf32>
    %443 = arith.mulf %438, %442 : vector<2x32xf32>
    %444 = arith.negf %428 : vector<2x128xf32>
    %445 = math.exp %444 : vector<2x128xf32>
    %cst_102 = arith.constant 1.000000e+00 : f32
    %446 = vector.broadcast %cst_102 : f32 to vector<2x128xf32>
    %447 = arith.addf %446, %445 : vector<2x128xf32>
    %448 = arith.divf %446, %447 : vector<2x128xf32>
    %449 = math.tanh %428 : vector<2x128xf32>
    %450 = vector.extract_strided_slice %448 {offsets = [0, 0], sizes = [2, 32], strides = [1, 1]} : vector<2x128xf32> to vector<2x32xf32>
    %451 = vector.extract_strided_slice %448 {offsets = [0, 32], sizes = [2, 32], strides = [1, 1]} : vector<2x128xf32> to vector<2x32xf32>
    %452 = vector.extract_strided_slice %449 {offsets = [0, 64], sizes = [2, 32], strides = [1, 1]} : vector<2x128xf32> to vector<2x32xf32>
    %453 = vector.extract_strided_slice %448 {offsets = [0, 96], sizes = [2, 32], strides = [1, 1]} : vector<2x128xf32> to vector<2x32xf32>
    %454 = arith.mulf %451, %418 : vector<2x32xf32>
    %455 = arith.mulf %450, %452 : vector<2x32xf32>
    %456 = arith.addf %454, %455 : vector<2x32xf32>
    %457 = math.tanh %456 : vector<2x32xf32>
    %458 = arith.mulf %453, %457 : vector<2x32xf32>
    %c20_103 = arith.constant 20 : index
    %c0_104 = arith.constant 0 : index
    %459 = vector.load %arg22[%c20_103, %c0_104] : memref<32x64xf32, #tpu.memory_space<vmem>>, vector<2x32xf32>
    tpu.vector_store %arg22[%c20_103, %c0_104], %443 {strides = array<i32>} : memref<32x64xf32, #tpu.memory_space<vmem>>, vector<2x32xf32>,
    %c10_105 = arith.constant 10 : index
    %c32_106 = arith.constant 32 : index
    %460 = vector.load %arg22[%c10_105, %c32_106] : memref<32x64xf32, #tpu.memory_space<vmem>>, vector<2x32xf32>
    tpu.vector_store %arg22[%c10_105, %c32_106], %458 {strides = array<i32>} : memref<32x64xf32, #tpu.memory_space<vmem>>, vector<2x32xf32>,
    %461 = vector.extract_strided_slice %31 {offsets = [22, 0], sizes = [2, 128], strides = [1, 1]} : vector<32x128xf32> to vector<2x128xf32>
    %cst_107 = arith.constant dense<0.000000e+00> : vector<2x128xf32>
    %462 = tpu.matmul %443, %37, %cst_107 {dimension_numbers = #tpu.dot_dimension_numbers<[1], [0], [0], [1], [0, 0, 1, 1], [], []>} : vector<2x32xf32>, vector<32x128xf32>, vector<2x128xf32> -> vector<2x128xf32>
    %463 = arith.addf %461, %462 : vector<2x128xf32>
    %464 = vector.extract_strided_slice %36 {offsets = [8, 0], sizes = [2, 128], strides = [1, 1]} : vector<32x128xf32> to vector<2x128xf32>
    %cst_108 = arith.constant dense<0.000000e+00> : vector<2x128xf32>
    %465 = tpu.matmul %458, %38, %cst_108 {dimension_numbers = #tpu.dot_dimension_numbers<[1], [0], [0], [1], [0, 0, 1, 1], [], []>} : vector<2x32xf32>, vector<32x128xf32>, vector<2x128xf32> -> vector<2x128xf32>
    %466 = arith.addf %464, %465 : vector<2x128xf32>
    %467 = arith.negf %463 : vector<2x128xf32>
    %468 = math.exp %467 : vector<2x128xf32>
    %cst_109 = arith.constant 1.000000e+00 : f32
    %469 = vector.broadcast %cst_109 : f32 to vector<2x128xf32>
    %470 = arith.addf %469, %468 : vector<2x128xf32>
    %471 = arith.divf %469, %470 : vector<2x128xf32>
    %472 = math.tanh %463 : vector<2x128xf32>
    %473 = vector.extract_strided_slice %471 {offsets = [0, 0], sizes = [2, 32], strides = [1, 1]} : vector<2x128xf32> to vector<2x32xf32>
    %474 = vector.extract_strided_slice %471 {offsets = [0, 32], sizes = [2, 32], strides = [1, 1]} : vector<2x128xf32> to vector<2x32xf32>
    %475 = vector.extract_strided_slice %472 {offsets = [0, 64], sizes = [2, 32], strides = [1, 1]} : vector<2x128xf32> to vector<2x32xf32>
    %476 = vector.extract_strided_slice %471 {offsets = [0, 96], sizes = [2, 32], strides = [1, 1]} : vector<2x128xf32> to vector<2x32xf32>
    %477 = arith.mulf %474, %441 : vector<2x32xf32>
    %478 = arith.mulf %473, %475 : vector<2x32xf32>
    %479 = arith.addf %477, %478 : vector<2x32xf32>
    %480 = math.tanh %479 : vector<2x32xf32>
    %481 = arith.mulf %476, %480 : vector<2x32xf32>
    %482 = arith.negf %466 : vector<2x128xf32>
    %483 = math.exp %482 : vector<2x128xf32>
    %cst_110 = arith.constant 1.000000e+00 : f32
    %484 = vector.broadcast %cst_110 : f32 to vector<2x128xf32>
    %485 = arith.addf %484, %483 : vector<2x128xf32>
    %486 = arith.divf %484, %485 : vector<2x128xf32>
    %487 = math.tanh %466 : vector<2x128xf32>
    %488 = vector.extract_strided_slice %486 {offsets = [0, 0], sizes = [2, 32], strides = [1, 1]} : vector<2x128xf32> to vector<2x32xf32>
    %489 = vector.extract_strided_slice %486 {offsets = [0, 32], sizes = [2, 32], strides = [1, 1]} : vector<2x128xf32> to vector<2x32xf32>
    %490 = vector.extract_strided_slice %487 {offsets = [0, 64], sizes = [2, 32], strides = [1, 1]} : vector<2x128xf32> to vector<2x32xf32>
    %491 = vector.extract_strided_slice %486 {offsets = [0, 96], sizes = [2, 32], strides = [1, 1]} : vector<2x128xf32> to vector<2x32xf32>
    %492 = arith.mulf %489, %456 : vector<2x32xf32>
    %493 = arith.mulf %488, %490 : vector<2x32xf32>
    %494 = arith.addf %492, %493 : vector<2x32xf32>
    %495 = math.tanh %494 : vector<2x32xf32>
    %496 = arith.mulf %491, %495 : vector<2x32xf32>
    %c22_111 = arith.constant 22 : index
    %c0_112 = arith.constant 0 : index
    %497 = vector.load %arg22[%c22_111, %c0_112] : memref<32x64xf32, #tpu.memory_space<vmem>>, vector<2x32xf32>
    tpu.vector_store %arg22[%c22_111, %c0_112], %481 {strides = array<i32>} : memref<32x64xf32, #tpu.memory_space<vmem>>, vector<2x32xf32>,
    %c8_113 = arith.constant 8 : index
    %c32_114 = arith.constant 32 : index
    %498 = vector.load %arg22[%c8_113, %c32_114] : memref<32x64xf32, #tpu.memory_space<vmem>>, vector<2x32xf32>
    tpu.vector_store %arg22[%c8_113, %c32_114], %496 {strides = array<i32>} : memref<32x64xf32, #tpu.memory_space<vmem>>, vector<2x32xf32>,
    %499 = vector.extract_strided_slice %31 {offsets = [24, 0], sizes = [2, 128], strides = [1, 1]} : vector<32x128xf32> to vector<2x128xf32>
    %cst_115 = arith.constant dense<0.000000e+00> : vector<2x128xf32>
    %500 = tpu.matmul %481, %37, %cst_115 {dimension_numbers = #tpu.dot_dimension_numbers<[1], [0], [0], [1], [0, 0, 1, 1], [], []>} : vector<2x32xf32>, vector<32x128xf32>, vector<2x128xf32> -> vector<2x128xf32>
    %501 = arith.addf %499, %500 : vector<2x128xf32>
    %502 = vector.extract_strided_slice %36 {offsets = [6, 0], sizes = [2, 128], strides = [1, 1]} : vector<32x128xf32> to vector<2x128xf32>
    %cst_116 = arith.constant dense<0.000000e+00> : vector<2x128xf32>
    %503 = tpu.matmul %496, %38, %cst_116 {dimension_numbers = #tpu.dot_dimension_numbers<[1], [0], [0], [1], [0, 0, 1, 1], [], []>} : vector<2x32xf32>, vector<32x128xf32>, vector<2x128xf32> -> vector<2x128xf32>
    %504 = arith.addf %502, %503 : vector<2x128xf32>
    %505 = arith.negf %501 : vector<2x128xf32>
    %506 = math.exp %505 : vector<2x128xf32>
    %cst_117 = arith.constant 1.000000e+00 : f32
    %507 = vector.broadcast %cst_117 : f32 to vector<2x128xf32>
    %508 = arith.addf %507, %506 : vector<2x128xf32>
    %509 = arith.divf %507, %508 : vector<2x128xf32>
    %510 = math.tanh %501 : vector<2x128xf32>
    %511 = vector.extract_strided_slice %509 {offsets = [0, 0], sizes = [2, 32], strides = [1, 1]} : vector<2x128xf32> to vector<2x32xf32>
    %512 = vector.extract_strided_slice %509 {offsets = [0, 32], sizes = [2, 32], strides = [1, 1]} : vector<2x128xf32> to vector<2x32xf32>
    %513 = vector.extract_strided_slice %510 {offsets = [0, 64], sizes = [2, 32], strides = [1, 1]} : vector<2x128xf32> to vector<2x32xf32>
    %514 = vector.extract_strided_slice %509 {offsets = [0, 96], sizes = [2, 32], strides = [1, 1]} : vector<2x128xf32> to vector<2x32xf32>
    %515 = arith.mulf %512, %479 : vector<2x32xf32>
    %516 = arith.mulf %511, %513 : vector<2x32xf32>
    %517 = arith.addf %515, %516 : vector<2x32xf32>
    %518 = math.tanh %517 : vector<2x32xf32>
    %519 = arith.mulf %514, %518 : vector<2x32xf32>
    %520 = arith.negf %504 : vector<2x128xf32>
    %521 = math.exp %520 : vector<2x128xf32>
    %cst_118 = arith.constant 1.000000e+00 : f32
    %522 = vector.broadcast %cst_118 : f32 to vector<2x128xf32>
    %523 = arith.addf %522, %521 : vector<2x128xf32>
    %524 = arith.divf %522, %523 : vector<2x128xf32>
    %525 = math.tanh %504 : vector<2x128xf32>
    %526 = vector.extract_strided_slice %524 {offsets = [0, 0], sizes = [2, 32], strides = [1, 1]} : vector<2x128xf32> to vector<2x32xf32>
    %527 = vector.extract_strided_slice %524 {offsets = [0, 32], sizes = [2, 32], strides = [1, 1]} : vector<2x128xf32> to vector<2x32xf32>
    %528 = vector.extract_strided_slice %525 {offsets = [0, 64], sizes = [2, 32], strides = [1, 1]} : vector<2x128xf32> to vector<2x32xf32>
    %529 = vector.extract_strided_slice %524 {offsets = [0, 96], sizes = [2, 32], strides = [1, 1]} : vector<2x128xf32> to vector<2x32xf32>
    %530 = arith.mulf %527, %494 : vector<2x32xf32>
    %531 = arith.mulf %526, %528 : vector<2x32xf32>
    %532 = arith.addf %530, %531 : vector<2x32xf32>
    %533 = math.tanh %532 : vector<2x32xf32>
    %534 = arith.mulf %529, %533 : vector<2x32xf32>
    %c24_119 = arith.constant 24 : index
    %c0_120 = arith.constant 0 : index
    %535 = vector.load %arg22[%c24_119, %c0_120] : memref<32x64xf32, #tpu.memory_space<vmem>>, vector<2x32xf32>
    tpu.vector_store %arg22[%c24_119, %c0_120], %519 {strides = array<i32>} : memref<32x64xf32, #tpu.memory_space<vmem>>, vector<2x32xf32>,
    %c6_121 = arith.constant 6 : index
    %c32_122 = arith.constant 32 : index
    %536 = vector.load %arg22[%c6_121, %c32_122] : memref<32x64xf32, #tpu.memory_space<vmem>>, vector<2x32xf32>
    tpu.vector_store %arg22[%c6_121, %c32_122], %534 {strides = array<i32>} : memref<32x64xf32, #tpu.memory_space<vmem>>, vector<2x32xf32>,
    %537 = vector.extract_strided_slice %31 {offsets = [26, 0], sizes = [2, 128], strides = [1, 1]} : vector<32x128xf32> to vector<2x128xf32>
    %cst_123 = arith.constant dense<0.000000e+00> : vector<2x128xf32>
    %538 = tpu.matmul %519, %37, %cst_123 {dimension_numbers = #tpu.dot_dimension_numbers<[1], [0], [0], [1], [0, 0, 1, 1], [], []>} : vector<2x32xf32>, vector<32x128xf32>, vector<2x128xf32> -> vector<2x128xf32>
    %539 = arith.addf %537, %538 : vector<2x128xf32>
    %540 = vector.extract_strided_slice %36 {offsets = [4, 0], sizes = [2, 128], strides = [1, 1]} : vector<32x128xf32> to vector<2x128xf32>
    %cst_124 = arith.constant dense<0.000000e+00> : vector<2x128xf32>
    %541 = tpu.matmul %534, %38, %cst_124 {dimension_numbers = #tpu.dot_dimension_numbers<[1], [0], [0], [1], [0, 0, 1, 1], [], []>} : vector<2x32xf32>, vector<32x128xf32>, vector<2x128xf32> -> vector<2x128xf32>
    %542 = arith.addf %540, %541 : vector<2x128xf32>
    %543 = arith.negf %539 : vector<2x128xf32>
    %544 = math.exp %543 : vector<2x128xf32>
    %cst_125 = arith.constant 1.000000e+00 : f32
    %545 = vector.broadcast %cst_125 : f32 to vector<2x128xf32>
    %546 = arith.addf %545, %544 : vector<2x128xf32>
    %547 = arith.divf %545, %546 : vector<2x128xf32>
    %548 = math.tanh %539 : vector<2x128xf32>
    %549 = vector.extract_strided_slice %547 {offsets = [0, 0], sizes = [2, 32], strides = [1, 1]} : vector<2x128xf32> to vector<2x32xf32>
    %550 = vector.extract_strided_slice %547 {offsets = [0, 32], sizes = [2, 32], strides = [1, 1]} : vector<2x128xf32> to vector<2x32xf32>
    %551 = vector.extract_strided_slice %548 {offsets = [0, 64], sizes = [2, 32], strides = [1, 1]} : vector<2x128xf32> to vector<2x32xf32>
    %552 = vector.extract_strided_slice %547 {offsets = [0, 96], sizes = [2, 32], strides = [1, 1]} : vector<2x128xf32> to vector<2x32xf32>
    %553 = arith.mulf %550, %517 : vector<2x32xf32>
    %554 = arith.mulf %549, %551 : vector<2x32xf32>
    %555 = arith.addf %553, %554 : vector<2x32xf32>
    %556 = math.tanh %555 : vector<2x32xf32>
    %557 = arith.mulf %552, %556 : vector<2x32xf32>
    %558 = arith.negf %542 : vector<2x128xf32>
    %559 = math.exp %558 : vector<2x128xf32>
    %cst_126 = arith.constant 1.000000e+00 : f32
    %560 = vector.broadcast %cst_126 : f32 to vector<2x128xf32>
    %561 = arith.addf %560, %559 : vector<2x128xf32>
    %562 = arith.divf %560, %561 : vector<2x128xf32>
    %563 = math.tanh %542 : vector<2x128xf32>
    %564 = vector.extract_strided_slice %562 {offsets = [0, 0], sizes = [2, 32], strides = [1, 1]} : vector<2x128xf32> to vector<2x32xf32>
    %565 = vector.extract_strided_slice %562 {offsets = [0, 32], sizes = [2, 32], strides = [1, 1]} : vector<2x128xf32> to vector<2x32xf32>
    %566 = vector.extract_strided_slice %563 {offsets = [0, 64], sizes = [2, 32], strides = [1, 1]} : vector<2x128xf32> to vector<2x32xf32>
    %567 = vector.extract_strided_slice %562 {offsets = [0, 96], sizes = [2, 32], strides = [1, 1]} : vector<2x128xf32> to vector<2x32xf32>
    %568 = arith.mulf %565, %532 : vector<2x32xf32>
    %569 = arith.mulf %564, %566 : vector<2x32xf32>
    %570 = arith.addf %568, %569 : vector<2x32xf32>
    %571 = math.tanh %570 : vector<2x32xf32>
    %572 = arith.mulf %567, %571 : vector<2x32xf32>
    %c26_127 = arith.constant 26 : index
    %c0_128 = arith.constant 0 : index
    %573 = vector.load %arg22[%c26_127, %c0_128] : memref<32x64xf32, #tpu.memory_space<vmem>>, vector<2x32xf32>
    tpu.vector_store %arg22[%c26_127, %c0_128], %557 {strides = array<i32>} : memref<32x64xf32, #tpu.memory_space<vmem>>, vector<2x32xf32>,
    %c4_129 = arith.constant 4 : index
    %c32_130 = arith.constant 32 : index
    %574 = vector.load %arg22[%c4_129, %c32_130] : memref<32x64xf32, #tpu.memory_space<vmem>>, vector<2x32xf32>
    tpu.vector_store %arg22[%c4_129, %c32_130], %572 {strides = array<i32>} : memref<32x64xf32, #tpu.memory_space<vmem>>, vector<2x32xf32>,
    %575 = vector.extract_strided_slice %31 {offsets = [28, 0], sizes = [2, 128], strides = [1, 1]} : vector<32x128xf32> to vector<2x128xf32>
    %cst_131 = arith.constant dense<0.000000e+00> : vector<2x128xf32>
    %576 = tpu.matmul %557, %37, %cst_131 {dimension_numbers = #tpu.dot_dimension_numbers<[1], [0], [0], [1], [0, 0, 1, 1], [], []>} : vector<2x32xf32>, vector<32x128xf32>, vector<2x128xf32> -> vector<2x128xf32>
    %577 = arith.addf %575, %576 : vector<2x128xf32>
    %578 = vector.extract_strided_slice %36 {offsets = [2, 0], sizes = [2, 128], strides = [1, 1]} : vector<32x128xf32> to vector<2x128xf32>
    %cst_132 = arith.constant dense<0.000000e+00> : vector<2x128xf32>
    %579 = tpu.matmul %572, %38, %cst_132 {dimension_numbers = #tpu.dot_dimension_numbers<[1], [0], [0], [1], [0, 0, 1, 1], [], []>} : vector<2x32xf32>, vector<32x128xf32>, vector<2x128xf32> -> vector<2x128xf32>
    %580 = arith.addf %578, %579 : vector<2x128xf32>
    %581 = arith.negf %577 : vector<2x128xf32>
    %582 = math.exp %581 : vector<2x128xf32>
    %cst_133 = arith.constant 1.000000e+00 : f32
    %583 = vector.broadcast %cst_133 : f32 to vector<2x128xf32>
    %584 = arith.addf %583, %582 : vector<2x128xf32>
    %585 = arith.divf %583, %584 : vector<2x128xf32>
    %586 = math.tanh %577 : vector<2x128xf32>
    %587 = vector.extract_strided_slice %585 {offsets = [0, 0], sizes = [2, 32], strides = [1, 1]} : vector<2x128xf32> to vector<2x32xf32>
    %588 = vector.extract_strided_slice %585 {offsets = [0, 32], sizes = [2, 32], strides = [1, 1]} : vector<2x128xf32> to vector<2x32xf32>
    %589 = vector.extract_strided_slice %586 {offsets = [0, 64], sizes = [2, 32], strides = [1, 1]} : vector<2x128xf32> to vector<2x32xf32>
    %590 = vector.extract_strided_slice %585 {offsets = [0, 96], sizes = [2, 32], strides = [1, 1]} : vector<2x128xf32> to vector<2x32xf32>
    %591 = arith.mulf %588, %555 : vector<2x32xf32>
    %592 = arith.mulf %587, %589 : vector<2x32xf32>
    %593 = arith.addf %591, %592 : vector<2x32xf32>
    %594 = math.tanh %593 : vector<2x32xf32>
    %595 = arith.mulf %590, %594 : vector<2x32xf32>
    %596 = arith.negf %580 : vector<2x128xf32>
    %597 = math.exp %596 : vector<2x128xf32>
    %cst_134 = arith.constant 1.000000e+00 : f32
    %598 = vector.broadcast %cst_134 : f32 to vector<2x128xf32>
    %599 = arith.addf %598, %597 : vector<2x128xf32>
    %600 = arith.divf %598, %599 : vector<2x128xf32>
    %601 = math.tanh %580 : vector<2x128xf32>
    %602 = vector.extract_strided_slice %600 {offsets = [0, 0], sizes = [2, 32], strides = [1, 1]} : vector<2x128xf32> to vector<2x32xf32>
    %603 = vector.extract_strided_slice %600 {offsets = [0, 32], sizes = [2, 32], strides = [1, 1]} : vector<2x128xf32> to vector<2x32xf32>
    %604 = vector.extract_strided_slice %601 {offsets = [0, 64], sizes = [2, 32], strides = [1, 1]} : vector<2x128xf32> to vector<2x32xf32>
    %605 = vector.extract_strided_slice %600 {offsets = [0, 96], sizes = [2, 32], strides = [1, 1]} : vector<2x128xf32> to vector<2x32xf32>
    %606 = arith.mulf %603, %570 : vector<2x32xf32>
    %607 = arith.mulf %602, %604 : vector<2x32xf32>
    %608 = arith.addf %606, %607 : vector<2x32xf32>
    %609 = math.tanh %608 : vector<2x32xf32>
    %610 = arith.mulf %605, %609 : vector<2x32xf32>
    %c28_135 = arith.constant 28 : index
    %c0_136 = arith.constant 0 : index
    %611 = vector.load %arg22[%c28_135, %c0_136] : memref<32x64xf32, #tpu.memory_space<vmem>>, vector<2x32xf32>
    tpu.vector_store %arg22[%c28_135, %c0_136], %595 {strides = array<i32>} : memref<32x64xf32, #tpu.memory_space<vmem>>, vector<2x32xf32>,
    %c2_137 = arith.constant 2 : index
    %c32_138 = arith.constant 32 : index
    %612 = vector.load %arg22[%c2_137, %c32_138] : memref<32x64xf32, #tpu.memory_space<vmem>>, vector<2x32xf32>
    tpu.vector_store %arg22[%c2_137, %c32_138], %610 {strides = array<i32>} : memref<32x64xf32, #tpu.memory_space<vmem>>, vector<2x32xf32>,
    %613 = vector.extract_strided_slice %31 {offsets = [30, 0], sizes = [2, 128], strides = [1, 1]} : vector<32x128xf32> to vector<2x128xf32>
    %cst_139 = arith.constant dense<0.000000e+00> : vector<2x128xf32>
    %614 = tpu.matmul %595, %37, %cst_139 {dimension_numbers = #tpu.dot_dimension_numbers<[1], [0], [0], [1], [0, 0, 1, 1], [], []>} : vector<2x32xf32>, vector<32x128xf32>, vector<2x128xf32> -> vector<2x128xf32>
    %615 = arith.addf %613, %614 : vector<2x128xf32>
    %616 = vector.extract_strided_slice %36 {offsets = [0, 0], sizes = [2, 128], strides = [1, 1]} : vector<32x128xf32> to vector<2x128xf32>
    %cst_140 = arith.constant dense<0.000000e+00> : vector<2x128xf32>
    %617 = tpu.matmul %610, %38, %cst_140 {dimension_numbers = #tpu.dot_dimension_numbers<[1], [0], [0], [1], [0, 0, 1, 1], [], []>} : vector<2x32xf32>, vector<32x128xf32>, vector<2x128xf32> -> vector<2x128xf32>
    %618 = arith.addf %616, %617 : vector<2x128xf32>
    %619 = arith.negf %615 : vector<2x128xf32>
    %620 = math.exp %619 : vector<2x128xf32>
    %cst_141 = arith.constant 1.000000e+00 : f32
    %621 = vector.broadcast %cst_141 : f32 to vector<2x128xf32>
    %622 = arith.addf %621, %620 : vector<2x128xf32>
    %623 = arith.divf %621, %622 : vector<2x128xf32>
    %624 = math.tanh %615 : vector<2x128xf32>
    %625 = vector.extract_strided_slice %623 {offsets = [0, 0], sizes = [2, 32], strides = [1, 1]} : vector<2x128xf32> to vector<2x32xf32>
    %626 = vector.extract_strided_slice %623 {offsets = [0, 32], sizes = [2, 32], strides = [1, 1]} : vector<2x128xf32> to vector<2x32xf32>
    %627 = vector.extract_strided_slice %624 {offsets = [0, 64], sizes = [2, 32], strides = [1, 1]} : vector<2x128xf32> to vector<2x32xf32>
    %628 = vector.extract_strided_slice %623 {offsets = [0, 96], sizes = [2, 32], strides = [1, 1]} : vector<2x128xf32> to vector<2x32xf32>
    %629 = arith.mulf %626, %593 : vector<2x32xf32>
    %630 = arith.mulf %625, %627 : vector<2x32xf32>
    %631 = arith.addf %629, %630 : vector<2x32xf32>
    %632 = math.tanh %631 : vector<2x32xf32>
    %633 = arith.mulf %628, %632 : vector<2x32xf32>
    %634 = arith.negf %618 : vector<2x128xf32>
    %635 = math.exp %634 : vector<2x128xf32>
    %cst_142 = arith.constant 1.000000e+00 : f32
    %636 = vector.broadcast %cst_142 : f32 to vector<2x128xf32>
    %637 = arith.addf %636, %635 : vector<2x128xf32>
    %638 = arith.divf %636, %637 : vector<2x128xf32>
    %639 = math.tanh %618 : vector<2x128xf32>
    %640 = vector.extract_strided_slice %638 {offsets = [0, 0], sizes = [2, 32], strides = [1, 1]} : vector<2x128xf32> to vector<2x32xf32>
    %641 = vector.extract_strided_slice %638 {offsets = [0, 32], sizes = [2, 32], strides = [1, 1]} : vector<2x128xf32> to vector<2x32xf32>
    %642 = vector.extract_strided_slice %639 {offsets = [0, 64], sizes = [2, 32], strides = [1, 1]} : vector<2x128xf32> to vector<2x32xf32>
    %643 = vector.extract_strided_slice %638 {offsets = [0, 96], sizes = [2, 32], strides = [1, 1]} : vector<2x128xf32> to vector<2x32xf32>
    %644 = arith.mulf %641, %608 : vector<2x32xf32>
    %645 = arith.mulf %640, %642 : vector<2x32xf32>
    %646 = arith.addf %644, %645 : vector<2x32xf32>
    %647 = math.tanh %646 : vector<2x32xf32>
    %648 = arith.mulf %643, %647 : vector<2x32xf32>
    %c30_143 = arith.constant 30 : index
    %c0_144 = arith.constant 0 : index
    %649 = vector.load %arg22[%c30_143, %c0_144] : memref<32x64xf32, #tpu.memory_space<vmem>>, vector<2x32xf32>
    tpu.vector_store %arg22[%c30_143, %c0_144], %633 {strides = array<i32>} : memref<32x64xf32, #tpu.memory_space<vmem>>, vector<2x32xf32>,
    %c0_145 = arith.constant 0 : index
    %c32_146 = arith.constant 32 : index
    %650 = vector.load %arg22[%c0_145, %c32_146] : memref<32x64xf32, #tpu.memory_space<vmem>>, vector<2x32xf32>
    tpu.vector_store %arg22[%c0_145, %c32_146], %648 {strides = array<i32>} : memref<32x64xf32, #tpu.memory_space<vmem>>, vector<2x32xf32>,
    %c0_147 = arith.constant 0 : index
    %c0_148 = arith.constant 0 : index
    %651 = vector.load %arg22[%c0_147, %c0_148] : memref<32x64xf32, #tpu.memory_space<vmem>>, vector<32x64xf32>
    %c0_149 = arith.constant 0 : index
    %c0_150 = arith.constant 0 : index
    %652 = vector.load %arg13[%c0_149, %c0_150] : memref<64x128xf32, #tpu.memory_space<vmem>>, vector<64x128xf32>
    %cst_151 = arith.constant dense<0.000000e+00> : vector<32x128xf32>
    %653 = tpu.matmul %651, %652, %cst_151 {dimension_numbers = #tpu.dot_dimension_numbers<[1], [0], [0], [1], [0, 0, 1, 1], [], []>} : vector<32x64xf32>, vector<64x128xf32>, vector<32x128xf32> -> vector<32x128xf32>
    %c0_152 = arith.constant 0 : index
    %c0_153 = arith.constant 0 : index
    %654 = vector.load %arg15[%c0_152, %c0_153] : memref<1x128xf32, #tpu.memory_space<vmem>>, vector<1x128xf32>
    %655 = vector.broadcast %654 : vector<1x128xf32> to vector<32x128xf32>
    %656 = arith.addf %653, %655 : vector<32x128xf32>
    %c0_154 = arith.constant 0 : index
    %c0_155 = arith.constant 0 : index
    %657 = vector.load %arg14[%c0_154, %c0_155] : memref<32x128xf32, #tpu.memory_space<vmem>>, vector<32x128xf32>
    %cst_156 = arith.constant 0.000000e+00 : f32
    %658 = vector.broadcast %cst_156 : f32 to vector<2x32xf32>
    %cst_157 = arith.constant 0.000000e+00 : f32
    %659 = vector.broadcast %cst_157 : f32 to vector<2x32xf32>
    %660 = vector.extract_strided_slice %656 {offsets = [0, 0], sizes = [2, 128], strides = [1, 1]} : vector<32x128xf32> to vector<2x128xf32>
    %cst_158 = arith.constant dense<0.000000e+00> : vector<2x128xf32>
    %661 = tpu.matmul %658, %657, %cst_158 {dimension_numbers = #tpu.dot_dimension_numbers<[1], [0], [0], [1], [0, 0, 1, 1], [], []>} : vector<2x32xf32>, vector<32x128xf32>, vector<2x128xf32> -> vector<2x128xf32>
    %662 = arith.addf %660, %661 : vector<2x128xf32>
    %663 = arith.negf %662 : vector<2x128xf32>
    %664 = math.exp %663 : vector<2x128xf32>
    %cst_159 = arith.constant 1.000000e+00 : f32
    %665 = vector.broadcast %cst_159 : f32 to vector<2x128xf32>
    %666 = arith.addf %665, %664 : vector<2x128xf32>
    %667 = arith.divf %665, %666 : vector<2x128xf32>
    %668 = math.tanh %662 : vector<2x128xf32>
    %669 = vector.extract_strided_slice %667 {offsets = [0, 0], sizes = [2, 32], strides = [1, 1]} : vector<2x128xf32> to vector<2x32xf32>
    %670 = vector.extract_strided_slice %667 {offsets = [0, 32], sizes = [2, 32], strides = [1, 1]} : vector<2x128xf32> to vector<2x32xf32>
    %671 = vector.extract_strided_slice %668 {offsets = [0, 64], sizes = [2, 32], strides = [1, 1]} : vector<2x128xf32> to vector<2x32xf32>
    %672 = vector.extract_strided_slice %667 {offsets = [0, 96], sizes = [2, 32], strides = [1, 1]} : vector<2x128xf32> to vector<2x32xf32>
    %673 = arith.mulf %670, %659 : vector<2x32xf32>
    %674 = arith.mulf %669, %671 : vector<2x32xf32>
    %675 = arith.addf %673, %674 : vector<2x32xf32>
    %676 = math.tanh %675 : vector<2x32xf32>
    %677 = arith.mulf %672, %676 : vector<2x32xf32>
    %678 = vector.extract_strided_slice %656 {offsets = [2, 0], sizes = [2, 128], strides = [1, 1]} : vector<32x128xf32> to vector<2x128xf32>
    %cst_160 = arith.constant dense<0.000000e+00> : vector<2x128xf32>
    %679 = tpu.matmul %677, %657, %cst_160 {dimension_numbers = #tpu.dot_dimension_numbers<[1], [0], [0], [1], [0, 0, 1, 1], [], []>} : vector<2x32xf32>, vector<32x128xf32>, vector<2x128xf32> -> vector<2x128xf32>
    %680 = arith.addf %678, %679 : vector<2x128xf32>
    %681 = arith.negf %680 : vector<2x128xf32>
    %682 = math.exp %681 : vector<2x128xf32>
    %cst_161 = arith.constant 1.000000e+00 : f32
    %683 = vector.broadcast %cst_161 : f32 to vector<2x128xf32>
    %684 = arith.addf %683, %682 : vector<2x128xf32>
    %685 = arith.divf %683, %684 : vector<2x128xf32>
    %686 = math.tanh %680 : vector<2x128xf32>
    %687 = vector.extract_strided_slice %685 {offsets = [0, 0], sizes = [2, 32], strides = [1, 1]} : vector<2x128xf32> to vector<2x32xf32>
    %688 = vector.extract_strided_slice %685 {offsets = [0, 32], sizes = [2, 32], strides = [1, 1]} : vector<2x128xf32> to vector<2x32xf32>
    %689 = vector.extract_strided_slice %686 {offsets = [0, 64], sizes = [2, 32], strides = [1, 1]} : vector<2x128xf32> to vector<2x32xf32>
    %690 = vector.extract_strided_slice %685 {offsets = [0, 96], sizes = [2, 32], strides = [1, 1]} : vector<2x128xf32> to vector<2x32xf32>
    %691 = arith.mulf %688, %675 : vector<2x32xf32>
    %692 = arith.mulf %687, %689 : vector<2x32xf32>
    %693 = arith.addf %691, %692 : vector<2x32xf32>
    %694 = math.tanh %693 : vector<2x32xf32>
    %695 = arith.mulf %690, %694 : vector<2x32xf32>
    %696 = vector.extract_strided_slice %656 {offsets = [4, 0], sizes = [2, 128], strides = [1, 1]} : vector<32x128xf32> to vector<2x128xf32>
    %cst_162 = arith.constant dense<0.000000e+00> : vector<2x128xf32>
    %697 = tpu.matmul %695, %657, %cst_162 {dimension_numbers = #tpu.dot_dimension_numbers<[1], [0], [0], [1], [0, 0, 1, 1], [], []>} : vector<2x32xf32>, vector<32x128xf32>, vector<2x128xf32> -> vector<2x128xf32>
    %698 = arith.addf %696, %697 : vector<2x128xf32>
    %699 = arith.negf %698 : vector<2x128xf32>
    %700 = math.exp %699 : vector<2x128xf32>
    %cst_163 = arith.constant 1.000000e+00 : f32
    %701 = vector.broadcast %cst_163 : f32 to vector<2x128xf32>
    %702 = arith.addf %701, %700 : vector<2x128xf32>
    %703 = arith.divf %701, %702 : vector<2x128xf32>
    %704 = math.tanh %698 : vector<2x128xf32>
    %705 = vector.extract_strided_slice %703 {offsets = [0, 0], sizes = [2, 32], strides = [1, 1]} : vector<2x128xf32> to vector<2x32xf32>
    %706 = vector.extract_strided_slice %703 {offsets = [0, 32], sizes = [2, 32], strides = [1, 1]} : vector<2x128xf32> to vector<2x32xf32>
    %707 = vector.extract_strided_slice %704 {offsets = [0, 64], sizes = [2, 32], strides = [1, 1]} : vector<2x128xf32> to vector<2x32xf32>
    %708 = vector.extract_strided_slice %703 {offsets = [0, 96], sizes = [2, 32], strides = [1, 1]} : vector<2x128xf32> to vector<2x32xf32>
    %709 = arith.mulf %706, %693 : vector<2x32xf32>
    %710 = arith.mulf %705, %707 : vector<2x32xf32>
    %711 = arith.addf %709, %710 : vector<2x32xf32>
    %712 = math.tanh %711 : vector<2x32xf32>
    %713 = arith.mulf %708, %712 : vector<2x32xf32>
    %714 = vector.extract_strided_slice %656 {offsets = [6, 0], sizes = [2, 128], strides = [1, 1]} : vector<32x128xf32> to vector<2x128xf32>
    %cst_164 = arith.constant dense<0.000000e+00> : vector<2x128xf32>
    %715 = tpu.matmul %713, %657, %cst_164 {dimension_numbers = #tpu.dot_dimension_numbers<[1], [0], [0], [1], [0, 0, 1, 1], [], []>} : vector<2x32xf32>, vector<32x128xf32>, vector<2x128xf32> -> vector<2x128xf32>
    %716 = arith.addf %714, %715 : vector<2x128xf32>
    %717 = arith.negf %716 : vector<2x128xf32>
    %718 = math.exp %717 : vector<2x128xf32>
    %cst_165 = arith.constant 1.000000e+00 : f32
    %719 = vector.broadcast %cst_165 : f32 to vector<2x128xf32>
    %720 = arith.addf %719, %718 : vector<2x128xf32>
    %721 = arith.divf %719, %720 : vector<2x128xf32>
    %722 = math.tanh %716 : vector<2x128xf32>
    %723 = vector.extract_strided_slice %721 {offsets = [0, 0], sizes = [2, 32], strides = [1, 1]} : vector<2x128xf32> to vector<2x32xf32>
    %724 = vector.extract_strided_slice %721 {offsets = [0, 32], sizes = [2, 32], strides = [1, 1]} : vector<2x128xf32> to vector<2x32xf32>
    %725 = vector.extract_strided_slice %722 {offsets = [0, 64], sizes = [2, 32], strides = [1, 1]} : vector<2x128xf32> to vector<2x32xf32>
    %726 = vector.extract_strided_slice %721 {offsets = [0, 96], sizes = [2, 32], strides = [1, 1]} : vector<2x128xf32> to vector<2x32xf32>
    %727 = arith.mulf %724, %711 : vector<2x32xf32>
    %728 = arith.mulf %723, %725 : vector<2x32xf32>
    %729 = arith.addf %727, %728 : vector<2x32xf32>
    %730 = math.tanh %729 : vector<2x32xf32>
    %731 = arith.mulf %726, %730 : vector<2x32xf32>
    %732 = vector.extract_strided_slice %656 {offsets = [8, 0], sizes = [2, 128], strides = [1, 1]} : vector<32x128xf32> to vector<2x128xf32>
    %cst_166 = arith.constant dense<0.000000e+00> : vector<2x128xf32>
    %733 = tpu.matmul %731, %657, %cst_166 {dimension_numbers = #tpu.dot_dimension_numbers<[1], [0], [0], [1], [0, 0, 1, 1], [], []>} : vector<2x32xf32>, vector<32x128xf32>, vector<2x128xf32> -> vector<2x128xf32>
    %734 = arith.addf %732, %733 : vector<2x128xf32>
    %735 = arith.negf %734 : vector<2x128xf32>
    %736 = math.exp %735 : vector<2x128xf32>
    %cst_167 = arith.constant 1.000000e+00 : f32
    %737 = vector.broadcast %cst_167 : f32 to vector<2x128xf32>
    %738 = arith.addf %737, %736 : vector<2x128xf32>
    %739 = arith.divf %737, %738 : vector<2x128xf32>
    %740 = math.tanh %734 : vector<2x128xf32>
    %741 = vector.extract_strided_slice %739 {offsets = [0, 0], sizes = [2, 32], strides = [1, 1]} : vector<2x128xf32> to vector<2x32xf32>
    %742 = vector.extract_strided_slice %739 {offsets = [0, 32], sizes = [2, 32], strides = [1, 1]} : vector<2x128xf32> to vector<2x32xf32>
    %743 = vector.extract_strided_slice %740 {offsets = [0, 64], sizes = [2, 32], strides = [1, 1]} : vector<2x128xf32> to vector<2x32xf32>
    %744 = vector.extract_strided_slice %739 {offsets = [0, 96], sizes = [2, 32], strides = [1, 1]} : vector<2x128xf32> to vector<2x32xf32>
    %745 = arith.mulf %742, %729 : vector<2x32xf32>
    %746 = arith.mulf %741, %743 : vector<2x32xf32>
    %747 = arith.addf %745, %746 : vector<2x32xf32>
    %748 = math.tanh %747 : vector<2x32xf32>
    %749 = arith.mulf %744, %748 : vector<2x32xf32>
    %750 = vector.extract_strided_slice %656 {offsets = [10, 0], sizes = [2, 128], strides = [1, 1]} : vector<32x128xf32> to vector<2x128xf32>
    %cst_168 = arith.constant dense<0.000000e+00> : vector<2x128xf32>
    %751 = tpu.matmul %749, %657, %cst_168 {dimension_numbers = #tpu.dot_dimension_numbers<[1], [0], [0], [1], [0, 0, 1, 1], [], []>} : vector<2x32xf32>, vector<32x128xf32>, vector<2x128xf32> -> vector<2x128xf32>
    %752 = arith.addf %750, %751 : vector<2x128xf32>
    %753 = arith.negf %752 : vector<2x128xf32>
    %754 = math.exp %753 : vector<2x128xf32>
    %cst_169 = arith.constant 1.000000e+00 : f32
    %755 = vector.broadcast %cst_169 : f32 to vector<2x128xf32>
    %756 = arith.addf %755, %754 : vector<2x128xf32>
    %757 = arith.divf %755, %756 : vector<2x128xf32>
    %758 = math.tanh %752 : vector<2x128xf32>
    %759 = vector.extract_strided_slice %757 {offsets = [0, 0], sizes = [2, 32], strides = [1, 1]} : vector<2x128xf32> to vector<2x32xf32>
    %760 = vector.extract_strided_slice %757 {offsets = [0, 32], sizes = [2, 32], strides = [1, 1]} : vector<2x128xf32> to vector<2x32xf32>
    %761 = vector.extract_strided_slice %758 {offsets = [0, 64], sizes = [2, 32], strides = [1, 1]} : vector<2x128xf32> to vector<2x32xf32>
    %762 = vector.extract_strided_slice %757 {offsets = [0, 96], sizes = [2, 32], strides = [1, 1]} : vector<2x128xf32> to vector<2x32xf32>
    %763 = arith.mulf %760, %747 : vector<2x32xf32>
    %764 = arith.mulf %759, %761 : vector<2x32xf32>
    %765 = arith.addf %763, %764 : vector<2x32xf32>
    %766 = math.tanh %765 : vector<2x32xf32>
    %767 = arith.mulf %762, %766 : vector<2x32xf32>
    %768 = vector.extract_strided_slice %656 {offsets = [12, 0], sizes = [2, 128], strides = [1, 1]} : vector<32x128xf32> to vector<2x128xf32>
    %cst_170 = arith.constant dense<0.000000e+00> : vector<2x128xf32>
    %769 = tpu.matmul %767, %657, %cst_170 {dimension_numbers = #tpu.dot_dimension_numbers<[1], [0], [0], [1], [0, 0, 1, 1], [], []>} : vector<2x32xf32>, vector<32x128xf32>, vector<2x128xf32> -> vector<2x128xf32>
    %770 = arith.addf %768, %769 : vector<2x128xf32>
    %771 = arith.negf %770 : vector<2x128xf32>
    %772 = math.exp %771 : vector<2x128xf32>
    %cst_171 = arith.constant 1.000000e+00 : f32
    %773 = vector.broadcast %cst_171 : f32 to vector<2x128xf32>
    %774 = arith.addf %773, %772 : vector<2x128xf32>
    %775 = arith.divf %773, %774 : vector<2x128xf32>
    %776 = math.tanh %770 : vector<2x128xf32>
    %777 = vector.extract_strided_slice %775 {offsets = [0, 0], sizes = [2, 32], strides = [1, 1]} : vector<2x128xf32> to vector<2x32xf32>
    %778 = vector.extract_strided_slice %775 {offsets = [0, 32], sizes = [2, 32], strides = [1, 1]} : vector<2x128xf32> to vector<2x32xf32>
    %779 = vector.extract_strided_slice %776 {offsets = [0, 64], sizes = [2, 32], strides = [1, 1]} : vector<2x128xf32> to vector<2x32xf32>
    %780 = vector.extract_strided_slice %775 {offsets = [0, 96], sizes = [2, 32], strides = [1, 1]} : vector<2x128xf32> to vector<2x32xf32>
    %781 = arith.mulf %778, %765 : vector<2x32xf32>
    %782 = arith.mulf %777, %779 : vector<2x32xf32>
    %783 = arith.addf %781, %782 : vector<2x32xf32>
    %784 = math.tanh %783 : vector<2x32xf32>
    %785 = arith.mulf %780, %784 : vector<2x32xf32>
    %786 = vector.extract_strided_slice %656 {offsets = [14, 0], sizes = [2, 128], strides = [1, 1]} : vector<32x128xf32> to vector<2x128xf32>
    %cst_172 = arith.constant dense<0.000000e+00> : vector<2x128xf32>
    %787 = tpu.matmul %785, %657, %cst_172 {dimension_numbers = #tpu.dot_dimension_numbers<[1], [0], [0], [1], [0, 0, 1, 1], [], []>} : vector<2x32xf32>, vector<32x128xf32>, vector<2x128xf32> -> vector<2x128xf32>
    %788 = arith.addf %786, %787 : vector<2x128xf32>
    %789 = arith.negf %788 : vector<2x128xf32>
    %790 = math.exp %789 : vector<2x128xf32>
    %cst_173 = arith.constant 1.000000e+00 : f32
    %791 = vector.broadcast %cst_173 : f32 to vector<2x128xf32>
    %792 = arith.addf %791, %790 : vector<2x128xf32>
    %793 = arith.divf %791, %792 : vector<2x128xf32>
    %794 = math.tanh %788 : vector<2x128xf32>
    %795 = vector.extract_strided_slice %793 {offsets = [0, 0], sizes = [2, 32], strides = [1, 1]} : vector<2x128xf32> to vector<2x32xf32>
    %796 = vector.extract_strided_slice %793 {offsets = [0, 32], sizes = [2, 32], strides = [1, 1]} : vector<2x128xf32> to vector<2x32xf32>
    %797 = vector.extract_strided_slice %794 {offsets = [0, 64], sizes = [2, 32], strides = [1, 1]} : vector<2x128xf32> to vector<2x32xf32>
    %798 = vector.extract_strided_slice %793 {offsets = [0, 96], sizes = [2, 32], strides = [1, 1]} : vector<2x128xf32> to vector<2x32xf32>
    %799 = arith.mulf %796, %783 : vector<2x32xf32>
    %800 = arith.mulf %795, %797 : vector<2x32xf32>
    %801 = arith.addf %799, %800 : vector<2x32xf32>
    %802 = math.tanh %801 : vector<2x32xf32>
    %803 = arith.mulf %798, %802 : vector<2x32xf32>
    %804 = vector.extract_strided_slice %656 {offsets = [16, 0], sizes = [2, 128], strides = [1, 1]} : vector<32x128xf32> to vector<2x128xf32>
    %cst_174 = arith.constant dense<0.000000e+00> : vector<2x128xf32>
    %805 = tpu.matmul %803, %657, %cst_174 {dimension_numbers = #tpu.dot_dimension_numbers<[1], [0], [0], [1], [0, 0, 1, 1], [], []>} : vector<2x32xf32>, vector<32x128xf32>, vector<2x128xf32> -> vector<2x128xf32>
    %806 = arith.addf %804, %805 : vector<2x128xf32>
    %807 = arith.negf %806 : vector<2x128xf32>
    %808 = math.exp %807 : vector<2x128xf32>
    %cst_175 = arith.constant 1.000000e+00 : f32
    %809 = vector.broadcast %cst_175 : f32 to vector<2x128xf32>
    %810 = arith.addf %809, %808 : vector<2x128xf32>
    %811 = arith.divf %809, %810 : vector<2x128xf32>
    %812 = math.tanh %806 : vector<2x128xf32>
    %813 = vector.extract_strided_slice %811 {offsets = [0, 0], sizes = [2, 32], strides = [1, 1]} : vector<2x128xf32> to vector<2x32xf32>
    %814 = vector.extract_strided_slice %811 {offsets = [0, 32], sizes = [2, 32], strides = [1, 1]} : vector<2x128xf32> to vector<2x32xf32>
    %815 = vector.extract_strided_slice %812 {offsets = [0, 64], sizes = [2, 32], strides = [1, 1]} : vector<2x128xf32> to vector<2x32xf32>
    %816 = vector.extract_strided_slice %811 {offsets = [0, 96], sizes = [2, 32], strides = [1, 1]} : vector<2x128xf32> to vector<2x32xf32>
    %817 = arith.mulf %814, %801 : vector<2x32xf32>
    %818 = arith.mulf %813, %815 : vector<2x32xf32>
    %819 = arith.addf %817, %818 : vector<2x32xf32>
    %820 = math.tanh %819 : vector<2x32xf32>
    %821 = arith.mulf %816, %820 : vector<2x32xf32>
    %822 = vector.extract_strided_slice %656 {offsets = [18, 0], sizes = [2, 128], strides = [1, 1]} : vector<32x128xf32> to vector<2x128xf32>
    %cst_176 = arith.constant dense<0.000000e+00> : vector<2x128xf32>
    %823 = tpu.matmul %821, %657, %cst_176 {dimension_numbers = #tpu.dot_dimension_numbers<[1], [0], [0], [1], [0, 0, 1, 1], [], []>} : vector<2x32xf32>, vector<32x128xf32>, vector<2x128xf32> -> vector<2x128xf32>
    %824 = arith.addf %822, %823 : vector<2x128xf32>
    %825 = arith.negf %824 : vector<2x128xf32>
    %826 = math.exp %825 : vector<2x128xf32>
    %cst_177 = arith.constant 1.000000e+00 : f32
    %827 = vector.broadcast %cst_177 : f32 to vector<2x128xf32>
    %828 = arith.addf %827, %826 : vector<2x128xf32>
    %829 = arith.divf %827, %828 : vector<2x128xf32>
    %830 = math.tanh %824 : vector<2x128xf32>
    %831 = vector.extract_strided_slice %829 {offsets = [0, 0], sizes = [2, 32], strides = [1, 1]} : vector<2x128xf32> to vector<2x32xf32>
    %832 = vector.extract_strided_slice %829 {offsets = [0, 32], sizes = [2, 32], strides = [1, 1]} : vector<2x128xf32> to vector<2x32xf32>
    %833 = vector.extract_strided_slice %830 {offsets = [0, 64], sizes = [2, 32], strides = [1, 1]} : vector<2x128xf32> to vector<2x32xf32>
    %834 = vector.extract_strided_slice %829 {offsets = [0, 96], sizes = [2, 32], strides = [1, 1]} : vector<2x128xf32> to vector<2x32xf32>
    %835 = arith.mulf %832, %819 : vector<2x32xf32>
    %836 = arith.mulf %831, %833 : vector<2x32xf32>
    %837 = arith.addf %835, %836 : vector<2x32xf32>
    %838 = math.tanh %837 : vector<2x32xf32>
    %839 = arith.mulf %834, %838 : vector<2x32xf32>
    %840 = vector.extract_strided_slice %656 {offsets = [20, 0], sizes = [2, 128], strides = [1, 1]} : vector<32x128xf32> to vector<2x128xf32>
    %cst_178 = arith.constant dense<0.000000e+00> : vector<2x128xf32>
    %841 = tpu.matmul %839, %657, %cst_178 {dimension_numbers = #tpu.dot_dimension_numbers<[1], [0], [0], [1], [0, 0, 1, 1], [], []>} : vector<2x32xf32>, vector<32x128xf32>, vector<2x128xf32> -> vector<2x128xf32>
    %842 = arith.addf %840, %841 : vector<2x128xf32>
    %843 = arith.negf %842 : vector<2x128xf32>
    %844 = math.exp %843 : vector<2x128xf32>
    %cst_179 = arith.constant 1.000000e+00 : f32
    %845 = vector.broadcast %cst_179 : f32 to vector<2x128xf32>
    %846 = arith.addf %845, %844 : vector<2x128xf32>
    %847 = arith.divf %845, %846 : vector<2x128xf32>
    %848 = math.tanh %842 : vector<2x128xf32>
    %849 = vector.extract_strided_slice %847 {offsets = [0, 0], sizes = [2, 32], strides = [1, 1]} : vector<2x128xf32> to vector<2x32xf32>
    %850 = vector.extract_strided_slice %847 {offsets = [0, 32], sizes = [2, 32], strides = [1, 1]} : vector<2x128xf32> to vector<2x32xf32>
    %851 = vector.extract_strided_slice %848 {offsets = [0, 64], sizes = [2, 32], strides = [1, 1]} : vector<2x128xf32> to vector<2x32xf32>
    %852 = vector.extract_strided_slice %847 {offsets = [0, 96], sizes = [2, 32], strides = [1, 1]} : vector<2x128xf32> to vector<2x32xf32>
    %853 = arith.mulf %850, %837 : vector<2x32xf32>
    %854 = arith.mulf %849, %851 : vector<2x32xf32>
    %855 = arith.addf %853, %854 : vector<2x32xf32>
    %856 = math.tanh %855 : vector<2x32xf32>
    %857 = arith.mulf %852, %856 : vector<2x32xf32>
    %858 = vector.extract_strided_slice %656 {offsets = [22, 0], sizes = [2, 128], strides = [1, 1]} : vector<32x128xf32> to vector<2x128xf32>
    %cst_180 = arith.constant dense<0.000000e+00> : vector<2x128xf32>
    %859 = tpu.matmul %857, %657, %cst_180 {dimension_numbers = #tpu.dot_dimension_numbers<[1], [0], [0], [1], [0, 0, 1, 1], [], []>} : vector<2x32xf32>, vector<32x128xf32>, vector<2x128xf32> -> vector<2x128xf32>
    %860 = arith.addf %858, %859 : vector<2x128xf32>
    %861 = arith.negf %860 : vector<2x128xf32>
    %862 = math.exp %861 : vector<2x128xf32>
    %cst_181 = arith.constant 1.000000e+00 : f32
    %863 = vector.broadcast %cst_181 : f32 to vector<2x128xf32>
    %864 = arith.addf %863, %862 : vector<2x128xf32>
    %865 = arith.divf %863, %864 : vector<2x128xf32>
    %866 = math.tanh %860 : vector<2x128xf32>
    %867 = vector.extract_strided_slice %865 {offsets = [0, 0], sizes = [2, 32], strides = [1, 1]} : vector<2x128xf32> to vector<2x32xf32>
    %868 = vector.extract_strided_slice %865 {offsets = [0, 32], sizes = [2, 32], strides = [1, 1]} : vector<2x128xf32> to vector<2x32xf32>
    %869 = vector.extract_strided_slice %866 {offsets = [0, 64], sizes = [2, 32], strides = [1, 1]} : vector<2x128xf32> to vector<2x32xf32>
    %870 = vector.extract_strided_slice %865 {offsets = [0, 96], sizes = [2, 32], strides = [1, 1]} : vector<2x128xf32> to vector<2x32xf32>
    %871 = arith.mulf %868, %855 : vector<2x32xf32>
    %872 = arith.mulf %867, %869 : vector<2x32xf32>
    %873 = arith.addf %871, %872 : vector<2x32xf32>
    %874 = math.tanh %873 : vector<2x32xf32>
    %875 = arith.mulf %870, %874 : vector<2x32xf32>
    %876 = vector.extract_strided_slice %656 {offsets = [24, 0], sizes = [2, 128], strides = [1, 1]} : vector<32x128xf32> to vector<2x128xf32>
    %cst_182 = arith.constant dense<0.000000e+00> : vector<2x128xf32>
    %877 = tpu.matmul %875, %657, %cst_182 {dimension_numbers = #tpu.dot_dimension_numbers<[1], [0], [0], [1], [0, 0, 1, 1], [], []>} : vector<2x32xf32>, vector<32x128xf32>, vector<2x128xf32> -> vector<2x128xf32>
    %878 = arith.addf %876, %877 : vector<2x128xf32>
    %879 = arith.negf %878 : vector<2x128xf32>
    %880 = math.exp %879 : vector<2x128xf32>
    %cst_183 = arith.constant 1.000000e+00 : f32
    %881 = vector.broadcast %cst_183 : f32 to vector<2x128xf32>
    %882 = arith.addf %881, %880 : vector<2x128xf32>
    %883 = arith.divf %881, %882 : vector<2x128xf32>
    %884 = math.tanh %878 : vector<2x128xf32>
    %885 = vector.extract_strided_slice %883 {offsets = [0, 0], sizes = [2, 32], strides = [1, 1]} : vector<2x128xf32> to vector<2x32xf32>
    %886 = vector.extract_strided_slice %883 {offsets = [0, 32], sizes = [2, 32], strides = [1, 1]} : vector<2x128xf32> to vector<2x32xf32>
    %887 = vector.extract_strided_slice %884 {offsets = [0, 64], sizes = [2, 32], strides = [1, 1]} : vector<2x128xf32> to vector<2x32xf32>
    %888 = vector.extract_strided_slice %883 {offsets = [0, 96], sizes = [2, 32], strides = [1, 1]} : vector<2x128xf32> to vector<2x32xf32>
    %889 = arith.mulf %886, %873 : vector<2x32xf32>
    %890 = arith.mulf %885, %887 : vector<2x32xf32>
    %891 = arith.addf %889, %890 : vector<2x32xf32>
    %892 = math.tanh %891 : vector<2x32xf32>
    %893 = arith.mulf %888, %892 : vector<2x32xf32>
    %894 = vector.extract_strided_slice %656 {offsets = [26, 0], sizes = [2, 128], strides = [1, 1]} : vector<32x128xf32> to vector<2x128xf32>
    %cst_184 = arith.constant dense<0.000000e+00> : vector<2x128xf32>
    %895 = tpu.matmul %893, %657, %cst_184 {dimension_numbers = #tpu.dot_dimension_numbers<[1], [0], [0], [1], [0, 0, 1, 1], [], []>} : vector<2x32xf32>, vector<32x128xf32>, vector<2x128xf32> -> vector<2x128xf32>
    %896 = arith.addf %894, %895 : vector<2x128xf32>
    %897 = arith.negf %896 : vector<2x128xf32>
    %898 = math.exp %897 : vector<2x128xf32>
    %cst_185 = arith.constant 1.000000e+00 : f32
    %899 = vector.broadcast %cst_185 : f32 to vector<2x128xf32>
    %900 = arith.addf %899, %898 : vector<2x128xf32>
    %901 = arith.divf %899, %900 : vector<2x128xf32>
    %902 = math.tanh %896 : vector<2x128xf32>
    %903 = vector.extract_strided_slice %901 {offsets = [0, 0], sizes = [2, 32], strides = [1, 1]} : vector<2x128xf32> to vector<2x32xf32>
    %904 = vector.extract_strided_slice %901 {offsets = [0, 32], sizes = [2, 32], strides = [1, 1]} : vector<2x128xf32> to vector<2x32xf32>
    %905 = vector.extract_strided_slice %902 {offsets = [0, 64], sizes = [2, 32], strides = [1, 1]} : vector<2x128xf32> to vector<2x32xf32>
    %906 = vector.extract_strided_slice %901 {offsets = [0, 96], sizes = [2, 32], strides = [1, 1]} : vector<2x128xf32> to vector<2x32xf32>
    %907 = arith.mulf %904, %891 : vector<2x32xf32>
    %908 = arith.mulf %903, %905 : vector<2x32xf32>
    %909 = arith.addf %907, %908 : vector<2x32xf32>
    %910 = math.tanh %909 : vector<2x32xf32>
    %911 = arith.mulf %906, %910 : vector<2x32xf32>
    %912 = vector.extract_strided_slice %656 {offsets = [28, 0], sizes = [2, 128], strides = [1, 1]} : vector<32x128xf32> to vector<2x128xf32>
    %cst_186 = arith.constant dense<0.000000e+00> : vector<2x128xf32>
    %913 = tpu.matmul %911, %657, %cst_186 {dimension_numbers = #tpu.dot_dimension_numbers<[1], [0], [0], [1], [0, 0, 1, 1], [], []>} : vector<2x32xf32>, vector<32x128xf32>, vector<2x128xf32> -> vector<2x128xf32>
    %914 = arith.addf %912, %913 : vector<2x128xf32>
    %915 = arith.negf %914 : vector<2x128xf32>
    %916 = math.exp %915 : vector<2x128xf32>
    %cst_187 = arith.constant 1.000000e+00 : f32
    %917 = vector.broadcast %cst_187 : f32 to vector<2x128xf32>
    %918 = arith.addf %917, %916 : vector<2x128xf32>
    %919 = arith.divf %917, %918 : vector<2x128xf32>
    %920 = math.tanh %914 : vector<2x128xf32>
    %921 = vector.extract_strided_slice %919 {offsets = [0, 0], sizes = [2, 32], strides = [1, 1]} : vector<2x128xf32> to vector<2x32xf32>
    %922 = vector.extract_strided_slice %919 {offsets = [0, 32], sizes = [2, 32], strides = [1, 1]} : vector<2x128xf32> to vector<2x32xf32>
    %923 = vector.extract_strided_slice %920 {offsets = [0, 64], sizes = [2, 32], strides = [1, 1]} : vector<2x128xf32> to vector<2x32xf32>
    %924 = vector.extract_strided_slice %919 {offsets = [0, 96], sizes = [2, 32], strides = [1, 1]} : vector<2x128xf32> to vector<2x32xf32>
    %925 = arith.mulf %922, %909 : vector<2x32xf32>
    %926 = arith.mulf %921, %923 : vector<2x32xf32>
    %927 = arith.addf %925, %926 : vector<2x32xf32>
    %928 = math.tanh %927 : vector<2x32xf32>
    %929 = arith.mulf %924, %928 : vector<2x32xf32>
    %930 = vector.extract_strided_slice %656 {offsets = [30, 0], sizes = [2, 128], strides = [1, 1]} : vector<32x128xf32> to vector<2x128xf32>
    %cst_188 = arith.constant dense<0.000000e+00> : vector<2x128xf32>
    %931 = tpu.matmul %929, %657, %cst_188 {dimension_numbers = #tpu.dot_dimension_numbers<[1], [0], [0], [1], [0, 0, 1, 1], [], []>} : vector<2x32xf32>, vector<32x128xf32>, vector<2x128xf32> -> vector<2x128xf32>
    %932 = arith.addf %930, %931 : vector<2x128xf32>
    %933 = arith.negf %932 : vector<2x128xf32>
    %934 = math.exp %933 : vector<2x128xf32>
    %cst_189 = arith.constant 1.000000e+00 : f32
    %935 = vector.broadcast %cst_189 : f32 to vector<2x128xf32>
    %936 = arith.addf %935, %934 : vector<2x128xf32>
    %937 = arith.divf %935, %936 : vector<2x128xf32>
    %938 = math.tanh %932 : vector<2x128xf32>
    %939 = vector.extract_strided_slice %937 {offsets = [0, 0], sizes = [2, 32], strides = [1, 1]} : vector<2x128xf32> to vector<2x32xf32>
    %940 = vector.extract_strided_slice %937 {offsets = [0, 32], sizes = [2, 32], strides = [1, 1]} : vector<2x128xf32> to vector<2x32xf32>
    %941 = vector.extract_strided_slice %938 {offsets = [0, 64], sizes = [2, 32], strides = [1, 1]} : vector<2x128xf32> to vector<2x32xf32>
    %942 = vector.extract_strided_slice %937 {offsets = [0, 96], sizes = [2, 32], strides = [1, 1]} : vector<2x128xf32> to vector<2x32xf32>
    %943 = arith.mulf %940, %927 : vector<2x32xf32>
    %944 = arith.mulf %939, %941 : vector<2x32xf32>
    %945 = arith.addf %943, %944 : vector<2x32xf32>
    %946 = math.tanh %945 : vector<2x32xf32>
    %947 = arith.mulf %942, %946 : vector<2x32xf32>
    %948 = vector.extract_strided_slice %651 {offsets = [30, 0], sizes = [2, 64], strides = [1, 1]} : vector<32x64xf32> to vector<2x64xf32>
    %c0_190 = arith.constant 0 : index
    %c0_191 = arith.constant 0 : index
    %949 = vector.load %arg16[%c0_190, %c0_191] : memref<64x128xf32, #tpu.memory_space<vmem>>, vector<64x128xf32>
    %cst_192 = arith.constant dense<0.000000e+00> : vector<2x128xf32>
    %950 = tpu.matmul %948, %949, %cst_192 {dimension_numbers = #tpu.dot_dimension_numbers<[1], [0], [0], [1], [0, 0, 1, 1], [], []>} : vector<2x64xf32>, vector<64x128xf32>, vector<2x128xf32> -> vector<2x128xf32>
    %c0_193 = arith.constant 0 : index
    %c0_194 = arith.constant 0 : index
    %951 = vector.load %arg18[%c0_193, %c0_194] : memref<1x128xf32, #tpu.memory_space<vmem>>, vector<1x128xf32>
    %952 = vector.broadcast %951 : vector<1x128xf32> to vector<2x128xf32>
    %953 = arith.addf %950, %952 : vector<2x128xf32>
    %cst_195 = arith.constant 0.000000e+00 : f32
    %954 = vector.broadcast %cst_195 : f32 to vector<2x32xf32>
    %955 = arith.negf %953 : vector<2x128xf32>
    %956 = math.exp %955 : vector<2x128xf32>
    %cst_196 = arith.constant 1.000000e+00 : f32
    %957 = vector.broadcast %cst_196 : f32 to vector<2x128xf32>
    %958 = arith.addf %957, %956 : vector<2x128xf32>
    %959 = arith.divf %957, %958 : vector<2x128xf32>
    %960 = math.tanh %953 : vector<2x128xf32>
    %961 = vector.extract_strided_slice %959 {offsets = [0, 0], sizes = [2, 32], strides = [1, 1]} : vector<2x128xf32> to vector<2x32xf32>
    %962 = vector.extract_strided_slice %959 {offsets = [0, 32], sizes = [2, 32], strides = [1, 1]} : vector<2x128xf32> to vector<2x32xf32>
    %963 = vector.extract_strided_slice %960 {offsets = [0, 64], sizes = [2, 32], strides = [1, 1]} : vector<2x128xf32> to vector<2x32xf32>
    %964 = vector.extract_strided_slice %959 {offsets = [0, 96], sizes = [2, 32], strides = [1, 1]} : vector<2x128xf32> to vector<2x32xf32>
    %965 = arith.mulf %962, %954 : vector<2x32xf32>
    %966 = arith.mulf %961, %963 : vector<2x32xf32>
    %967 = arith.addf %965, %966 : vector<2x32xf32>
    %968 = math.tanh %967 : vector<2x32xf32>
    %969 = arith.mulf %964, %968 : vector<2x32xf32>
    %c0_197 = arith.constant 0 : index
    %c0_198 = arith.constant 0 : index
    %970 = vector.load %arg19[%c0_197, %c0_198] : memref<64x1xf32, #tpu.memory_space<vmem>>, vector<32x1xf32>
    %cst_199 = arith.constant dense<0.000000e+00> : vector<2x1xf32>
    %971 = tpu.matmul %947, %970, %cst_199 {dimension_numbers = #tpu.dot_dimension_numbers<[1], [0], [0], [1], [0, 0, 1, 1], [], []>} : vector<2x32xf32>, vector<32x1xf32>, vector<2x1xf32> -> vector<2x1xf32>
    %c32_200 = arith.constant 32 : index
    %c0_201 = arith.constant 0 : index
    %972 = vector.load %arg19[%c32_200, %c0_201] : memref<64x1xf32, #tpu.memory_space<vmem>>, vector<32x1xf32>
    %cst_202 = arith.constant dense<0.000000e+00> : vector<2x1xf32>
    %973 = tpu.matmul %969, %972, %cst_202 {dimension_numbers = #tpu.dot_dimension_numbers<[1], [0], [0], [1], [0, 0, 1, 1], [], []>} : vector<2x32xf32>, vector<32x1xf32>, vector<2x1xf32> -> vector<2x1xf32>
    %974 = arith.addf %971, %973 : vector<2x1xf32>
    %c0_203 = arith.constant 0 : index
    %c0_204 = arith.constant 0 : index
    %975 = vector.load %arg20[%c0_203, %c0_204] : memref<1x1xf32, #tpu.memory_space<vmem>>, vector<1x1xf32>
    %976 = vector.broadcast %975 : vector<1x1xf32> to vector<2x1xf32>
    %977 = arith.addf %974, %976 : vector<2x1xf32>
    %978 = arith.negf %977 : vector<2x1xf32>
    %979 = math.exp %978 : vector<2x1xf32>
    %cst_205 = arith.constant 1.000000e+00 : f32
    %980 = vector.broadcast %cst_205 : f32 to vector<2x1xf32>
    %981 = arith.addf %980, %979 : vector<2x1xf32>
    %982 = arith.divf %980, %981 : vector<2x1xf32>
    %c0_206 = arith.constant 0 : index
    %c0_207 = arith.constant 0 : index
    %983 = vector.load %arg21[%c0_206, %c0_207] : memref<2x1xf32, #tpu.memory_space<vmem>>, vector<2x1xf32>
    tpu.vector_store %arg21[%c0_206, %c0_207], %982 {strides = array<i32>} : memref<2x1xf32, #tpu.memory_space<vmem>>, vector<2x1xf32>,
    return
  }
}

</mosaic_0001>

<bundles_post_ra>
// kernel: model_forward.1
= control target key start
LH: loop header
LB: loop body
LE: loop exit
PB: predicated region body
PF: predicated region fallthrough
CT: control target
= control target key end

     0   :  { %s9962_s0 = inlined_call_operand.vmem [shape: f32[32,3], index: 0, kind: input, shape index: {}]   ;;  %s9963_s1 = inlined_call_operand.hbm [shape: f32[3,16], index: 1, kind: input, shape index: {}]   ;;  %s9964_s2 = inlined_call_operand.hbm [shape: f32[1,16], index: 2, kind: input, shape index: {}]   ;;  %s9965_s3 = inlined_call_operand.hbm [shape: f32[1,16], index: 3, kind: input, shape index: {}]   ;;  %s9966_s4 = inlined_call_operand.vmem [shape: f32[48,16], index: 4, kind: input, shape index: {}]   ;;  %s9967_s5 = inlined_call_operand.hbm [shape: f32[1,16], index: 5, kind: input, shape index: {}]   ;;  %s9968_s6 = inlined_call_operand.hbm [shape: f32[1,16], index: 6, kind: input, shape index: {}]   ;;  %s9969_s7 = inlined_call_operand.vmem [shape: f32[16,128], index: 7, kind: input, shape index: {}]   ;;  %s9970_s8 = inlined_call_operand.hbm [shape: f32[32,128], index: 8, kind: input, shape index: {}]   ;;  %s9971_s9 = inlined_call_operand.hbm [shape: f32[1,128], index: 9, kind: input, shape index: {}]   ;;  %s9972_s10 = inlined_call_operand.hbm [shape: f32[16,128], index: 10, kind: input, shape index: {}]   ;;  %s9973_s11 = inlined_call_operand.hbm [shape: f32[32,128], index: 11, kind: input, shape index: {}]   ;;  %s9974_s12 = inlined_call_operand.hbm [shape: f32[1,128], index: 12, kind: input, shape index: {}]   ;;  %s9975_s13 = inlined_call_operand.vmem [shape: f32[64,128], index: 13, kind: input, shape index: {}]   ;;  %s9976_s14 = inlined_call_operand.hbm [shape: f32[32,128], index: 14, kind: input, shape index: {}]   ;;  %s9977_s15 = inlined_call_operand.hbm [shape: f32[1,128], index: 15, kind: input, shape index: {}]   ;;  %s9978_s16 = inlined_call_operand.vmem [shape: f32[64,128], index: 16, kind: input, shape index: {}]   ;;  %s9979_s17 = inlined_call_operand.hbm [shape: f32[32,128], index: 17, kind: input, shape index: {}]   ;;  %s9980_s18 = inlined_call_operand.hbm [shape: f32[1,128], index: 18, kind: input, shape index: {}]   ;;  %s9981_s19 = inlined_call_operand.vmem [shape: f32[64,1], index: 19, kind: input, shape index: {}]   ;;  %s9982_s20 = inlined_call_operand.<no memory space> [shape: f32[1,1], index: 20, kind: input, shape index: {}]   ;;  %s9983_s21 = inlined_call_operand.vmem [shape: f32[2,1], index: 21, kind: output, shape index: {}]  }
   0x1   :  { %9990 = sst [smem:[#allocation34_spill]] %s9962_s0  ;;  %v26_v0 = vstv %s9982_s20 }
   0x2   :  { %9991 = sst [smem:[#allocation35_spill]] %s9963_s1  ;;  %27 = vst [vmem:[#allocation3] sm:$0x1] %v26_v0 }
   0x3   :  { %9992 = sst [smem:[#allocation36_spill]] %s9964_s2 }
   0x4   :  { %9993 = sst [smem:[#allocation37_spill]] %s9965_s3 }
   0x5   :  { %9994 = sst [smem:[#allocation38_spill]] %s9966_s4 }
   0x6   :  { %9995 = sst [smem:[#allocation39_spill]] %s9967_s5 }
   0x7   :  { %28 = vsyncpa [#allocation5], 0 }
   0x8   :  { %29 = vsyncpa [#allocation7], 0 }
   0x9   :  { %30 = vsyncpa [#allocation10], 0 }
   0xa   :  { %31 = vsyncpa [#allocation13], 0 }
   0xb   :  { %32 = vsyncpa [#allocation16], 0 }
   0xc   :  { %33 = vsyncpa [#allocation19], 0 }
   0xd   :  { %34 = vsyncpa [#allocation22], 0 }
   0xe   :  { %35 = vsyncpa [#allocation25], 0  ;;  %s8543_s26 = smov [#allocation6]   ;;  %s8544_s3 = smov [#allocation9]  }
   0xf   :  { %s54_s27 = sshll.u32 %s8543_s26, 4  ;;  %s76_s28 = sshll.u32 %s8544_s3, 4  ;;  %s55_s27 = int_to_ptr.vmem [resolvable:$true] %s54_s27  ;;  %s77_s28 = int_to_ptr.vmem [resolvable:$true] %s76_s28 }
  0x10   :  { %s9996_s4 = sld [smem:[#allocation36_spill]] }
  0x16   :  { %s8219_s30 = scalar_lea.hbm %s9996_s4, 16 }
  0x17   :  { %p8220_p0 = scmp.ne.s32.totalorder %s9996_s4, %s8219_s30  ;;  %p8223_p1 = scmp.lt.u32.totalorder %s8219_s30, %s9996_s4 }
  0x19   :  { %p8225_p2 = pnand %p8223_p1, %p8220_p0 }
  0x1b   :  { %8228 = shalt.err (!%p8225_p2)
}
  0x1c   :  { %s8229_s1 = scalar_lea.vmem %s55_s27, 16  ;;  %s8233_s24 = scalar_lea.vmem %s55_s27, 32 }
  0x1d   :  { %p8230_p3 = scmp.ne.s32.totalorder %s55_s27, %s8229_s1  ;;  %p8234_p4 = scmp.lt.s32.totalorder %s55_s27, %s55_s27 }
  0x1e   :  { %p8235_p5 = scmp.lt.s32.totalorder %s8233_s24, %s8229_s1 }
  0x20   :  { %p8236_p6 = por %p8235_p5, %p8234_p4 }
  0x22   :  { %p8237_p7 = pnand %p8236_p6, %p8230_p3 }
  0x24   :  { %8240 = shalt.err (!%p8237_p7)
}
  0x25   :  { %57 = dma.hbm_to_vmem [thread:$0]  %s9996_s4, 16, %s55_s27, [#allocation7]  }
  0x26   :  { %s9997_s29 = sld [smem:[#allocation39_spill]] }
  0x2c   :  { %s8241_s0 = scalar_lea.hbm %s9997_s29, 16 }
  0x2d   :  { %p8242_p8 = scmp.ne.s32.totalorder %s9997_s29, %s8241_s0  ;;  %p8245_p9 = scmp.lt.u32.totalorder %s8241_s0, %s9997_s29 }
  0x2f   :  { %p8247_p10 = pnand %p8245_p9, %p8242_p8 }
  0x31   :  { %8250 = shalt.err (!%p8247_p10)
}
  0x32   :  { %s8251_s23 = scalar_lea.vmem %s77_s28, 16  ;;  %s8255_s1 = scalar_lea.vmem %s77_s28, 32 }
  0x33   :  { %p8252_p11 = scmp.ne.s32.totalorder %s77_s28, %s8251_s23  ;;  %p8256_p12 = scmp.lt.s32.totalorder %s77_s28, %s77_s28 }
  0x34   :  { %p8257_p13 = scmp.lt.s32.totalorder %s8255_s1, %s8251_s23 }
  0x36   :  { %p8258_p0 = por %p8257_p13, %p8256_p12 }
  0x38   :  { %p8259_p1 = pnand %p8258_p0, %p8252_p11 }
  0x3a   :  { %8262 = shalt.err (!%p8259_p1)
}
  0x3b   :  { %79 = dma.hbm_to_vmem [thread:$0]  %s9997_s29, 16, %s77_s28, [#allocation10]  }
  0x3c   :  { %s8545_s24 = smov [#allocation12]   ;;  %s8263_s3 = scalar_lea.hbm %s9970_s8, 512 }
  0x3d   :  { %s97_s2 = sshll.u32 %s8545_s24, 4  ;;  %p8264_p2 = scmp.ne.s32.totalorder %s9970_s8, %s8263_s3  ;;  %s98_s2 = int_to_ptr.vmem [resolvable:$true] %s97_s2 }
  0x3e   :  { %p8267_p3 = scmp.lt.u32.totalorder %s8263_s3, %s9970_s8 }
  0x40   :  { %p8269_p4 = pnand %p8267_p3, %p8264_p2 }
  0x42   :  { %8272 = shalt.err (!%p8269_p4)
}
  0x43   :  { %s8273_s22 = scalar_lea.vmem %s98_s2, 512  ;;  %p8278_p6 = scmp.lt.s32.totalorder %s98_s2, %s98_s2 }
  0x44   :  { %p8274_p5 = scmp.ne.s32.totalorder %s98_s2, %s8273_s22  ;;  %p8279_p7 = scmp.lt.s32.totalorder %s8273_s22, %s8273_s22 }
  0x46   :  { %p8280_p8 = por %p8279_p7, %p8278_p6 }
  0x48   :  { %p8281_p9 = pnand %p8280_p8, %p8274_p5 }
  0x4a   :  { %8284 = shalt.err (!%p8281_p9)
}
  0x4b   :  { %s8546_s28 = smov 128   ;;  %s8547_s29 = smov 8  }
  0x4c   :  { %103 = dma.hbm_to_vmem [thread:$0]  %s9970_s8, 512, %s98_s2, [#allocation13], %s8546_s28, %s8546_s28, %s8547_s29  }
  0x4d   :  { %s8548_s27 = smov [#allocation15]   ;;  %s8549_s24 = smov [#allocation18]  }
  0x4e   :  { %s119_s4 = sshll.u32 %s8548_s27, 4  ;;  %s144_s25 = sshll.u32 %s8549_s24, 4  ;;  %s120_s4 = int_to_ptr.vmem [resolvable:$true] %s119_s4  ;;  %s145_s25 = int_to_ptr.vmem [resolvable:$true] %s144_s25 }
  0x4f   :  { %s8285_s0 = scalar_lea.hbm %s9972_s10, 256 }
  0x50   :  { %p8286_p10 = scmp.ne.s32.totalorder %s9972_s10, %s8285_s0  ;;  %p8289_p11 = scmp.lt.u32.totalorder %s8285_s0, %s9972_s10 }
  0x52   :  { %p8291_p12 = pnand %p8289_p11, %p8286_p10 }
  0x54   :  { %8294 = shalt.err (!%p8291_p12)
}
  0x55   :  { %s8295_s8 = scalar_lea.vmem %s120_s4, 256  ;;  %p8300_p0 = scmp.lt.s32.totalorder %s120_s4, %s120_s4 }
  0x56   :  { %p8296_p13 = scmp.ne.s32.totalorder %s120_s4, %s8295_s8  ;;  %p8301_p1 = scmp.lt.s32.totalorder %s8295_s8, %s8295_s8 }
  0x58   :  { %p8302_p2 = por %p8301_p1, %p8300_p0 }
  0x5a   :  { %p8303_p3 = pnand %p8302_p2, %p8296_p13 }
  0x5c   :  { %8306 = shalt.err (!%p8303_p3)
}
  0x5d   :  { %125 = dma.hbm_to_vmem [thread:$0]  %s9972_s10, 256, %s120_s4, [#allocation16], %s8546_s28, %s8546_s28, %s8547_s29  }
  0x5e   :  { %s8307_s24 = scalar_lea.hbm %s9974_s12, 16 }
  0x5f   :  { %p8308_p4 = scmp.ne.s32.totalorder %s9974_s12, %s8307_s24  ;;  %p8311_p5 = scmp.lt.u32.totalorder %s8307_s24, %s9974_s12 }
  0x61   :  { %p8313_p6 = pnand %p8311_p5, %p8308_p4 }
  0x63   :  { %8316 = shalt.err (!%p8313_p6)
}
  0x64   :  { %s8317_s30 = scalar_lea.vmem %s145_s25, 16  ;;  %s8321_s5 = scalar_lea.vmem %s145_s25, 32 }
  0x65   :  { %p8318_p7 = scmp.ne.s32.totalorder %s145_s25, %s8317_s30  ;;  %p8322_p8 = scmp.lt.s32.totalorder %s145_s25, %s145_s25 }
  0x66   :  { %p8323_p9 = scmp.lt.s32.totalorder %s8321_s5, %s8317_s30 }
  0x68   :  { %p8324_p10 = por %p8323_p9, %p8322_p8 }
  0x6a   :  { %p8325_p11 = pnand %p8324_p10, %p8318_p7 }
  0x6c   :  { %8328 = shalt.err (!%p8325_p11)
}
  0x6d   :  { %147 = dma.hbm_to_vmem [thread:$0]  %s9974_s12, 16, %s145_s25, [#allocation19]  }
  0x6e   :  { %s8550_s22 = smov [#allocation21]   ;;  %s8551_s2 = smov [#allocation4]  }
  0x6f   :  { %s168_s8 = sshll.u32 %s8550_s22, 4  ;;  %s44_s23 = sshll.u32 %s8551_s2, 4  ;;  %s169_s8 = int_to_ptr.vmem [resolvable:$true] %s168_s8  ;;  %s45_s23 = int_to_ptr.vmem [resolvable:$true] %s44_s23 }
  0x70   :  { %s8329_s24 = scalar_lea.hbm %s9977_s15, 16 }
  0x71   :  { %p8330_p12 = scmp.ne.s32.totalorder %s9977_s15, %s8329_s24  ;;  %p8333_p13 = scmp.lt.u32.totalorder %s8329_s24, %s9977_s15 }
  0x73   :  { %p8335_p0 = pnand %p8333_p13, %p8330_p12 }
  0x75   :  { %8338 = shalt.err (!%p8335_p0)
}
  0x76   :  { %s8339_s12 = scalar_lea.vmem %s169_s8, 16  ;;  %s8343_s25 = scalar_lea.vmem %s169_s8, 32 }
  0x77   :  { %p8340_p1 = scmp.ne.s32.totalorder %s169_s8, %s8339_s12  ;;  %p8344_p2 = scmp.lt.s32.totalorder %s169_s8, %s169_s8 }
  0x78   :  { %p8345_p3 = scmp.lt.s32.totalorder %s8343_s25, %s8339_s12 }
  0x7a   :  { %p8346_p4 = por %p8345_p3, %p8344_p2 }
  0x7c   :  { %p8347_p5 = pnand %p8346_p4, %p8340_p1 }
  0x7e   :  { %8350 = shalt.err (!%p8347_p5)
}
  0x7f   :  { %171 = dma.hbm_to_vmem [thread:$0]  %s9977_s15, 16, %s169_s8, [#allocation22]  }
  0x80   :  { %s9998_s22 = sld [smem:[#allocation35_spill]] }
  0x86   :  { %s8351_s2 = scalar_lea.hbm %s9998_s22, 64 }
  0x87   :  { %p8352_p6 = scmp.ne.s32.totalorder %s9998_s22, %s8351_s2  ;;  %p8355_p7 = scmp.lt.u32.totalorder %s8351_s2, %s9998_s22 }
  0x89   :  { %p8357_p8 = pnand %p8355_p7, %p8352_p6 }
  0x8b   :  { %8360 = shalt.err (!%p8357_p8)
}
  0x8c   :  { %s8361_s3 = scalar_lea.vmem %s45_s23, 64  ;;  %p8366_p10 = scmp.lt.s32.totalorder %s45_s23, %s45_s23 }
  0x8d   :  { %p8362_p9 = scmp.ne.s32.totalorder %s45_s23, %s8361_s3  ;;  %p8367_p11 = scmp.lt.s32.totalorder %s8361_s3, %s8361_s3 }
  0x8f   :  { %p8368_p12 = por %p8367_p11, %p8366_p10 }
  0x91   :  { %p8369_p13 = pnand %p8368_p12, %p8362_p9 }
  0x93   :  { %8372 = shalt.err (!%p8369_p13)
}
  0x94   :  { %47 = dma.hbm_to_vmem [thread:$0]  %s9998_s22, 64, %s45_s23, [#allocation5]  }
  0x95   :  { %s8552_s0 = smov [#allocation8]   ;;  %s8553_s12 = smov [#allocation11]  }
  0x96   :  { %s64_s20 = sshll.u32 %s8552_s0, 4  ;;  %s86_s25 = sshll.u32 %s8553_s12, 4  ;;  %s65_s20 = int_to_ptr.vmem [resolvable:$true] %s64_s20  ;;  %s87_s25 = int_to_ptr.vmem [resolvable:$true] %s86_s25 }
  0x97   :  { %s9999_s10 = sld [smem:[#allocation37_spill]] }
  0x9d   :  { %s8373_s4 = scalar_lea.hbm %s9999_s10, 16 }
  0x9e   :  { %p8374_p0 = scmp.ne.s32.totalorder %s9999_s10, %s8373_s4  ;;  %p8377_p1 = scmp.lt.u32.totalorder %s8373_s4, %s9999_s10 }
  0xa0   :  { %p8379_p2 = pnand %p8377_p1, %p8374_p0 }
  0xa2   :  { %8382 = shalt.err (!%p8379_p2)
}
  0xa3   :  { %s8383_s23 = scalar_lea.vmem %s65_s20, 16  ;;  %s8387_s22 = scalar_lea.vmem %s65_s20, 32 }
  0xa4   :  { %p8384_p3 = scmp.ne.s32.totalorder %s65_s20, %s8383_s23  ;;  %p8388_p4 = scmp.lt.s32.totalorder %s65_s20, %s65_s20 }
  0xa5   :  { %p8389_p5 = scmp.lt.s32.totalorder %s8387_s22, %s8383_s23 }
  0xa7   :  { %p8390_p6 = por %p8389_p5, %p8388_p4 }
  0xa9   :  { %p8391_p7 = pnand %p8390_p6, %p8384_p3 }
  0xab   :  { %8394 = shalt.err (!%p8391_p7)
}
  0xac   :  { %67 = dma.hbm_to_vmem [thread:$0]  %s9999_s10, 16, %s65_s20, [#allocation7]  }
  0xad   :  { %s8395_s0 = scalar_lea.hbm %s9968_s6, 16 }
  0xae   :  { %p8396_p8 = scmp.ne.s32.totalorder %s9968_s6, %s8395_s0  ;;  %p8399_p9 = scmp.lt.u32.totalorder %s8395_s0, %s9968_s6 }
  0xb0   :  { %p8401_p10 = pnand %p8399_p9, %p8396_p8 }
  0xb2   :  { %8404 = shalt.err (!%p8401_p10)
}
  0xb3   :  { %s8405_s2 = scalar_lea.vmem %s87_s25, 16  ;;  %s8409_s1 = scalar_lea.vmem %s87_s25, 32 }
  0xb4   :  { %p8406_p11 = scmp.ne.s32.totalorder %s87_s25, %s8405_s2  ;;  %p8410_p12 = scmp.lt.s32.totalorder %s87_s25, %s87_s25 }
  0xb5   :  { %p8411_p13 = scmp.lt.s32.totalorder %s8409_s1, %s8405_s2 }
  0xb7   :  { %p8412_p0 = por %p8411_p13, %p8410_p12 }
  0xb9   :  { %p8413_p1 = pnand %p8412_p0, %p8406_p11 }
  0xbb   :  { %8416 = shalt.err (!%p8413_p1)
}
  0xbc   :  { %89 = dma.hbm_to_vmem [thread:$0]  %s9968_s6, 16, %s87_s25, [#allocation10]  }
  0xbd   :  { %s8554_s27 = smov [#allocation14]   ;;  %s8555_s23 = smov [#allocation17]  }
  0xbe   :  { %s110_s24 = sshll.u32 %s8554_s27, 4  ;;  %s131_s22 = sshll.u32 %s8555_s23, 4  ;;  %s111_s24 = int_to_ptr.vmem [resolvable:$true] %s110_s24  ;;  %s132_s22 = int_to_ptr.vmem [resolvable:$true] %s131_s22 }
  0xbf   :  { %s8417_s15 = scalar_lea.hbm %s9971_s9, 16 }
  0xc0   :  { %p8418_p2 = scmp.ne.s32.totalorder %s9971_s9, %s8417_s15  ;;  %p8421_p3 = scmp.lt.u32.totalorder %s8417_s15, %s9971_s9 }
  0xc2   :  { %p8423_p4 = pnand %p8421_p3, %p8418_p2 }
  0xc4   :  { %8426 = shalt.err (!%p8423_p4)
}
  0xc5   :  { %s8427_s6 = scalar_lea.vmem %s111_s24, 16  ;;  %s8431_s25 = scalar_lea.vmem %s111_s24, 32 }
  0xc6   :  { %p8428_p5 = scmp.ne.s32.totalorder %s111_s24, %s8427_s6  ;;  %p8432_p6 = scmp.lt.s32.totalorder %s111_s24, %s111_s24 }
  0xc7   :  { %p8433_p7 = scmp.lt.s32.totalorder %s8431_s25, %s8427_s6 }
  0xc9   :  { %p8434_p8 = por %p8433_p7, %p8432_p6 }
  0xcb   :  { %p8435_p9 = pnand %p8434_p8, %p8428_p5 }
  0xcd   :  { %8438 = shalt.err (!%p8435_p9)
}
  0xce   :  { %113 = dma.hbm_to_vmem [thread:$0]  %s9971_s9, 16, %s111_s24, [#allocation13]  }
  0xcf   :  { %s8439_s20 = scalar_lea.hbm %s9973_s11, 512 }
  0xd0   :  { %p8440_p10 = scmp.ne.s32.totalorder %s9973_s11, %s8439_s20  ;;  %p8443_p11 = scmp.lt.u32.totalorder %s8439_s20, %s9973_s11 }
  0xd2   :  { %p8445_p12 = pnand %p8443_p11, %p8440_p10 }
  0xd4   :  { %8448 = shalt.err (!%p8445_p12)
}
  0xd5   :  { %s8449_s3 = scalar_lea.vmem %s132_s22, 512  ;;  %p8454_p0 = scmp.lt.s32.totalorder %s132_s22, %s132_s22 }
  0xd6   :  { %p8450_p13 = scmp.ne.s32.totalorder %s132_s22, %s8449_s3  ;;  %p8455_p1 = scmp.lt.s32.totalorder %s8449_s3, %s8449_s3 }
  0xd8   :  { %p8456_p2 = por %p8455_p1, %p8454_p0 }
  0xda   :  { %p8457_p3 = pnand %p8456_p2, %p8450_p13 }
  0xdc   :  { %8460 = shalt.err (!%p8457_p3)
}
  0xdd   :  { %137 = dma.hbm_to_vmem [thread:$0]  %s9973_s11, 512, %s132_s22, [#allocation16], %s8546_s28, %s8546_s28, %s8547_s29  }
  0xde   :  { %s8556_s15 = smov [#allocation20]   ;;  %s8557_s0 = smov [#allocation23]  }
  0xdf   :  { %s155_s8 = sshll.u32 %s8556_s15, 4  ;;  %s179_s12 = sshll.u32 %s8557_s0, 4  ;;  %s156_s8 = int_to_ptr.vmem [resolvable:$true] %s155_s8  ;;  %s180_s12 = int_to_ptr.vmem [resolvable:$true] %s179_s12 }
  0xe0   :  { %s8461_s25 = scalar_lea.hbm %s9976_s14, 512 }
  0xe1   :  { %p8462_p4 = scmp.ne.s32.totalorder %s9976_s14, %s8461_s25  ;;  %p8465_p5 = scmp.lt.u32.totalorder %s8461_s25, %s9976_s14 }
  0xe3   :  { %p8467_p6 = pnand %p8465_p5, %p8462_p4 }
  0xe5   :  { %8470 = shalt.err (!%p8467_p6)
}
  0xe6   :  { %s8471_s11 = scalar_lea.vmem %s156_s8, 512  ;;  %p8476_p8 = scmp.lt.s32.totalorder %s156_s8, %s156_s8 }
  0xe7   :  { %p8472_p7 = scmp.ne.s32.totalorder %s156_s8, %s8471_s11  ;;  %p8477_p9 = scmp.lt.s32.totalorder %s8471_s11, %s8471_s11 }
  0xe9   :  { %p8478_p10 = por %p8477_p9, %p8476_p8 }
  0xeb   :  { %p8479_p11 = pnand %p8478_p10, %p8472_p7 }
  0xed   :  { %8482 = shalt.err (!%p8479_p11)
}
  0xee   :  { %161 = dma.hbm_to_vmem [thread:$0]  %s9976_s14, 512, %s156_s8, [#allocation19], %s8546_s28, %s8546_s28, %s8547_s29  }
  0xef   :  { %s8483_s23 = scalar_lea.hbm %s9979_s17, 512 }
  0xf0   :  { %p8484_p12 = scmp.ne.s32.totalorder %s9979_s17, %s8483_s23  ;;  %p8487_p13 = scmp.lt.u32.totalorder %s8483_s23, %s9979_s17 }
  0xf2   :  { %p8489_p0 = pnand %p8487_p13, %p8484_p12 }
  0xf4   :  { %8492 = shalt.err (!%p8489_p0)
}
  0xf5   :  { %s8493_s15 = scalar_lea.vmem %s180_s12, 512  ;;  %p8498_p2 = scmp.lt.s32.totalorder %s180_s12, %s180_s12 }
  0xf6   :  { %p8494_p1 = scmp.ne.s32.totalorder %s180_s12, %s8493_s15  ;;  %p8499_p3 = scmp.lt.s32.totalorder %s8493_s15, %s8493_s15 }
  0xf8   :  { %p8500_p4 = por %p8499_p3, %p8498_p2 }
  0xfa   :  { %p8501_p5 = pnand %p8500_p4, %p8494_p1 }
  0xfc   :  { %8504 = shalt.err (!%p8501_p5)
}
  0xfd   :  { %185 = dma.hbm_to_vmem [thread:$0]  %s9979_s17, 512, %s180_s12, [#allocation22], %s8546_s28, %s8546_s28, %s8547_s29  }
  0xfe   :  { %s8558_s0 = smov [#allocation24]   ;;  %s8505_s5 = scalar_lea.hbm %s9980_s18, 16 }
  0xff   :  { %s192_s30 = sshll.u32 %s8558_s0, 4  ;;  %p8506_p6 = scmp.ne.s32.totalorder %s9980_s18, %s8505_s5  ;;  %s193_s30 = int_to_ptr.vmem [resolvable:$true] %s192_s30 }
 0x100   :  { %p8509_p7 = scmp.lt.u32.totalorder %s8505_s5, %s9980_s18 }
 0x102   :  { %p8511_p8 = pnand %p8509_p7, %p8506_p6 }
 0x104   :  { %8514 = shalt.err (!%p8511_p8)
}
 0x105   :  { %s8515_s22 = scalar_lea.vmem %s193_s30, 16  ;;  %s8519_s17 = scalar_lea.vmem %s193_s30, 32 }
 0x106   :  { %p8516_p9 = scmp.ne.s32.totalorder %s193_s30, %s8515_s22  ;;  %p8520_p10 = scmp.lt.s32.totalorder %s193_s30, %s193_s30 }
 0x107   :  { %p8521_p11 = scmp.lt.s32.totalorder %s8519_s17, %s8515_s22 }
 0x109   :  { %p8522_p12 = por %p8521_p11, %p8520_p10 }
 0x10b   :  { %p8523_p13 = pnand %p8522_p12, %p8516_p9 }
 0x10d   :  { %8526 = shalt.err (!%p8523_p13)
}
 0x10e   :  { %195 = dma.hbm_to_vmem [thread:$0]  %s9980_s18, 16, %s193_s30, [#allocation25]  }
 0x10f   :  { %8527 = dma.done.wait [#allocation5], 64  }
 0x110   :  { %8528 = vsyncadd [#allocation5], 4294967232 }
 0x111   :  { %8529 = dma.done.wait [#allocation7], 32  }
 0x112   :  { %8530 = vsyncadd [#allocation7], 4294967264 }
 0x113   :  { %8531 = dma.done.wait [#allocation10], 32  }
 0x114   :  { %8532 = vsyncadd [#allocation10], 4294967264 }
 0x115   :  { %8533 = dma.done.wait [#allocation13], 528  }
 0x116   :  { %8534 = vsyncadd [#allocation13], 4294966768 }
 0x117   :  { %8535 = dma.done.wait [#allocation16], 768  }
 0x118   :  { %8536 = vsyncadd [#allocation16], 4294966528 }
 0x119   :  { %8537 = dma.done.wait [#allocation19], 528  }
 0x11a   :  { %8538 = vsyncadd [#allocation19], 4294966768 }
 0x11b   :  { %8539 = dma.done.wait [#allocation22], 528  }
 0x11c   :  { %8540 = vsyncadd [#allocation22], 4294966768 }
 0x11d   :  { %8541 = dma.done.wait [#allocation25], 16  }
 0x11e   :  { %8542 = vsyncadd [#allocation25], 4294967280  ;;  %vm260_vm0 = vcmask 1042432   ;;  %vm247_vm1 = vcmask 23552   ;;  %v246_v1 = vld [vmem:[#allocation4] sm:$0x7] }
 0x11f   :  { %s10000_s20 = sld [smem:[#allocation34_spill]]  ;;  %6816 = vmatprep.subr.msk.mxu1 %vm260_vm0, %v246_v1  ;;  %s10001_s14 = sld [smem:[#allocation38_spill]]  ;;  %v6395_v12 = vld [vmem:[#allocation6] ss:$0 sm:$0xff]  ;;  %v6396_v14 = vld [vmem:[#allocation8] ss:$0 sm:$0xff] }
 0x120   :  { %6817 = vmatpush3.msk.msra.mxu1 %vm260_vm0, %v246_v1  ;;  %vm392_vm2 = vcmask 1045504   ;;  %s8559_s22 = smov 16   ;;  %vm379_vm3 = vcmask 1041408   ;;  %s8560_s17 = smov 32   ;;  %vm432_vm4 = vcmask 261120   ;;  %vm427_vm5 = vcmask 130048  }
 0x121   :  { %vm443_vm6 = vcmask 392192   ;;  %v567_v1 = vld [vmem:[%s9969_s7] sm:$0xff]  ;;  %vm8562_vm7 = vmmov 0   ;;  %vm975_vm8 = vcmask 254976   ;;  %vm1420_vm9 = vcmask 259076  }
 0x122   :  { %vm1196_vm10 = vcmask 257026   ;;  %vm1641_vm11 = vcmask 261126   ;;  %vm1202_vm12 = vcmask 521476   ;;  %vm981_vm13 = vcmask 523526  }
 0x123   :  { %vm1426_vm14 = vcmask 519426   ;;  %vm1647_vm15 = vcmask 517376   ;;  %vm4302_vm0 = vcmask 523264  }
 0x125   :  { %v242_v2 = vld [vmem:[%s10000_s20] sm:$0xff]  ;;  %v243_v3 = vld [vmem:[%s10000_s20 + $0x8] sm:$0xff]  ;;  %v244_v4 = vld [vmem:[%s10000_s20 + $0x10] sm:$0xff] }
 0x126   :  { %6818 = vmatprep.mubr.msk.f32.mxu1 %vm247_vm1, %v242_v2  ;;  %v245_v5 = vld [vmem:[%s10000_s20 + $0x18] sm:$0xff]  ;;  %v437_v6 = vld [vmem:[%s10001_s14] sm:$0xff]  ;;  %v438_v7 = vld [vmem:[%s10001_s14 + $0x8] sm:$0xff] }
 0x127   :  { %6819 = vmatmul.mubr.msk.f32.vlgmr.msra.gmra.mrb[0].mxu1 %vm247_vm1, %v243_v3  ;;  %v7453_v8 = vpack.c.bf16 %v438_v7, %v437_v6  ;;  %v439_v9 = vld [vmem:[%s10001_s14 + $0x10] sm:$0xff]  ;;  %v440_v10 = vld [vmem:[%s10001_s14 + $0x18] sm:$0xff]  ;;  %v441_v15 = vld [vmem:[%s10001_s14 + $0x20] sm:$0xff]  ;;  %v8561_v6 = vmov 0.0|0.0  }
 0x128   :  { %6821 = vmatprep.mubr.msk.f32.mxu1 %vm247_vm1, %v244_v4  ;;  %v7457_v11 = vpack.c.bf16 %v440_v10, %v439_v9  ;;  %v442_v16 = vld [vmem:[%s10001_s14 + $0x28] sm:$0xff] }
 0x129   :  { %7454 = vmatprep.subr.bf16.mxu1 %v7453_v8  ;;  %v7461_v19 = vpack.c.bf16 %v442_v16, %v441_v15  ;;  %v568_v2 = vld [vmem:[%s9969_s7 + $0x8] sm:$0xff]  ;;  %s8564_s7 = smov 64  }
 0x12a   :  { %7456 = vmatpush3.bf16.msra.mxu1 %v7453_v8  ;;  %v767_v3 = vld [vmem:[#allocation12] sm:$0xff]  ;;  %v7465_v4 = vpack.c.bf16 %v568_v2, %v567_v1  ;;  %v769_v8 = vld [vmem:[#allocation12 + $0x10] sm:$0xff]  ;;  %v770_v9 = vld [vmem:[#allocation12 + $0x18] sm:$0xff] }
 0x12b   :  { %6822 = vmatmul.mubr.msk.f32.gmra.mrb[2].mxu1 %vm247_vm1, %v245_v5  ;;  %7458 = vmatprep.subr.bf16.mxu1 %v7457_v11  ;;  %v768_v5 = vld [vmem:[#allocation12 + $0x8] sm:$0xff]  ;;  %v8926_v10 = vpack.c.bf16 %v770_v9, %v769_v8  ;;  %v6401_v15 = vld [vmem:[#allocation9] ss:$0 sm:$0xff]  ;;  %vm6376_vm1 = vcmask 1024  }
 0x12c   :  { %v8922_v7 = vpack.c.bf16 %v768_v5, %v767_v3  ;;  %7466 = vmatprep.subr.bf16.mxu0 %v7465_v4 }
 0x12d   :  { %7468 = vmatpush3.bf16.msra.mxu0 %v7465_v4 }
 0x12e   :  { %7460 = vmatpush3.bf16.msra.mxu1 %v7457_v11  ;;  %v673_v11 = vld [vmem:[#allocation15] sm:$0xff] }
 0x12f   :  { %7462 = vmatprep.subr.bf16.mxu1 %v7461_v19 }
 0x132   :  { %7464 = vmatpush3.bf16.msra.mxu1 %v7461_v19 }
 0x133   :  { %7473 = vmatprep.subr.bf16.mxu1 %v8561_v6 }
 0x1fa   :  { %v6820_v13 = vpop.f32.mrb[0].mxu1 }
 0x1fb   :  { %v357_v17 = vmul.f32 %v6820_v13, %v6395_v12  ;;  %v330_v18 = vpop.f32.mrb[1].mxu1 }
 0x1fc   :  { %v356_v20 = vmul.f32 %v6395_v12, %v330_v18 }
 0x1fd   :  { %v368_v21 = vadd.f32 %v6396_v14, %v357_v17  ;;  %v6402_v17 = vld [vmem:[#allocation11] ss:$0 sm:$0xff] }
 0x1fe   :  { %v367_v22 = vadd.f32 %v6396_v14, %v356_v20  ;;  %v6823_v23 = vpop.f32.mrb[2].mxu1 }
 0x1ff   :  { %v372_v24 = vmax.f32 %v368_v21, 0.0  ;;  %v359_v25 = vmul.f32 %v6823_v23, %v6395_v12  ;;  %v340_v26 = vpop.f32.mrb[3].mxu1 }
 0x200   :  { %v371_v27 = vmax.f32 %v367_v22, 0.0  ;;  %v358_v28 = vmul.f32 %v6395_v12, %v340_v26  ;;  %v674_v12 = vld [vmem:[#allocation15 + $0x8] sm:$0xff] }
 0x201   :  { %v381_v29 = vrot.slane %v372_v24, 6  ;;  %v370_v30 = vadd.f32 %v6396_v14, %v359_v25  ;;  %404 = vrot.lane.b32.xlu0 %v372_v24, %s8559_s22  ;;  %v394_v31 = vrot.slane %v372_v24, 2  ;;  %v7469_v13 = vpack.c.bf16 %v674_v12, %v673_v11 }
 0x202   :  { %v380_v32 = vrot.slane %v371_v27, 6  ;;  %v369_v33 = vadd.f32 %v6396_v14, %v358_v28  ;;  %v393_v34 = vrot.slane %v371_v27, 2  ;;  %v8563_v14 = vmov 0.0  }
 0x203   :  { %v374_v35 = vmax.f32 %v370_v30, 0.0  ;;  %7470 = vmatprep.subr.bf16.mxu0 %v7469_v13 }
 0x204   :  { %v373_v36 = vmax.f32 %v369_v33, 0.0  ;;  %v395_v37 = vsel %vm392_vm2, %v393_v34, %v394_v31  ;;  %v382_v38 = vsel %vm379_vm3, %v380_v32, %v381_v29  ;;  %v391_v50 = vsel %vm379_vm3, 0.0, %v380_v32  ;;  %v771_v33 = vld [vmem:[#allocation17] sm:$0xff]  ;;  %v772_v34 = vld [vmem:[#allocation17 + $0x8] sm:$0xff] }
 0x205   :  { %v385_v39 = vrot.slane %v374_v35, 6  ;;  %402 = vrot.lane.b32.xlu0 %v371_v27, %s8559_s22  ;;  %415 = vrot.lane.b32.xlu1 %v395_v37, %s8560_s17  ;;  %v398_v40 = vrot.slane %v374_v35, 2  ;;  %v774_v37 = vld [vmem:[#allocation17 + $0x18] sm:$0xff] }
 0x206   :  { %v383_v41 = vrot.slane %v373_v36, 6  ;;  %v396_v42 = vrot.slane %v373_v36, 2 }
 0x207   :  { %v401_v47 = vsel %vm392_vm2, %v398_v40, 0.0 }
 0x208   :  { %v399_v43 = vsel %vm392_vm2, %v396_v42, %v398_v40  ;;  %v397_v44 = vsel %vm392_vm2, %v394_v31, %v396_v42  ;;  %v386_v45 = vsel %vm379_vm3, %v383_v41, %v385_v39  ;;  %v384_v46 = vsel %vm379_vm3, %v381_v29, %v383_v41  ;;  %v6403_v41 = vld [vmem:[#allocation14] ss:$0 sm:$0xff] }
 0x209   :  { %408 = vrot.lane.b32.xlu1 %v374_v35, %s8559_s22  ;;  %406 = vrot.lane.b32.xlu0 %v373_v36, %s8559_s22  ;;  %v8945_v35 = vpack.c.bf16 %v772_v34, %v771_v33  ;;  %v773_v36 = vld [vmem:[#allocation17 + $0x10] sm:$0xff] }
 0x20d   :  { %419 = vrot.lane.b32.xlu0 %v399_v43, %s8560_s17  ;;  %417 = vrot.lane.b32.xlu1 %v397_v44, %s8560_s17 }
 0x211   :  { %421 = vrot.lane.b32.xlu1 %v401_v47, %s8560_s17 }
 0x273   :  { %v405_v48 = vpop.permute.xlu0 %404 }
 0x274   :  { %v429_v56 = vsel %vm427_vm5, %v382_v38, %v405_v48  ;;  %v8950_v38 = vpack.c.bf16 %v774_v37, %v773_v36 }
 0x277   :  { %v403_v49 = vpop.permute.xlu0 %402  ;;  %v416_v51 = vpop.permute.xlu1 %415 }
 0x278   :  { %v428_v52 = vsel %vm427_vm5, %v391_v50, %v403_v49  ;;  %v6408_v49 = vld [vmem:[#allocation18] ss:$0 sm:$0xff] }
 0x279   :  { %v433_v53 = vsel %vm432_vm4, %v428_v52, %v416_v51 }
 0x27a   :  { %6836 = vmatprep.mubr.msk.f32.mxu1 %vm443_vm6, %v433_v53 }
 0x27b   :  { %v409_v54 = vpop.permute.xlu1 %408  ;;  %v407_v55 = vpop.permute.xlu0 %406 }
 0x27c   :  { %v430_v57 = vsel %vm427_vm5, %v384_v46, %v407_v55  ;;  %v431_v62 = vsel %vm427_vm5, %v386_v45, %v409_v54 }
 0x27f   :  { %v420_v58 = vpop.permute.xlu0 %419  ;;  %v418_v59 = vpop.permute.xlu1 %417 }
 0x280   :  { %v435_v60 = vsel %vm432_vm4, %v430_v57, %v420_v58  ;;  %v434_v61 = vsel %vm432_vm4, %v429_v56, %v418_v59 }
 0x281   :  { %6837 = vmatmul.mubr.msk.f32.vlgmr.msra.gmra.mrb[4].mxu1 %vm443_vm6, %v434_v61 }
 0x282   :  { %6839 = vmatprep.mubr.msk.f32.mxu1 %vm443_vm6, %v435_v60  ;;  %7475 = vmatpush3.bf16.msra.mxu1 %v8922_v7 }
 0x283   :  { %v422_v63 = vpop.permute.xlu1 %421  ;;  %7476 = vmatprep.subr.bf16.mxu1 %v8561_v6 }
 0x284   :  { %v436_v0 = vsel %vm432_vm4, %v431_v62, %v422_v63 }
 0x285   :  { %6840 = vmatmul.mubr.msk.f32.gmra.mrb[6].mxu1 %vm443_vm6, %v436_v0 }
 0x286   :  { %7478 = vmatpush3.bf16.msra.mxu1 %v8926_v10  ;;  %6870 = vmatprep.mubr.msk.f32.mxu1 %vm8562_vm7, %v8563_v14 }
 0x287   :  { %7485 = vmatprep.subr.bf16.mxu1 %v8561_v6 }
 0x289   :  { %6871 = vmatmul.mubr.f32.vlgmr.msra.gmra.mrb[8].mxu1 %v8563_v14 }
 0x28a   :  { %7487 = vmatpush3.bf16.msra.mxu1 %v8922_v7  ;;  %6892 = vmatprep.mubr.msk.f32.mxu1 %vm8562_vm7, %v8563_v14 }
 0x28b   :  { %7488 = vmatprep.subr.bf16.mxu1 %v8561_v6 }
 0x28e   :  { %7490 = vmatpush3.bf16.msra.mxu1 %v8926_v10 }
 0x28f   :  { %7497 = vmatprep.subr.bf16.mxu1 %v8561_v6 }
 0x354   :  { %v6838_v16 = vpop.f32.mrb[4].mxu1 }
 0x355   :  { %v549_v18 = vmul.f32 %v6838_v16, %v6401_v15  ;;  %v522_v19 = vpop.f32.mrb[5].mxu1 }
 0x356   :  { %v548_v20 = vmul.f32 %v6401_v15, %v522_v19 }
 0x357   :  { %v560_v21 = vadd.f32 %v6402_v17, %v549_v18 }
 0x358   :  { %v6841_v22 = vpop.f32.mrb[6].mxu1  ;;  %v559_v23 = vadd.f32 %v6402_v17, %v548_v20 }
 0x359   :  { %v551_v24 = vmul.f32 %v6841_v22, %v6401_v15  ;;  %v532_v25 = vpop.f32.mrb[7].mxu1  ;;  %v564_v28 = vmax.f32 %v560_v21, 0.0 }
 0x35a   :  { %v550_v26 = vmul.f32 %v6401_v15, %v532_v25  ;;  %v563_v27 = vmax.f32 %v559_v23, 0.0 }
 0x35b   :  { %v562_v29 = vadd.f32 %v6402_v17, %v551_v24 }
 0x35c   :  { %v561_v30 = vadd.f32 %v6402_v17, %v550_v26  ;;  %6846 = vmatprep.mubr.msk.f32.mxu0 %vm427_vm5, %v563_v27  ;;  %v844_v39 = vpop.f32.mrb[8].mxu1 }
 0x35d   :  { %6847 = vmatmul.mubr.msk.f32.vlgmr.msra.gmra.mrb[0].mxu0 %vm427_vm5, %v564_v28  ;;  %v566_v32 = vmax.f32 %v562_v29, 0.0  ;;  %v6872_v40 = vpop.f32.mrb[9].mxu1 }
 0x35e   :  { %v565_v31 = vmax.f32 %v561_v30, 0.0  ;;  %7472 = vmatpush3.bf16.msra.mxu0 %v7469_v13 }
 0x35f   :  { %7479 = vmatprep.subr.bf16.mxu0 %v8561_v6 }
 0x360   :  { %6849 = vmatprep.mubr.msk.f32.mxu0 %vm427_vm5, %v565_v31 }
 0x361   :  { %6850 = vmatmul.mubr.msk.f32.gmra.mrb[2].mxu0 %vm427_vm5, %v566_v32 }
 0x362   :  { %6856 = vmatprep.mubr.msk.f32.mxu0 %vm427_vm5, %v563_v27 }
 0x365   :  { %6857 = vmatmul.mubr.msk.f32.vlgmr.msra.gmra.mrb[4].mxu0 %vm427_vm5, %v564_v28 }
 0x366   :  { %7481 = vmatpush3.bf16.msra.mxu0 %v8945_v35  ;;  %6859 = vmatprep.mubr.msk.f32.mxu0 %vm427_vm5, %v565_v31 }
 0x367   :  { %7482 = vmatprep.subr.bf16.mxu0 %v8561_v6 }
 0x369   :  { %6860 = vmatmul.mubr.msk.f32.gmra.mrb[6].mxu0 %vm427_vm5, %v566_v32 }
 0x36a   :  { %7484 = vmatpush3.bf16.msra.mxu0 %v8950_v38  ;;  %6881 = vmatprep.mubr.msk.f32.mxu0 %vm8562_vm7, %v8563_v14 }
 0x36b   :  { %7491 = vmatprep.subr.bf16.mxu0 %v8561_v6 }
 0x36d   :  { %6882 = vmatmul.mubr.f32.vlgmr.msra.gmra.mrb[8].mxu0 %v8563_v14 }
 0x36e   :  { %7493 = vmatpush3.bf16.msra.mxu0 %v8945_v35  ;;  %6903 = vmatprep.mubr.msk.f32.mxu0 %vm8562_vm7, %v8563_v14 }
 0x36f   :  { %7494 = vmatprep.subr.bf16.mxu0 %v8561_v6 }
 0x372   :  { %7496 = vmatpush3.bf16.msra.mxu0 %v8950_v38 }
 0x373   :  { %7503 = vmatprep.subr.bf16.mxu0 %v8561_v6 }
 0x430   :  { %v6848_v42 = vpop.f32.mrb[0].mxu0 }
 0x431   :  { %v8965_v43 = vadd.f32 %v6848_v42, %v6403_v41  ;;  %v654_v44 = vpop.f32.mrb[1].mxu0 }
 0x432   :  { %v8982_v5 = vadd.f32 %v6403_v41, %v654_v44 }
 0x434   :  { %v6851_v45 = vpop.f32.mrb[2].mxu0  ;;  %v848_v12 = vadd.f32 %v844_v39, %v8982_v5 }
 0x435   :  { %v8967_v46 = vadd.f32 %v6851_v45, %v6403_v41  ;;  %v664_v47 = vpop.f32.mrb[3].mxu0 }
 0x436   :  { %v8969_v48 = vadd.f32 %v6403_v41, %v664_v47  ;;  %v6413_v16 = vmul.f32 -1.442695, %v848_v12 }
 0x438   :  { %v6858_v50 = vpop.f32.mrb[4].mxu0 }
 0x439   :  { %v8971_v51 = vadd.f32 %v6858_v50, %v6408_v49  ;;  %v748_v52 = vpop.f32.mrb[5].mxu0 }
 0x43a   :  { %v8973_v53 = vadd.f32 %v6408_v49, %v748_v52 }
 0x43c   :  { %v6861_v54 = vpop.f32.mrb[6].mxu0 }
 0x43d   :  { %v758_v55 = vpop.f32.mrb[7].mxu0  ;;  %v8977_v58 = vadd.f32 %v6861_v54, %v6408_v49 }
 0x43e   :  { %v8975_v56 = vadd.f32 %v6408_v49, %v758_v55 }
 0x440   :  { %v915_v57 = vpop.f32.mrb[8].mxu0 }
 0x441   :  { %v920_v59 = vrot.slane %v915_v57, 2  ;;  %v6883_v60 = vpop.f32.mrb[9].mxu0 }
 0x443   :  { %v922_v61 = vadd.f32 %v920_v59, %v8977_v58 }
 0x445   :  { %7823 = vtanh.f32 %v922_v61  ;;  %v6414_v63 = vmul.f32 -1.442695, %v922_v61 }
 0x447   :  { %7825 = vpow2.f32 %v6414_v63 }
 0x44f   :  { %v7824_v62 = vpop.eup %7823 }
 0x450   :  { %956 = vrot.lane.b32.xlu0 %v7824_v62, %s8564_s7 }
 0x451   :  { %v7826_v0 = vpop.eup %7825 }
 0x452   :  { %v950_v1 = vadd.f32 1.0, %v7826_v0 }
 0x454   :  { %7827 = vrcp.f32 %v950_v1 }
 0x45e   :  { %v7828_v2 = vpop.eup %7827 }
 0x45f   :  { %v954_v8 = vmul.f32 0.0, %v7828_v2 }
 0x4c2   :  { %v957_v3 = vpop.permute.xlu0 %956 }
 0x4c3   :  { %v959_v4 = vmul.f32 %v7828_v2, %v957_v3 }
 0x4c5   :  { %961 = vrot.lane.b32.xlu1 %v959_v4, %s8560_s17 }
 0x537   :  { %v962_v9 = vpop.permute.xlu1 %961 }
 0x538   :  { %v8984_v11 = vadd.f32 %v962_v9, %v954_v8 }
 0x53a   :  { %7829 = vtanh.f32 %v8984_v11  ;;  %v1173_v49 = vrot.slane %v8984_v11, 2 }
 0x53b   :  { %7831 = vtanh.f32 %v848_v12 }
 0x53c   :  { %7833 = vpow2.f32 %v6413_v16 }
 0x544   :  { %v7830_v13 = vpop.eup %7829 }
 0x545   :  { %967 = vrot.lane.b32.xlu0 %v7830_v13, %s8564_s7  ;;  %v7832_v15 = vpop.eup %7831 }
 0x546   :  { %v7834_v17 = vpop.eup %7833 }
 0x547   :  { %v926_v18 = vadd.f32 1.0, %v7834_v17 }
 0x549   :  { %932 = vrot.lane.b32.xlu0 %v7832_v15, %s8564_s7  ;;  %7835 = vrcp.f32 %v926_v18 }
 0x553   :  { %v7836_v22 = vpop.eup %7835 }
 0x554   :  { %v930_v26 = vmul.f32 0.0, %v7836_v22 }
 0x5b7   :  { %v968_v19 = vpop.permute.xlu0 %967 }
 0x5b8   :  { %v8990_v20 = vmul.f32 %v7828_v2, %v968_v19 }
 0x5ba   :  { %v1059_v21 = vrot.slane %v8990_v20, 6 }
 0x5bb   :  { %v933_v23 = vpop.permute.xlu0 %932 }
 0x5bc   :  { %v935_v24 = vmul.f32 %v7836_v22, %v933_v23  ;;  %1060 = vrot.lane.b32.xlu1 %v1059_v21, %s8560_s17 }
 0x5be   :  { %937 = vrot.lane.b32.xlu0 %v935_v24, %s8560_s17 }
 0x62e   :  { %v1061_v25 = vpop.permute.xlu1 %1060 }
 0x62f   :  { %6904 = vmatmul.mubr.msk.f32.vlgmr.msra.gmra.mrb[10].mxu0 %vm432_vm4, %v1061_v25 }
 0x630   :  { %v938_v27 = vpop.permute.xlu0 %937  ;;  %7505 = vmatpush3.bf16.msra.mxu0 %v8945_v35  ;;  %6925 = vmatprep.mubr.msk.f32.mxu0 %vm8562_vm7, %v8563_v14 }
 0x631   :  { %v8999_v28 = vadd.f32 %v938_v27, %v930_v26  ;;  %7506 = vmatprep.subr.bf16.mxu0 %v8561_v6 }
 0x633   :  { %7837 = vtanh.f32 %v8999_v28  ;;  %v1146_v12 = vrot.slane %v8999_v28, 6 }
 0x634   :  { %7508 = vmatpush3.bf16.msra.mxu0 %v8950_v38 }
 0x635   :  { %7515 = vmatprep.subr.bf16.mxu0 %v8561_v6 }
 0x63d   :  { %v7838_v29 = vpop.eup %7837 }
 0x63e   :  { %943 = vrot.lane.b32.xlu0 %v7838_v29, %s8564_s7 }
 0x6b0   :  { %v944_v30 = vpop.permute.xlu0 %943 }
 0x6b1   :  { %v946_v31 = vmul.f32 %v7836_v22, %v944_v30 }
 0x6b3   :  { %972 = vrot.lane.b32.xlu0 %v946_v31, %s8560_s17 }
 0x702   :  { %v1130_v32 = vpop.f32.mrb[10].mxu0 }
 0x703   :  { %v1135_v33 = vrot.slane %v1130_v32, 4  ;;  %v6905_v34 = vpop.f32.mrb[11].mxu0 }
 0x705   :  { %v1137_v36 = vadd.f32 %v1135_v33, %v8977_v58 }
 0x707   :  { %7839 = vtanh.f32 %v1137_v36  ;;  %v6418_v40 = vmul.f32 -1.442695, %v1137_v36 }
 0x709   :  { %7841 = vpow2.f32 %v6418_v40 }
 0x711   :  { %v7840_v37 = vpop.eup %7839 }
 0x712   :  { %1177 = vrot.lane.b32.xlu1 %v7840_v37, %s8564_s7 }
 0x713   :  { %v7842_v41 = vpop.eup %7841 }
 0x714   :  { %v1168_v42 = vadd.f32 1.0, %v7842_v41 }
 0x716   :  { %7843 = vrcp.f32 %v1168_v42 }
 0x720   :  { %v7844_v44 = vpop.eup %7843 }
 0x721   :  { %v1175_v50 = vmul.f32 %v7844_v44, %v1173_v49 }
 0x725   :  { %v973_v39 = vpop.permute.xlu0 %972 }
 0x726   :  { %976 = vst.msk [vmem:[#allocation2] sm:$0x3] %vm975_vm8, %v973_v39  ;;  %6893 = vmatmul.mubr.msk.f32.vlgmr.msra.gmra.mrb[10].mxu1 %vm432_vm4, %v973_v39 }
 0x727   :  { %7499 = vmatpush3.bf16.msra.mxu1 %v8922_v7  ;;  %6914 = vmatprep.mubr.msk.f32.mxu1 %vm8562_vm7, %v8563_v14 }
 0x728   :  { %7500 = vmatprep.subr.bf16.mxu1 %v8561_v6 }
 0x72b   :  { %7502 = vmatpush3.bf16.msra.mxu1 %v8926_v10 }
 0x72c   :  { %7509 = vmatprep.subr.bf16.mxu1 %v8561_v6 }
 0x784   :  { %v1178_v45 = vpop.permute.xlu1 %1177 }
 0x785   :  { %v1180_v47 = vmul.f32 %v7844_v44, %v1178_v45 }
 0x787   :  { %1182 = vrot.lane.b32.xlu1 %v1180_v47, %s8560_s17 }
 0x7f9   :  { %v1051_v52 = vpop.f32.mrb[10].mxu1  ;;  %v1183_v54 = vpop.permute.xlu1 %1182 }
 0x7fa   :  { %v1056_v55 = vrot.slane %v1051_v52, 6  ;;  %v9019_v57 = vadd.f32 %v1183_v54, %v1175_v50  ;;  %v6894_v59 = vpop.f32.mrb[11].mxu1 }
 0x7fc   :  { %v1058_v60 = vadd.f32 %v1056_v55, %v8982_v5  ;;  %7845 = vtanh.f32 %v9019_v57  ;;  %v1397_v36 = vrot.slane %v9019_v57, 2 }
 0x7fe   :  { %7847 = vtanh.f32 %v1058_v60  ;;  %v6417_v63 = vmul.f32 -1.442695, %v1058_v60 }
 0x800   :  { %7849 = vpow2.f32 %v6417_v63 }
 0x806   :  { %v7846_v61 = vpop.eup %7845 }
 0x807   :  { %1188 = vrot.lane.b32.xlu1 %v7846_v61, %s8564_s7 }
 0x808   :  { %v7848_v62 = vpop.eup %7847 }
 0x809   :  { %1150 = vrot.lane.b32.xlu0 %v7848_v62, %s8564_s7 }
 0x80a   :  { %v7850_v0 = vpop.eup %7849 }
 0x80b   :  { %v1141_v1 = vadd.f32 1.0, %v7850_v0 }
 0x80d   :  { %7851 = vrcp.f32 %v1141_v1 }
 0x817   :  { %v7852_v4 = vpop.eup %7851 }
 0x818   :  { %v1148_v13 = vmul.f32 %v7852_v4, %v1146_v12 }
 0x879   :  { %v1189_v2 = vpop.permute.xlu1 %1188 }
 0x87a   :  { %v9025_v3 = vmul.f32 %v7844_v44, %v1189_v2 }
 0x87b   :  { %v1151_v8 = vpop.permute.xlu0 %1150 }
 0x87c   :  { %v1283_v9 = vrot.slane %v9025_v3, 4  ;;  %v1153_v11 = vmul.f32 %v7852_v4, %v1151_v8 }
 0x87e   :  { %1155 = vrot.lane.b32.xlu0 %v1153_v11, %s8560_s17  ;;  %1284 = vrot.lane.b32.xlu1 %v1283_v9, %s8560_s17 }
 0x8f0   :  { %v1156_v15 = vpop.permute.xlu0 %1155  ;;  %v1285_v16 = vpop.permute.xlu1 %1284 }
 0x8f1   :  { %v9031_v17 = vadd.f32 %v1156_v15, %v1148_v13  ;;  %6926 = vmatmul.mubr.msk.f32.vlgmr.msra.gmra.mrb[12].mxu0 %vm432_vm4, %v1285_v16 }
 0x8f2   :  { %7517 = vmatpush3.bf16.msra.mxu0 %v8945_v35  ;;  %6947 = vmatprep.mubr.msk.f32.mxu0 %vm8562_vm7, %v8563_v14 }
 0x8f3   :  { %7853 = vtanh.f32 %v9031_v17  ;;  %7518 = vmatprep.subr.bf16.mxu0 %v8561_v6  ;;  %v1370_v63 = vrot.slane %v9031_v17, 6 }
 0x8f6   :  { %7520 = vmatpush3.bf16.msra.mxu0 %v8950_v38 }
 0x8f7   :  { %7527 = vmatprep.subr.bf16.mxu0 %v8561_v6 }
 0x8fd   :  { %v7854_v18 = vpop.eup %7853 }
 0x8fe   :  { %1161 = vrot.lane.b32.xlu0 %v7854_v18, %s8564_s7 }
 0x970   :  { %v1162_v19 = vpop.permute.xlu0 %1161 }
 0x971   :  { %v9042_v21 = vmul.f32 %v7852_v4, %v1162_v19 }
 0x973   :  { %v1204_v22 = vrot.slane %v9042_v21, 2 }
 0x975   :  { %1205 = vrot.lane.b32.xlu0 %v1204_v22, %s8560_s17 }
 0x9c4   :  { %v1354_v23 = vpop.f32.mrb[12].mxu0 }
 0x9c5   :  { %v1359_v24 = vrot.slane %v1354_v23, 6  ;;  %v6927_v25 = vpop.f32.mrb[13].mxu0 }
 0x9c7   :  { %v1361_v26 = vadd.f32 %v1359_v24, %v8977_v58 }
 0x9c9   :  { %7855 = vtanh.f32 %v1361_v26  ;;  %v6422_v29 = vmul.f32 -1.442695, %v1361_v26 }
 0x9cb   :  { %7857 = vpow2.f32 %v6422_v29 }
 0x9d3   :  { %v7856_v27 = vpop.eup %7855 }
 0x9d4   :  { %1401 = vrot.lane.b32.xlu1 %v7856_v27, %s8564_s7 }
 0x9d5   :  { %v7858_v30 = vpop.eup %7857 }
 0x9d6   :  { %v1392_v31 = vadd.f32 1.0, %v7858_v30 }
 0x9d8   :  { %7859 = vrcp.f32 %v1392_v31 }
 0x9e2   :  { %v7860_v32 = vpop.eup %7859 }
 0x9e3   :  { %v1399_v37 = vmul.f32 %v7860_v32, %v1397_v36 }
 0x9e7   :  { %v1206_v28 = vpop.permute.xlu0 %1205 }
 0x9e8   :  { %6915 = vmatmul.mubr.msk.f32.vlgmr.msra.gmra.mrb[12].mxu1 %vm432_vm4, %v1206_v28 }
 0x9e9   :  { %7511 = vmatpush3.bf16.msra.mxu1 %v8922_v7  ;;  %6936 = vmatprep.mubr.msk.f32.mxu1 %vm8562_vm7, %v8563_v14 }
 0x9ea   :  { %7512 = vmatprep.subr.bf16.mxu1 %v8561_v6 }
 0x9ed   :  { %7514 = vmatpush3.bf16.msra.mxu1 %v8926_v10 }
 0x9ee   :  { %7521 = vmatprep.subr.bf16.mxu1 %v8561_v6 }
 0xa46   :  { %v1402_v33 = vpop.permute.xlu1 %1401 }
 0xa47   :  { %v1404_v34 = vmul.f32 %v7860_v32, %v1402_v33 }
 0xa49   :  { %1406 = vrot.lane.b32.xlu1 %v1404_v34, %s8560_s17 }
 0xabb   :  { %v1275_v39 = vpop.f32.mrb[12].mxu1  ;;  %v1407_v40 = vpop.permute.xlu1 %1406 }
 0xabc   :  { %v1280_v41 = vrot.slane %v1275_v39, 4  ;;  %v9057_v42 = vadd.f32 %v1407_v40, %v1399_v37  ;;  %v6916_v44 = vpop.f32.mrb[13].mxu1 }
 0xabe   :  { %v1282_v45 = vadd.f32 %v1280_v41, %v8982_v5  ;;  %7861 = vtanh.f32 %v9057_v42  ;;  %v1618_v26 = vrot.slane %v9057_v42, 2 }
 0xac0   :  { %7863 = vtanh.f32 %v1282_v45  ;;  %v6421_v50 = vmul.f32 -1.442695, %v1282_v45 }
 0xac2   :  { %7865 = vpow2.f32 %v6421_v50 }
 0xac8   :  { %v7862_v47 = vpop.eup %7861 }
 0xac9   :  { %1412 = vrot.lane.b32.xlu1 %v7862_v47, %s8564_s7 }
 0xaca   :  { %v7864_v49 = vpop.eup %7863 }
 0xacb   :  { %1374 = vrot.lane.b32.xlu0 %v7864_v49, %s8564_s7 }
 0xacc   :  { %v7866_v52 = vpop.eup %7865 }
 0xacd   :  { %v1365_v54 = vadd.f32 1.0, %v7866_v52 }
 0xacf   :  { %7867 = vrcp.f32 %v1365_v54 }
 0xad9   :  { %v7868_v59 = vpop.eup %7867 }
 0xada   :  { %v1372_v0 = vmul.f32 %v7868_v59, %v1370_v63 }
 0xb3b   :  { %v1413_v55 = vpop.permute.xlu1 %1412 }
 0xb3c   :  { %v9063_v57 = vmul.f32 %v7860_v32, %v1413_v55 }
 0xb3d   :  { %v1375_v60 = vpop.permute.xlu0 %1374 }
 0xb3e   :  { %v1507_v61 = vrot.slane %v9063_v57, 2  ;;  %v1377_v62 = vmul.f32 %v7868_v59, %v1375_v60 }
 0xb40   :  { %1379 = vrot.lane.b32.xlu0 %v1377_v62, %s8560_s17  ;;  %1508 = vrot.lane.b32.xlu1 %v1507_v61, %s8560_s17 }
 0xbb2   :  { %v1380_v1 = vpop.permute.xlu0 %1379  ;;  %v1509_v2 = vpop.permute.xlu1 %1508 }
 0xbb3   :  { %v9069_v4 = vadd.f32 %v1380_v1, %v1372_v0  ;;  %6948 = vmatmul.mubr.msk.f32.vlgmr.msra.gmra.mrb[14].mxu0 %vm432_vm4, %v1509_v2 }
 0xbb4   :  { %7529 = vmatpush3.bf16.msra.mxu0 %v8945_v35  ;;  %6969 = vmatprep.mubr.msk.f32.mxu0 %vm8562_vm7, %v8563_v14 }
 0xbb5   :  { %7869 = vtanh.f32 %v9069_v4  ;;  %7530 = vmatprep.subr.bf16.mxu0 %v8561_v6  ;;  %v1591_v49 = vrot.slane %v9069_v4, 6 }
 0xbb8   :  { %7532 = vmatpush3.bf16.msra.mxu0 %v8950_v38 }
 0xbb9   :  { %7539 = vmatprep.subr.bf16.mxu0 %v8561_v6 }
 0xbbf   :  { %v7870_v8 = vpop.eup %7869 }
 0xbc0   :  { %1385 = vrot.lane.b32.xlu0 %v7870_v8, %s8564_s7 }
 0xc32   :  { %v1386_v9 = vpop.permute.xlu0 %1385 }
 0xc33   :  { %v9080_v11 = vmul.f32 %v7868_v59, %v1386_v9 }
 0xc35   :  { %v1428_v12 = vrot.slane %v9080_v11, 4 }
 0xc37   :  { %1429 = vrot.lane.b32.xlu0 %v1428_v12, %s8560_s17 }
 0xc86   :  { %v1578_v13 = vpop.f32.mrb[14].mxu0 }
 0xc87   :  { %v1582_v15 = vadd.f32 %v1578_v13, %v8977_v58  ;;  %v6949_v16 = vpop.f32.mrb[15].mxu0 }
 0xc89   :  { %7871 = vtanh.f32 %v1582_v15  ;;  %v6426_v58 = vmul.f32 -1.442695, %v1582_v15 }
 0xc8b   :  { %7873 = vpow2.f32 %v6426_v58 }
 0xc93   :  { %v7872_v17 = vpop.eup %7871 }
 0xc94   :  { %1622 = vrot.lane.b32.xlu1 %v7872_v17, %s8564_s7 }
 0xc95   :  { %v7874_v19 = vpop.eup %7873 }
 0xc96   :  { %v1613_v22 = vadd.f32 1.0, %v7874_v19 }
 0xc98   :  { %7875 = vrcp.f32 %v1613_v22 }
 0xca2   :  { %v7876_v23 = vpop.eup %7875 }
 0xca3   :  { %v1620_v27 = vmul.f32 %v7876_v23, %v1618_v26 }
 0xca9   :  { %v1430_v18 = vpop.permute.xlu0 %1429 }
 0xcaa   :  { %6937 = vmatmul.mubr.msk.f32.vlgmr.msra.gmra.mrb[14].mxu1 %vm432_vm4, %v1430_v18 }
 0xcab   :  { %7523 = vmatpush3.bf16.msra.mxu1 %v8922_v7  ;;  %6958 = vmatprep.mubr.msk.f32.mxu1 %vm8562_vm7, %v8563_v14 }
 0xcac   :  { %7524 = vmatprep.subr.bf16.mxu1 %v8561_v6 }
 0xcaf   :  { %7526 = vmatpush3.bf16.msra.mxu1 %v8926_v10 }
 0xcb0   :  { %7533 = vmatprep.subr.bf16.mxu1 %v8561_v6 }
 0xd06   :  { %v1623_v24 = vpop.permute.xlu1 %1622 }
 0xd07   :  { %v1625_v25 = vmul.f32 %v7876_v23, %v1623_v24 }
 0xd09   :  { %1627 = vrot.lane.b32.xlu1 %v1625_v25, %s8560_s17 }
 0xd7b   :  { %v1628_v28 = vpop.permute.xlu1 %1627 }
 0xd7c   :  { %v9095_v29 = vadd.f32 %v1628_v28, %v1620_v27 }
 0xd7d   :  { %v1499_v30 = vpop.f32.mrb[14].mxu1 }
 0xd7e   :  { %7877 = vtanh.f32 %v9095_v29  ;;  %v1504_v31 = vrot.slane %v1499_v30, 2  ;;  %v6938_v32 = vpop.f32.mrb[15].mxu1  ;;  %v1838_v17 = vrot.slane %v9095_v29, 2 }
 0xd80   :  { %v1506_v33 = vadd.f32 %v1504_v31, %v8982_v5 }
 0xd82   :  { %7879 = vtanh.f32 %v1506_v33  ;;  %v6425_v37 = vmul.f32 -1.442695, %v1506_v33 }
 0xd84   :  { %7881 = vpow2.f32 %v6425_v37 }
 0xd88   :  { %v7878_v34 = vpop.eup %7877 }
 0xd89   :  { %1633 = vrot.lane.b32.xlu1 %v7878_v34, %s8564_s7 }
 0xd8c   :  { %v7880_v36 = vpop.eup %7879 }
 0xd8d   :  { %1595 = vrot.lane.b32.xlu0 %v7880_v36, %s8564_s7 }
 0xd8e   :  { %v7882_v39 = vpop.eup %7881 }
 0xd8f   :  { %v1586_v40 = vadd.f32 1.0, %v7882_v39 }
 0xd91   :  { %7883 = vrcp.f32 %v1586_v40 }
 0xd9b   :  { %v7884_v44 = vpop.eup %7883 }
 0xd9c   :  { %v1593_v50 = vmul.f32 %v7884_v44, %v1591_v49 }
 0xdfb   :  { %v1634_v41 = vpop.permute.xlu1 %1633 }
 0xdfc   :  { %v9101_v42 = vmul.f32 %v7876_v23, %v1634_v41 }
 0xdfe   :  { %1725 = vrot.lane.b32.xlu1 %v9101_v42, %s8560_s17 }
 0xdff   :  { %v1596_v5 = vpop.permute.xlu0 %1595 }
 0xe00   :  { %v1598_v45 = vmul.f32 %v7884_v44, %v1596_v5 }
 0xe02   :  { %1600 = vrot.lane.b32.xlu0 %v1598_v45, %s8560_s17 }
 0xe70   :  { %v1726_v47 = vpop.permute.xlu1 %1725 }
 0xe71   :  { %6970 = vmatmul.mubr.msk.f32.vlgmr.msra.gmra.mrb[16].mxu0 %vm432_vm4, %v1726_v47 }
 0xe72   :  { %7541 = vmatpush3.bf16.msra.mxu0 %v8945_v35  ;;  %6991 = vmatprep.mubr.msk.f32.mxu0 %vm8562_vm7, %v8563_v14 }
 0xe73   :  { %7542 = vmatprep.subr.bf16.mxu0 %v8561_v6 }
 0xe74   :  { %v1601_v52 = vpop.permute.xlu0 %1600 }
 0xe75   :  { %v9112_v54 = vadd.f32 %v1601_v52, %v1593_v50 }
 0xe76   :  { %7544 = vmatpush3.bf16.msra.mxu0 %v8950_v38 }
 0xe77   :  { %7885 = vtanh.f32 %v9112_v54  ;;  %7551 = vmatprep.subr.bf16.mxu0 %v8561_v6  ;;  %v1811_v37 = vrot.slane %v9112_v54, 6 }
 0xe81   :  { %v7886_v55 = vpop.eup %7885 }
 0xe82   :  { %1606 = vrot.lane.b32.xlu0 %v7886_v55, %s8564_s7 }
 0xef4   :  { %v1607_v59 = vpop.permute.xlu0 %1606 }
 0xef5   :  { %v9118_v60 = vmul.f32 %v7884_v44, %v1607_v59 }
 0xef7   :  { %v1649_v61 = vrot.slane %v9118_v60, 6 }
 0xef9   :  { %1650 = vrot.lane.b32.xlu0 %v1649_v61, %s8560_s17 }
 0xf44   :  { %v1795_v62 = vpop.f32.mrb[16].mxu0 }
 0xf45   :  { %v1800_v63 = vrot.slane %v1795_v62, 2  ;;  %v6971_v0 = vpop.f32.mrb[17].mxu0 }
 0xf47   :  { %v1802_v1 = vadd.f32 %v1800_v63, %v8975_v56 }
 0xf49   :  { %7887 = vtanh.f32 %v1802_v1  ;;  %v6430_v8 = vmul.f32 -1.442695, %v1802_v1 }
 0xf4b   :  { %7889 = vpow2.f32 %v6430_v8 }
 0xf53   :  { %v7888_v2 = vpop.eup %7887 }
 0xf54   :  { %1842 = vrot.lane.b32.xlu1 %v7888_v2, %s8564_s7 }
 0xf55   :  { %v7890_v9 = vpop.eup %7889 }
 0xf56   :  { %v1833_v12 = vadd.f32 1.0, %v7890_v9 }
 0xf58   :  { %7891 = vrcp.f32 %v1833_v12 }
 0xf62   :  { %v7892_v13 = vpop.eup %7891 }
 0xf63   :  { %v1840_v18 = vmul.f32 %v7892_v13, %v1838_v17 }
 0xf6b   :  { %v1651_v4 = vpop.permute.xlu0 %1650 }
 0xf6c   :  { %6959 = vmatmul.mubr.msk.f32.vlgmr.msra.gmra.mrb[16].mxu1 %vm432_vm4, %v1651_v4 }
 0xf6d   :  { %7535 = vmatpush3.bf16.msra.mxu1 %v8922_v7  ;;  %6980 = vmatprep.mubr.msk.f32.mxu1 %vm8562_vm7, %v8563_v14 }
 0xf6e   :  { %7536 = vmatprep.subr.bf16.mxu1 %v8561_v6 }
 0xf71   :  { %7538 = vmatpush3.bf16.msra.mxu1 %v8926_v10 }
 0xf72   :  { %7545 = vmatprep.subr.bf16.mxu1 %v8561_v6 }
 0xfc6   :  { %v1843_v15 = vpop.permute.xlu1 %1842 }
 0xfc7   :  { %v1845_v16 = vmul.f32 %v7892_v13, %v1843_v15 }
 0xfc9   :  { %1847 = vrot.lane.b32.xlu1 %v1845_v16, %s8560_s17 }
0x103b   :  { %v1848_v58 = vpop.permute.xlu1 %1847 }
0x103c   :  { %v9133_v19 = vadd.f32 %v1848_v58, %v1840_v18 }
0x103e   :  { %7893 = vtanh.f32 %v9133_v19  ;;  %v2057_v4 = vrot.slane %v9133_v19, 2 }
0x103f   :  { %v1720_v22 = vpop.f32.mrb[16].mxu1 }
0x1040   :  { %v1724_v23 = vadd.f32 %v1720_v22, %v8965_v43  ;;  %v6960_v24 = vpop.f32.mrb[17].mxu1 }
0x1042   :  { %7895 = vtanh.f32 %v1724_v23  ;;  %v6429_v27 = vmul.f32 -1.442695, %v1724_v23 }
0x1044   :  { %7897 = vpow2.f32 %v6429_v27 }
0x1048   :  { %v7894_v25 = vpop.eup %7893 }
0x1049   :  { %1853 = vrot.lane.b32.xlu1 %v7894_v25, %s8564_s7 }
0x104c   :  { %v7896_v26 = vpop.eup %7895 }
0x104d   :  { %1815 = vrot.lane.b32.xlu0 %v7896_v26, %s8564_s7 }
0x104e   :  { %v7898_v28 = vpop.eup %7897 }
0x104f   :  { %v1806_v29 = vadd.f32 1.0, %v7898_v28 }
0x1051   :  { %7899 = vrcp.f32 %v1806_v29 }
0x105b   :  { %v7900_v33 = vpop.eup %7899 }
0x105c   :  { %v1813_v40 = vmul.f32 %v7900_v33, %v1811_v37 }
0x10bb   :  { %v1854_v30 = vpop.permute.xlu1 %1853 }
0x10bc   :  { %v9139_v31 = vmul.f32 %v7892_v13, %v1854_v30 }
0x10be   :  { %v1943_v32 = vrot.slane %v9139_v31, 6 }
0x10bf   :  { %v1816_v34 = vpop.permute.xlu0 %1815 }
0x10c0   :  { %v1818_v36 = vmul.f32 %v7900_v33, %v1816_v34  ;;  %1944 = vrot.lane.b32.xlu1 %v1943_v32, %s8560_s17 }
0x10c2   :  { %1820 = vrot.lane.b32.xlu0 %v1818_v36, %s8560_s17 }
0x1132   :  { %v1945_v39 = vpop.permute.xlu1 %1944 }
0x1133   :  { %6992 = vmatmul.mubr.msk.f32.vlgmr.msra.gmra.mrb[18].mxu0 %vm432_vm4, %v1945_v39 }
0x1134   :  { %v1821_v41 = vpop.permute.xlu0 %1820  ;;  %7553 = vmatpush3.bf16.msra.mxu0 %v8945_v35  ;;  %7013 = vmatprep.mubr.msk.f32.mxu0 %vm8562_vm7, %v8563_v14 }
0x1135   :  { %v9149_v44 = vadd.f32 %v1821_v41, %v1813_v40  ;;  %7554 = vmatprep.subr.bf16.mxu0 %v8561_v6 }
0x1137   :  { %7901 = vtanh.f32 %v9149_v44  ;;  %v2030_v30 = vrot.slane %v9149_v44, 6 }
0x1138   :  { %7556 = vmatpush3.bf16.msra.mxu0 %v8950_v38 }
0x1139   :  { %7563 = vmatprep.subr.bf16.mxu0 %v8561_v6 }
0x1141   :  { %v7902_v5 = vpop.eup %7901 }
0x1142   :  { %1826 = vrot.lane.b32.xlu0 %v7902_v5, %s8564_s7 }
0x11b4   :  { %v1827_v45 = vpop.permute.xlu0 %1826 }
0x11b5   :  { %v1829_v47 = vmul.f32 %v7900_v33, %v1827_v45 }
0x11b7   :  { %1858 = vrot.lane.b32.xlu0 %v1829_v47, %s8560_s17 }
0x1206   :  { %v2014_v49 = vpop.f32.mrb[18].mxu0 }
0x1207   :  { %v2019_v50 = vrot.slane %v2014_v49, 4  ;;  %v6993_v52 = vpop.f32.mrb[19].mxu0 }
0x1209   :  { %v2021_v54 = vadd.f32 %v2019_v50, %v8975_v56 }
0x120b   :  { %7903 = vtanh.f32 %v2021_v54  ;;  %v6434_v61 = vmul.f32 -1.442695, %v2021_v54 }
0x120d   :  { %7905 = vpow2.f32 %v6434_v61 }
0x1215   :  { %v7904_v55 = vpop.eup %7903 }
0x1216   :  { %2061 = vrot.lane.b32.xlu1 %v7904_v55, %s8564_s7 }
0x1217   :  { %v7906_v62 = vpop.eup %7905 }
0x1218   :  { %v2052_v63 = vadd.f32 1.0, %v7906_v62 }
0x121a   :  { %7907 = vrcp.f32 %v2052_v63 }
0x1224   :  { %v7908_v0 = vpop.eup %7907 }
0x1225   :  { %v2059_v8 = vmul.f32 %v7908_v0, %v2057_v4 }
0x1229   :  { %v1859_v59 = vpop.permute.xlu0 %1858 }
0x122a   :  { %1861 = vst.msk [vmem:[#allocation2 + $0x8] sm:$0x3] %vm975_vm8, %v1859_v59  ;;  %6981 = vmatmul.mubr.msk.f32.vlgmr.msra.gmra.mrb[18].mxu1 %vm432_vm4, %v1859_v59 }
0x122b   :  { %7547 = vmatpush3.bf16.msra.mxu1 %v8922_v7  ;;  %7002 = vmatprep.mubr.msk.f32.mxu1 %vm8562_vm7, %v8563_v14 }
0x122c   :  { %7548 = vmatprep.subr.bf16.mxu1 %v8561_v6 }
0x122f   :  { %7550 = vmatpush3.bf16.msra.mxu1 %v8926_v10 }
0x1230   :  { %7557 = vmatprep.subr.bf16.mxu1 %v8561_v6 }
0x1288   :  { %v2062_v1 = vpop.permute.xlu1 %2061 }
0x1289   :  { %v2064_v2 = vmul.f32 %v7908_v0, %v2062_v1 }
0x128b   :  { %2066 = vrot.lane.b32.xlu1 %v2064_v2, %s8560_s17 }
0x12fd   :  { %v1935_v9 = vpop.f32.mrb[18].mxu1  ;;  %v2067_v12 = vpop.permute.xlu1 %2066 }
0x12fe   :  { %v1940_v13 = vrot.slane %v1935_v9, 6  ;;  %v9169_v15 = vadd.f32 %v2067_v12, %v2059_v8  ;;  %v6982_v16 = vpop.f32.mrb[19].mxu1 }
0x1300   :  { %v1942_v17 = vadd.f32 %v1940_v13, %v8965_v43  ;;  %7909 = vtanh.f32 %v9169_v15  ;;  %v2279_v63 = vrot.slane %v9169_v15, 2 }
0x1302   :  { %7911 = vtanh.f32 %v1942_v17  ;;  %v6433_v22 = vmul.f32 -1.442695, %v1942_v17 }
0x1304   :  { %7913 = vpow2.f32 %v6433_v22 }
0x130a   :  { %v7910_v18 = vpop.eup %7909 }
0x130b   :  { %2072 = vrot.lane.b32.xlu1 %v7910_v18, %s8564_s7 }
0x130c   :  { %v7912_v58 = vpop.eup %7911 }
0x130d   :  { %2034 = vrot.lane.b32.xlu0 %v7912_v58, %s8564_s7 }
0x130e   :  { %v7914_v19 = vpop.eup %7913 }
0x130f   :  { %v2025_v23 = vadd.f32 1.0, %v7914_v19 }
0x1311   :  { %7915 = vrcp.f32 %v2025_v23 }
0x131b   :  { %v7916_v26 = vpop.eup %7915 }
0x131c   :  { %v2032_v32 = vmul.f32 %v7916_v26, %v2030_v30 }
0x137d   :  { %v2073_v24 = vpop.permute.xlu1 %2072 }
0x137e   :  { %v9175_v25 = vmul.f32 %v7908_v0, %v2073_v24 }
0x137f   :  { %v2035_v27 = vpop.permute.xlu0 %2034 }
0x1380   :  { %v2165_v28 = vrot.slane %v9175_v25, 4  ;;  %v2037_v29 = vmul.f32 %v7916_v26, %v2035_v27 }
0x1382   :  { %2039 = vrot.lane.b32.xlu0 %v2037_v29, %s8560_s17  ;;  %2166 = vrot.lane.b32.xlu1 %v2165_v28, %s8560_s17 }
0x13f4   :  { %v2040_v33 = vpop.permute.xlu0 %2039  ;;  %v2167_v34 = vpop.permute.xlu1 %2166 }
0x13f5   :  { %v9181_v36 = vadd.f32 %v2040_v33, %v2032_v32  ;;  %7014 = vmatmul.mubr.msk.f32.vlgmr.msra.gmra.mrb[20].mxu0 %vm432_vm4, %v2167_v34 }
0x13f6   :  { %7565 = vmatpush3.bf16.msra.mxu0 %v8945_v35  ;;  %7035 = vmatprep.mubr.msk.f32.mxu0 %vm8562_vm7, %v8563_v14 }
0x13f7   :  { %7917 = vtanh.f32 %v9181_v36  ;;  %7566 = vmatprep.subr.bf16.mxu0 %v8561_v6  ;;  %v2252_v27 = vrot.slane %v9181_v36, 6 }
0x13fa   :  { %7568 = vmatpush3.bf16.msra.mxu0 %v8950_v38 }
0x13fb   :  { %7575 = vmatprep.subr.bf16.mxu0 %v8561_v6 }
0x1401   :  { %v7918_v37 = vpop.eup %7917 }
0x1402   :  { %2045 = vrot.lane.b32.xlu0 %v7918_v37, %s8564_s7 }
0x1474   :  { %v2046_v39 = vpop.permute.xlu0 %2045 }
0x1475   :  { %v9192_v40 = vmul.f32 %v7916_v26, %v2046_v39 }
0x1477   :  { %v2086_v41 = vrot.slane %v9192_v40, 2 }
0x1479   :  { %2087 = vrot.lane.b32.xlu0 %v2086_v41, %s8560_s17 }
0x14c8   :  { %v2236_v44 = vpop.f32.mrb[20].mxu0 }
0x14c9   :  { %v2241_v5 = vrot.slane %v2236_v44, 6  ;;  %v7015_v45 = vpop.f32.mrb[21].mxu0 }
0x14cb   :  { %v2243_v47 = vadd.f32 %v2241_v5, %v8975_v56 }
0x14cd   :  { %7919 = vtanh.f32 %v2243_v47  ;;  %v6438_v52 = vmul.f32 -1.442695, %v2243_v47 }
0x14cf   :  { %7921 = vpow2.f32 %v6438_v52 }
0x14d7   :  { %v7920_v49 = vpop.eup %7919 }
0x14d8   :  { %2283 = vrot.lane.b32.xlu1 %v7920_v49, %s8564_s7 }
0x14d9   :  { %v7922_v54 = vpop.eup %7921 }
0x14da   :  { %v2274_v55 = vadd.f32 1.0, %v7922_v54 }
0x14dc   :  { %7923 = vrcp.f32 %v2274_v55 }
0x14e6   :  { %v7924_v59 = vpop.eup %7923 }
0x14e7   :  { %v2281_v0 = vmul.f32 %v7924_v59, %v2279_v63 }
0x14eb   :  { %v2088_v50 = vpop.permute.xlu0 %2087 }
0x14ec   :  { %7003 = vmatmul.mubr.msk.f32.vlgmr.msra.gmra.mrb[20].mxu1 %vm432_vm4, %v2088_v50 }
0x14ed   :  { %7559 = vmatpush3.bf16.msra.mxu1 %v8922_v7  ;;  %7024 = vmatprep.mubr.msk.f32.mxu1 %vm8562_vm7, %v8563_v14 }
0x14ee   :  { %7560 = vmatprep.subr.bf16.mxu1 %v8561_v6 }
0x14f1   :  { %7562 = vmatpush3.bf16.msra.mxu1 %v8926_v10 }
0x14f2   :  { %7569 = vmatprep.subr.bf16.mxu1 %v8561_v6 }
0x154a   :  { %v2284_v61 = vpop.permute.xlu1 %2283 }
0x154b   :  { %v2286_v62 = vmul.f32 %v7924_v59, %v2284_v61 }
0x154d   :  { %2288 = vrot.lane.b32.xlu1 %v2286_v62, %s8560_s17 }
0x15bf   :  { %v2157_v1 = vpop.f32.mrb[20].mxu1  ;;  %v2289_v2 = vpop.permute.xlu1 %2288 }
0x15c0   :  { %v2162_v4 = vrot.slane %v2157_v1, 4  ;;  %v9207_v8 = vadd.f32 %v2289_v2, %v2281_v0  ;;  %v7004_v9 = vpop.f32.mrb[21].mxu1 }
0x15c2   :  { %v2164_v12 = vadd.f32 %v2162_v4, %v8965_v43  ;;  %7925 = vtanh.f32 %v9207_v8  ;;  %v2498_v55 = vrot.slane %v9207_v8, 2 }
0x15c4   :  { %7927 = vtanh.f32 %v2164_v12  ;;  %v6437_v17 = vmul.f32 -1.442695, %v2164_v12 }
0x15c6   :  { %7929 = vpow2.f32 %v6437_v17 }
0x15cc   :  { %v7926_v13 = vpop.eup %7925 }
0x15cd   :  { %2294 = vrot.lane.b32.xlu1 %v7926_v13, %s8564_s7 }
0x15ce   :  { %v7928_v16 = vpop.eup %7927 }
0x15cf   :  { %2256 = vrot.lane.b32.xlu0 %v7928_v16, %s8564_s7 }
0x15d0   :  { %v7930_v15 = vpop.eup %7929 }
0x15d1   :  { %v2247_v18 = vadd.f32 1.0, %v7930_v15 }
0x15d3   :  { %7931 = vrcp.f32 %v2247_v18 }
0x15dd   :  { %v7932_v19 = vpop.eup %7931 }
0x15de   :  { %v2254_v28 = vmul.f32 %v7932_v19, %v2252_v27 }
0x163f   :  { %v2295_v58 = vpop.permute.xlu1 %2294 }
0x1640   :  { %v9213_v22 = vmul.f32 %v7924_v59, %v2295_v58 }
0x1641   :  { %v2257_v23 = vpop.permute.xlu0 %2256 }
0x1642   :  { %v2387_v24 = vrot.slane %v9213_v22, 2  ;;  %v2259_v26 = vmul.f32 %v7932_v19, %v2257_v23 }
0x1644   :  { %2261 = vrot.lane.b32.xlu0 %v2259_v26, %s8560_s17  ;;  %2388 = vrot.lane.b32.xlu1 %v2387_v24, %s8560_s17 }
0x16b6   :  { %v2262_v29 = vpop.permute.xlu0 %2261  ;;  %v2389_v30 = vpop.permute.xlu1 %2388 }
0x16b7   :  { %v9219_v32 = vadd.f32 %v2262_v29, %v2254_v28  ;;  %7036 = vmatmul.mubr.msk.f32.vlgmr.msra.gmra.mrb[22].mxu0 %vm432_vm4, %v2389_v30 }
0x16b8   :  { %7577 = vmatpush3.bf16.msra.mxu0 %v8945_v35  ;;  %7057 = vmatprep.mubr.msk.f32.mxu0 %vm8562_vm7, %v8563_v14 }
0x16b9   :  { %7933 = vtanh.f32 %v9219_v32  ;;  %7578 = vmatprep.subr.bf16.mxu0 %v8561_v6 }
0x16bc   :  { %7580 = vmatpush3.bf16.msra.mxu0 %v8950_v38 }
0x16bd   :  { %7587 = vmatprep.subr.bf16.mxu0 %v8561_v6 }
0x16c3   :  { %v7934_v33 = vpop.eup %7933 }
0x16c4   :  { %2267 = vrot.lane.b32.xlu0 %v7934_v33, %s8564_s7 }
0x1736   :  { %v2268_v34 = vpop.permute.xlu0 %2267 }
0x1737   :  { %v9230_v36 = vmul.f32 %v7932_v19, %v2268_v34  ;;  %v2471_v19 = vrot.slane %v9219_v32, 6 }
0x1739   :  { %v2308_v37 = vrot.slane %v9230_v36, 4 }
0x173b   :  { %2309 = vrot.lane.b32.xlu0 %v2308_v37, %s8560_s17 }
0x178a   :  { %v2458_v39 = vpop.f32.mrb[22].mxu0 }
0x178b   :  { %v2462_v41 = vadd.f32 %v2458_v39, %v8975_v56  ;;  %v7037_v44 = vpop.f32.mrb[23].mxu0 }
0x178d   :  { %7935 = vtanh.f32 %v2462_v41  ;;  %v6442_v56 = vmul.f32 -1.442695, %v2462_v41 }
0x178f   :  { %7937 = vpow2.f32 %v6442_v56 }
0x1797   :  { %v7936_v5 = vpop.eup %7935 }
0x1798   :  { %2502 = vrot.lane.b32.xlu1 %v7936_v5, %s8564_s7 }
0x1799   :  { %v7938_v47 = vpop.eup %7937 }
0x179a   :  { %v2493_v49 = vadd.f32 1.0, %v7938_v47 }
0x179c   :  { %7939 = vrcp.f32 %v2493_v49 }
0x17a6   :  { %v7940_v50 = vpop.eup %7939 }
0x17a7   :  { %v2500_v59 = vmul.f32 %v7940_v50, %v2498_v55 }
0x17ad   :  { %v2310_v45 = vpop.permute.xlu0 %2309 }
0x17ae   :  { %7025 = vmatmul.mubr.msk.f32.vlgmr.msra.gmra.mrb[22].mxu1 %vm432_vm4, %v2310_v45 }
0x17af   :  { %7571 = vmatpush3.bf16.msra.mxu1 %v8922_v7  ;;  %7046 = vmatprep.mubr.msk.f32.mxu1 %vm8562_vm7, %v8563_v14 }
0x17b0   :  { %7572 = vmatprep.subr.bf16.mxu1 %v8561_v6 }
0x17b3   :  { %7574 = vmatpush3.bf16.msra.mxu1 %v8926_v10 }
0x17b4   :  { %7581 = vmatprep.subr.bf16.mxu1 %v8561_v6 }
0x180a   :  { %v2503_v52 = vpop.permute.xlu1 %2502 }
0x180b   :  { %v2505_v54 = vmul.f32 %v7940_v50, %v2503_v52 }
0x180d   :  { %2507 = vrot.lane.b32.xlu1 %v2505_v54, %s8560_s17 }
0x187f   :  { %v2508_v61 = vpop.permute.xlu1 %2507 }
0x1880   :  { %v9245_v62 = vadd.f32 %v2508_v61, %v2500_v59 }
0x1881   :  { %v2379_v63 = vpop.f32.mrb[22].mxu1 }
0x1882   :  { %7941 = vtanh.f32 %v9245_v62  ;;  %v2384_v0 = vrot.slane %v2379_v63, 2  ;;  %v7026_v1 = vpop.f32.mrb[23].mxu1 }
0x1884   :  { %v2386_v2 = vadd.f32 %v2384_v0, %v8965_v43 }
0x1886   :  { %7943 = vtanh.f32 %v2386_v2  ;;  %v6441_v12 = vmul.f32 -1.442695, %v2386_v2 }
0x1888   :  { %7945 = vpow2.f32 %v6441_v12 }
0x188c   :  { %v7942_v4 = vpop.eup %7941 }
0x188d   :  { %2513 = vrot.lane.b32.xlu1 %v7942_v4, %s8564_s7 }
0x1890   :  { %v7944_v9 = vpop.eup %7943 }
0x1891   :  { %2475 = vrot.lane.b32.xlu0 %v7944_v9, %s8564_s7 }
0x1892   :  { %v7946_v8 = vpop.eup %7945 }
0x1893   :  { %v2466_v13 = vadd.f32 1.0, %v7946_v8 }
0x1895   :  { %7947 = vrcp.f32 %v2466_v13 }
0x189f   :  { %v7948_v15 = vpop.eup %7947 }
0x18a0   :  { %v2473_v23 = vmul.f32 %v7948_v15, %v2471_v19 }
0x18ff   :  { %v2514_v16 = vpop.permute.xlu1 %2513 }
0x1900   :  { %v9251_v17 = vmul.f32 %v7940_v50, %v2514_v16  ;;  %v2716_v50 = vrot.slane %v9245_v62, 2 }
0x1902   :  { %2603 = vrot.lane.b32.xlu1 %v9251_v17, %s8560_s17 }
0x1903   :  { %v2476_v43 = vpop.permute.xlu0 %2475 }
0x1904   :  { %v2478_v18 = vmul.f32 %v7948_v15, %v2476_v43 }
0x1906   :  { %2480 = vrot.lane.b32.xlu0 %v2478_v18, %s8560_s17 }
0x1974   :  { %v2604_v58 = vpop.permute.xlu1 %2603 }
0x1975   :  { %7058 = vmatmul.mubr.msk.f32.vlgmr.msra.gmra.mrb[24].mxu0 %vm432_vm4, %v2604_v58 }
0x1976   :  { %7589 = vmatpush3.bf16.msra.mxu0 %v8945_v35  ;;  %7079 = vmatprep.mubr.msk.f32.mxu0 %vm8562_vm7, %v8563_v14 }
0x1977   :  { %7590 = vmatprep.subr.bf16.mxu0 %v8561_v6 }
0x1978   :  { %v2481_v24 = vpop.permute.xlu0 %2480 }
0x1979   :  { %v9262_v26 = vadd.f32 %v2481_v24, %v2473_v23 }
0x197a   :  { %7592 = vmatpush3.bf16.msra.mxu0 %v8950_v38 }
0x197b   :  { %7949 = vtanh.f32 %v9262_v26  ;;  %7599 = vmatprep.subr.bf16.mxu0 %v8561_v6  ;;  %v2689_v43 = vrot.slane %v9262_v26, 6 }
0x1985   :  { %v7950_v27 = vpop.eup %7949 }
0x1986   :  { %2486 = vrot.lane.b32.xlu0 %v7950_v27, %s8564_s7 }
0x19f8   :  { %v2487_v28 = vpop.permute.xlu0 %2486 }
0x19f9   :  { %v9268_v29 = vmul.f32 %v7948_v15, %v2487_v28 }
0x19fb   :  { %v2527_v30 = vrot.slane %v9268_v29, 6 }
0x19fd   :  { %2528 = vrot.lane.b32.xlu0 %v2527_v30, %s8560_s17 }
0x1a48   :  { %v2673_v32 = vpop.f32.mrb[24].mxu0 }
0x1a49   :  { %v2678_v33 = vrot.slane %v2673_v32, 2  ;;  %v7059_v34 = vpop.f32.mrb[25].mxu0 }
0x1a4b   :  { %v2680_v37 = vadd.f32 %v2678_v33, %v8971_v51 }
0x1a4d   :  { %7951 = vtanh.f32 %v2680_v37  ;;  %v6446_v44 = vmul.f32 -1.442695, %v2680_v37 }
0x1a4f   :  { %7953 = vpow2.f32 %v6446_v44 }
0x1a57   :  { %v7952_v39 = vpop.eup %7951 }
0x1a58   :  { %2720 = vrot.lane.b32.xlu1 %v7952_v39, %s8564_s7 }
0x1a59   :  { %v7954_v5 = vpop.eup %7953 }
0x1a5a   :  { %v2711_v45 = vadd.f32 1.0, %v7954_v5 }
0x1a5c   :  { %7955 = vrcp.f32 %v2711_v45 }
0x1a66   :  { %v7956_v56 = vpop.eup %7955 }
0x1a67   :  { %v2718_v52 = vmul.f32 %v7956_v56, %v2716_v50 }
0x1a6f   :  { %v2529_v41 = vpop.permute.xlu0 %2528 }
0x1a70   :  { %7047 = vmatmul.mubr.msk.f32.vlgmr.msra.gmra.mrb[24].mxu1 %vm432_vm4, %v2529_v41 }
0x1a71   :  { %7583 = vmatpush3.bf16.msra.mxu1 %v8922_v7  ;;  %7068 = vmatprep.mubr.msk.f32.mxu1 %vm8562_vm7, %v8563_v14 }
0x1a72   :  { %7584 = vmatprep.subr.bf16.mxu1 %v8561_v6 }
0x1a75   :  { %7586 = vmatpush3.bf16.msra.mxu1 %v8926_v10 }
0x1a76   :  { %7593 = vmatprep.subr.bf16.mxu1 %v8561_v6 }
0x1aca   :  { %v2721_v47 = vpop.permute.xlu1 %2720 }
0x1acb   :  { %v2723_v49 = vmul.f32 %v7956_v56, %v2721_v47 }
0x1acd   :  { %2725 = vrot.lane.b32.xlu1 %v2723_v49, %s8560_s17 }
0x1b3f   :  { %v2726_v54 = vpop.permute.xlu1 %2725 }
0x1b40   :  { %v9283_v55 = vadd.f32 %v2726_v54, %v2718_v52 }
0x1b42   :  { %7957 = vtanh.f32 %v9283_v55  ;;  %v2935_v47 = vrot.slane %v9283_v55, 2 }
0x1b43   :  { %v2598_v59 = vpop.f32.mrb[24].mxu1 }
0x1b44   :  { %v2602_v61 = vadd.f32 %v2598_v59, %v8969_v48  ;;  %v7048_v63 = vpop.f32.mrb[25].mxu1 }
0x1b46   :  { %7959 = vtanh.f32 %v2602_v61  ;;  %v6445_v2 = vmul.f32 -1.442695, %v2602_v61 }
0x1b48   :  { %7961 = vpow2.f32 %v6445_v2 }
0x1b4c   :  { %v7958_v0 = vpop.eup %7957 }
0x1b4d   :  { %2731 = vrot.lane.b32.xlu1 %v7958_v0, %s8564_s7 }
0x1b50   :  { %v7960_v1 = vpop.eup %7959 }
0x1b51   :  { %2693 = vrot.lane.b32.xlu0 %v7960_v1, %s8564_s7 }
0x1b52   :  { %v7962_v62 = vpop.eup %7961 }
0x1b53   :  { %v2684_v4 = vadd.f32 1.0, %v7962_v62 }
0x1b55   :  { %7963 = vrcp.f32 %v2684_v4 }
0x1b5f   :  { %v7964_v13 = vpop.eup %7963 }
0x1b60   :  { %v2691_v58 = vmul.f32 %v7964_v13, %v2689_v43 }
0x1bbf   :  { %v2732_v9 = vpop.permute.xlu1 %2731 }
0x1bc0   :  { %v9289_v12 = vmul.f32 %v7956_v56, %v2732_v9 }
0x1bc2   :  { %v2821_v8 = vrot.slane %v9289_v12, 6 }
0x1bc3   :  { %v2694_v16 = vpop.permute.xlu0 %2693 }
0x1bc4   :  { %v2696_v15 = vmul.f32 %v7964_v13, %v2694_v16  ;;  %2822 = vrot.lane.b32.xlu1 %v2821_v8, %s8560_s17 }
0x1bc6   :  { %2698 = vrot.lane.b32.xlu0 %v2696_v15, %s8560_s17 }
0x1c36   :  { %v2823_v18 = vpop.permute.xlu1 %2822 }
0x1c37   :  { %7080 = vmatmul.mubr.msk.f32.vlgmr.msra.gmra.mrb[26].mxu0 %vm432_vm4, %v2823_v18 }
0x1c38   :  { %v2699_v19 = vpop.permute.xlu0 %2698  ;;  %7601 = vmatpush3.bf16.msra.mxu0 %v8945_v35  ;;  %7101 = vmatprep.mubr.msk.f32.mxu0 %vm8562_vm7, %v8563_v14 }
0x1c39   :  { %v2701_v23 = vadd.f32 %v2699_v19, %v2691_v58  ;;  %7602 = vmatprep.subr.bf16.mxu0 %v8561_v6 }
0x1c3b   :  { %7965 = vtanh.f32 %v2701_v23  ;;  %v2908_v43 = vrot.slane %v2701_v23, 6 }
0x1c3c   :  { %7604 = vmatpush3.bf16.msra.mxu0 %v8950_v38 }
0x1c3d   :  { %7611 = vmatprep.subr.bf16.mxu0 %v8561_v6 }
0x1c45   :  { %v7966_v24 = vpop.eup %7965 }
0x1c46   :  { %2704 = vrot.lane.b32.xlu0 %v7966_v24, %s8564_s7 }
0x1cb8   :  { %v2705_v26 = vpop.permute.xlu0 %2704 }
0x1cb9   :  { %v2707_v27 = vmul.f32 %v7964_v13, %v2705_v26 }
0x1cbb   :  { %2736 = vrot.lane.b32.xlu0 %v2707_v27, %s8560_s17 }
0x1d0a   :  { %v2892_v28 = vpop.f32.mrb[26].mxu0 }
0x1d0b   :  { %v2897_v30 = vrot.slane %v2892_v28, 4  ;;  %v7081_v32 = vpop.f32.mrb[27].mxu0 }
0x1d0d   :  { %v2899_v33 = vadd.f32 %v2897_v30, %v8971_v51 }
0x1d0f   :  { %7967 = vtanh.f32 %v2899_v33  ;;  %v6450_v39 = vmul.f32 -1.442695, %v2899_v33 }
0x1d11   :  { %7969 = vpow2.f32 %v6450_v39 }
0x1d19   :  { %v7968_v34 = vpop.eup %7967 }
0x1d1a   :  { %2939 = vrot.lane.b32.xlu1 %v7968_v34, %s8564_s7 }
0x1d1b   :  { %v7970_v41 = vpop.eup %7969 }
0x1d1c   :  { %v2930_v44 = vadd.f32 1.0, %v7970_v41 }
0x1d1e   :  { %7971 = vrcp.f32 %v2930_v44 }
0x1d28   :  { %v7972_v5 = vpop.eup %7971 }
0x1d29   :  { %v2937_v49 = vmul.f32 %v7972_v5, %v2935_v47 }
0x1d2d   :  { %v9306_v37 = vpop.permute.xlu0 %2736 }
0x1d2e   :  { %7069 = vmatmul.mubr.msk.f32.vlgmr.msra.gmra.mrb[26].mxu1 %vm432_vm4, %v9306_v37 }
0x1d2f   :  { %7595 = vmatpush3.bf16.msra.mxu1 %v8922_v7  ;;  %7090 = vmatprep.mubr.msk.f32.mxu1 %vm8562_vm7, %v8563_v14 }
0x1d30   :  { %7596 = vmatprep.subr.bf16.mxu1 %v8561_v6 }
0x1d33   :  { %7598 = vmatpush3.bf16.msra.mxu1 %v8926_v10 }
0x1d34   :  { %7605 = vmatprep.subr.bf16.mxu1 %v8561_v6 }
0x1d8c   :  { %v2940_v45 = vpop.permute.xlu1 %2939 }
0x1d8d   :  { %v2942_v56 = vmul.f32 %v7972_v5, %v2940_v45 }
0x1d8f   :  { %2944 = vrot.lane.b32.xlu1 %v2942_v56, %s8560_s17 }
0x1e01   :  { %v2945_v50 = vpop.permute.xlu1 %2944  ;;  %v2813_v52 = vpop.f32.mrb[26].mxu1 }
0x1e02   :  { %v9318_v54 = vadd.f32 %v2945_v50, %v2937_v49  ;;  %v2818_v59 = vrot.slane %v2813_v52, 6  ;;  %v7070_v61 = vpop.f32.mrb[27].mxu1 }
0x1e04   :  { %7973 = vtanh.f32 %v9318_v54  ;;  %v2820_v63 = vadd.f32 %v2818_v59, %v8969_v48  ;;  %v3157_v50 = vrot.slane %v9318_v54, 2 }
0x1e06   :  { %7975 = vtanh.f32 %v2820_v63  ;;  %v6449_v2 = vmul.f32 -1.442695, %v2820_v63 }
0x1e08   :  { %7977 = vpow2.f32 %v6449_v2 }
0x1e0e   :  { %v7974_v0 = vpop.eup %7973 }
0x1e0f   :  { %2950 = vrot.lane.b32.xlu1 %v7974_v0, %s8564_s7 }
0x1e10   :  { %v7976_v1 = vpop.eup %7975 }
0x1e11   :  { %2912 = vrot.lane.b32.xlu0 %v7976_v1, %s8564_s7 }
0x1e12   :  { %v7978_v55 = vpop.eup %7977 }
0x1e13   :  { %v2903_v62 = vadd.f32 1.0, %v7978_v55 }
0x1e15   :  { %7979 = vrcp.f32 %v2903_v62 }
0x1e1f   :  { %v7980_v8 = vpop.eup %7979 }
0x1e20   :  { %v2910_v18 = vmul.f32 %v7980_v8, %v2908_v43 }
0x1e81   :  { %v2951_v4 = vpop.permute.xlu1 %2950 }
0x1e82   :  { %v9324_v9 = vmul.f32 %v7972_v5, %v2951_v4 }
0x1e83   :  { %v2913_v13 = vpop.permute.xlu0 %2912 }
0x1e84   :  { %v3043_v16 = vrot.slane %v9324_v9, 4  ;;  %v2915_v15 = vmul.f32 %v7980_v8, %v2913_v13 }
0x1e86   :  { %3044 = vrot.lane.b32.xlu1 %v3043_v16, %s8560_s17  ;;  %2917 = vrot.lane.b32.xlu0 %v2915_v15, %s8560_s17 }
0x1ef8   :  { %v3045_v58 = vpop.permute.xlu1 %3044  ;;  %v2918_v19 = vpop.permute.xlu0 %2917 }
0x1ef9   :  { %v9329_v24 = vadd.f32 %v2918_v19, %v2910_v18  ;;  %7102 = vmatmul.mubr.msk.f32.vlgmr.msra.gmra.mrb[28].mxu0 %vm432_vm4, %v3045_v58 }
0x1efa   :  { %7613 = vmatpush3.bf16.msra.mxu0 %v8945_v35  ;;  %7123 = vmatprep.mubr.msk.f32.mxu0 %vm8562_vm7, %v8563_v14 }
0x1efb   :  { %7981 = vtanh.f32 %v9329_v24  ;;  %7614 = vmatprep.subr.bf16.mxu0 %v8561_v6  ;;  %v3130_v19 = vrot.slane %v9329_v24, 6 }
0x1efe   :  { %7616 = vmatpush3.bf16.msra.mxu0 %v8950_v38 }
0x1eff   :  { %7623 = vmatprep.subr.bf16.mxu0 %v8561_v6 }
0x1f05   :  { %v7982_v23 = vpop.eup %7981 }
0x1f06   :  { %2923 = vrot.lane.b32.xlu0 %v7982_v23, %s8564_s7 }
0x1f78   :  { %v2924_v26 = vpop.permute.xlu0 %2923 }
0x1f79   :  { %v9340_v27 = vmul.f32 %v7980_v8, %v2924_v26 }
0x1f7b   :  { %v2964_v28 = vrot.slane %v9340_v27, 2 }
0x1f7d   :  { %2965 = vrot.lane.b32.xlu0 %v2964_v28, %s8560_s17 }
0x1fcc   :  { %v3114_v30 = vpop.f32.mrb[28].mxu0 }
0x1fcd   :  { %v3119_v32 = vrot.slane %v3114_v30, 6  ;;  %v7103_v33 = vpop.f32.mrb[29].mxu0 }
0x1fcf   :  { %v3121_v34 = vadd.f32 %v3119_v32, %v8971_v51 }
0x1fd1   :  { %7983 = vtanh.f32 %v3121_v34  ;;  %v6454_v44 = vmul.f32 -1.442695, %v3121_v34 }
0x1fd3   :  { %7985 = vpow2.f32 %v6454_v44 }
0x1fdb   :  { %v7984_v39 = vpop.eup %7983 }
0x1fdc   :  { %3161 = vrot.lane.b32.xlu1 %v7984_v39, %s8564_s7 }
0x1fdd   :  { %v7986_v5 = vpop.eup %7985 }
0x1fde   :  { %v3152_v45 = vadd.f32 1.0, %v7986_v5 }
0x1fe0   :  { %7987 = vrcp.f32 %v3152_v45 }
0x1fea   :  { %v7988_v56 = vpop.eup %7987 }
0x1feb   :  { %v3159_v52 = vmul.f32 %v7988_v56, %v3157_v50 }
0x1fef   :  { %v2966_v41 = vpop.permute.xlu0 %2965 }
0x1ff0   :  { %7091 = vmatmul.mubr.msk.f32.vlgmr.msra.gmra.mrb[28].mxu1 %vm432_vm4, %v2966_v41 }
0x1ff1   :  { %7607 = vmatpush3.bf16.msra.mxu1 %v8922_v7  ;;  %7112 = vmatprep.mubr.msk.f32.mxu1 %vm8562_vm7, %v8563_v14 }
0x1ff2   :  { %7608 = vmatprep.subr.bf16.mxu1 %v8561_v6 }
0x1ff5   :  { %7610 = vmatpush3.bf16.msra.mxu1 %v8926_v10 }
0x1ff6   :  { %7617 = vmatprep.subr.bf16.mxu1 %v8561_v6 }
0x204e   :  { %v3162_v47 = vpop.permute.xlu1 %3161 }
0x204f   :  { %v3164_v49 = vmul.f32 %v7988_v56, %v3162_v47 }
0x2051   :  { %3166 = vrot.lane.b32.xlu1 %v3164_v49, %s8560_s17 }
0x20c3   :  { %v3167_v59 = vpop.permute.xlu1 %3166  ;;  %v3035_v61 = vpop.f32.mrb[28].mxu1 }
0x20c4   :  { %v9355_v63 = vadd.f32 %v3167_v59, %v3159_v52  ;;  %v3040_v0 = vrot.slane %v3035_v61, 4  ;;  %v7092_v1 = vpop.f32.mrb[29].mxu1 }
0x20c6   :  { %7989 = vtanh.f32 %v9355_v63  ;;  %v3042_v2 = vadd.f32 %v3040_v0, %v8969_v48  ;;  %v3376_v59 = vrot.slane %v9355_v63, 2 }
0x20c8   :  { %7991 = vtanh.f32 %v3042_v2  ;;  %v6453_v4 = vmul.f32 -1.442695, %v3042_v2 }
0x20ca   :  { %7993 = vpow2.f32 %v6453_v4 }
0x20d0   :  { %v7990_v55 = vpop.eup %7989 }
0x20d1   :  { %3172 = vrot.lane.b32.xlu1 %v7990_v55, %s8564_s7 }
0x20d2   :  { %v7992_v62 = vpop.eup %7991 }
0x20d3   :  { %3134 = vrot.lane.b32.xlu0 %v7992_v62, %s8564_s7 }
0x20d4   :  { %v7994_v54 = vpop.eup %7993 }
0x20d5   :  { %v3125_v8 = vadd.f32 1.0, %v7994_v54 }
0x20d7   :  { %7995 = vrcp.f32 %v3125_v8 }
0x20e1   :  { %v7996_v15 = vpop.eup %7995 }
0x20e2   :  { %v3132_v23 = vmul.f32 %v7996_v15, %v3130_v19 }
0x2143   :  { %v3173_v13 = vpop.permute.xlu1 %3172 }
0x2144   :  { %v9361_v16 = vmul.f32 %v7988_v56, %v3173_v13 }
0x2145   :  { %v3135_v43 = vpop.permute.xlu0 %3134 }
0x2146   :  { %v3265_v18 = vrot.slane %v9361_v16, 2  ;;  %v3137_v58 = vmul.f32 %v7996_v15, %v3135_v43 }
0x2148   :  { %3266 = vrot.lane.b32.xlu1 %v3265_v18, %s8560_s17  ;;  %3139 = vrot.lane.b32.xlu0 %v3137_v58, %s8560_s17 }
0x21ba   :  { %v3267_v26 = vpop.permute.xlu1 %3266  ;;  %v3140_v28 = vpop.permute.xlu0 %3139 }
0x21bb   :  { %v9367_v30 = vadd.f32 %v3140_v28, %v3132_v23  ;;  %7124 = vmatmul.mubr.msk.f32.vlgmr.msra.gmra.mrb[30].mxu0 %vm432_vm4, %v3267_v26 }
0x21bc   :  { %7625 = vmatpush3.bf16.msra.mxu0 %v8945_v35  ;;  %7145 = vmatprep.mubr.msk.f32.mxu0 %vm8562_vm7, %v8563_v14 }
0x21bd   :  { %7997 = vtanh.f32 %v9367_v30  ;;  %7626 = vmatprep.subr.bf16.mxu0 %v8561_v6  ;;  %v3349_v26 = vrot.slane %v9367_v30, 6 }
0x21c0   :  { %7628 = vmatpush3.bf16.msra.mxu0 %v8950_v38 }
0x21c1   :  { %7635 = vmatprep.subr.bf16.mxu0 %v8561_v6 }
0x21c7   :  { %v7998_v24 = vpop.eup %7997 }
0x21c8   :  { %3145 = vrot.lane.b32.xlu0 %v7998_v24, %s8564_s7 }
0x223a   :  { %v3146_v32 = vpop.permute.xlu0 %3145 }
0x223b   :  { %v9378_v33 = vmul.f32 %v7996_v15, %v3146_v32 }
0x223d   :  { %v3186_v34 = vrot.slane %v9378_v33, 4 }
0x223f   :  { %3187 = vrot.lane.b32.xlu0 %v3186_v34, %s8560_s17 }
0x228e   :  { %v3336_v39 = vpop.f32.mrb[30].mxu0 }
0x228f   :  { %v3340_v41 = vadd.f32 %v3336_v39, %v8971_v51  ;;  %v7125_v44 = vpop.f32.mrb[31].mxu0 }
0x2291   :  { %7999 = vtanh.f32 %v3340_v41  ;;  %v6458_v51 = vmul.f32 -1.442695, %v3340_v41 }
0x2293   :  { %8001 = vpow2.f32 %v6458_v51 }
0x229b   :  { %v8000_v5 = vpop.eup %7999 }
0x229c   :  { %3380 = vrot.lane.b32.xlu1 %v8000_v5, %s8564_s7 }
0x229d   :  { %v8002_v56 = vpop.eup %8001 }
0x229e   :  { %v3371_v47 = vadd.f32 1.0, %v8002_v56 }
0x22a0   :  { %8003 = vrcp.f32 %v3371_v47 }
0x22aa   :  { %v8004_v49 = vpop.eup %8003 }
0x22ab   :  { %v3378_v61 = vmul.f32 %v8004_v49, %v3376_v59 }
0x22b1   :  { %v3188_v45 = vpop.permute.xlu0 %3187 }
0x22b2   :  { %7113 = vmatmul.mubr.msk.f32.vlgmr.msra.gmra.mrb[30].mxu1 %vm432_vm4, %v3188_v45 }
0x22b3   :  { %7619 = vmatpush3.bf16.msra.mxu1 %v8922_v7  ;;  %7134 = vmatprep.mubr.msk.f32.mxu1 %vm8562_vm7, %v8563_v14 }
0x22b4   :  { %7620 = vmatprep.subr.bf16.mxu1 %v8561_v6 }
0x22b7   :  { %7622 = vmatpush3.bf16.msra.mxu1 %v8926_v10 }
0x22b8   :  { %7629 = vmatprep.subr.bf16.mxu1 %v8561_v6 }
0x230e   :  { %v3381_v50 = vpop.permute.xlu1 %3380 }
0x230f   :  { %v3383_v52 = vmul.f32 %v8004_v49, %v3381_v50 }
0x2311   :  { %3385 = vrot.lane.b32.xlu1 %v3383_v52, %s8560_s17 }
0x2383   :  { %v3386_v0 = vpop.permute.xlu1 %3385 }
0x2384   :  { %v9393_v1 = vadd.f32 %v3386_v0, %v3378_v61 }
0x2385   :  { %v3257_v2 = vpop.f32.mrb[30].mxu1 }
0x2386   :  { %8005 = vtanh.f32 %v9393_v1  ;;  %v3262_v55 = vrot.slane %v3257_v2, 2  ;;  %v7114_v62 = vpop.f32.mrb[31].mxu1  ;;  %v3594_v2 = vrot.slane %v9393_v1, 2 }
0x2388   :  { %v3264_v4 = vadd.f32 %v3262_v55, %v8969_v48 }
0x238a   :  { %8007 = vtanh.f32 %v3264_v4  ;;  %v6457_v13 = vmul.f32 -1.442695, %v3264_v4 }
0x238c   :  { %8009 = vpow2.f32 %v6457_v13 }
0x2390   :  { %v8006_v54 = vpop.eup %8005 }
0x2391   :  { %3391 = vrot.lane.b32.xlu1 %v8006_v54, %s8564_s7 }
0x2394   :  { %v8008_v8 = vpop.eup %8007 }
0x2395   :  { %3353 = vrot.lane.b32.xlu0 %v8008_v8, %s8564_s7 }
0x2396   :  { %v8010_v63 = vpop.eup %8009 }
0x2397   :  { %v3344_v15 = vadd.f32 1.0, %v8010_v63 }
0x2399   :  { %8011 = vrcp.f32 %v3344_v15 }
0x23a3   :  { %v8012_v58 = vpop.eup %8011 }
0x23a4   :  { %v3351_v28 = vmul.f32 %v8012_v58, %v3349_v26 }
0x2403   :  { %v3392_v43 = vpop.permute.xlu1 %3391 }
0x2404   :  { %v9399_v18 = vmul.f32 %v8004_v49, %v3392_v43 }
0x2406   :  { %3481 = vrot.lane.b32.xlu1 %v9399_v18, %s8560_s17 }
0x2407   :  { %v3354_v48 = vpop.permute.xlu0 %3353 }
0x2408   :  { %v3356_v19 = vmul.f32 %v8012_v58, %v3354_v48 }
0x240a   :  { %3358 = vrot.lane.b32.xlu0 %v3356_v19, %s8560_s17 }
0x2478   :  { %v3482_v23 = vpop.permute.xlu1 %3481 }
0x2479   :  { %7146 = vmatmul.mubr.msk.f32.vlgmr.msra.gmra.mrb[32].mxu0 %vm432_vm4, %v3482_v23 }
0x247a   :  { %7637 = vmatpush3.bf16.msra.mxu0 %v8945_v35  ;;  %7167 = vmatprep.mubr.msk.f32.mxu0 %vm8562_vm7, %v8563_v14 }
0x247b   :  { %7638 = vmatprep.subr.bf16.mxu0 %v8561_v6 }
0x247c   :  { %v3359_v24 = vpop.permute.xlu0 %3358 }
0x247d   :  { %v9410_v32 = vadd.f32 %v3359_v24, %v3351_v28 }
0x247e   :  { %7640 = vmatpush3.bf16.msra.mxu0 %v8950_v38 }
0x247f   :  { %8013 = vtanh.f32 %v9410_v32  ;;  %7647 = vmatprep.subr.bf16.mxu0 %v8561_v6 }
0x2489   :  { %v8014_v30 = vpop.eup %8013 }
0x248a   :  { %3364 = vrot.lane.b32.xlu0 %v8014_v30, %s8564_s7  ;;  %v3567_v30 = vrot.slane %v9410_v32, 6 }
0x24fc   :  { %v3365_v34 = vpop.permute.xlu0 %3364 }
0x24fd   :  { %v9416_v39 = vmul.f32 %v8012_v58, %v3365_v34 }
0x24ff   :  { %v3405_v41 = vrot.slane %v9416_v39, 6 }
0x2501   :  { %3406 = vrot.lane.b32.xlu0 %v3405_v41, %s8560_s17 }
0x254c   :  { %v3551_v44 = vpop.f32.mrb[32].mxu0 }
0x254d   :  { %v3556_v5 = vrot.slane %v3551_v44, 2  ;;  %v7147_v45 = vpop.f32.mrb[33].mxu0 }
0x254f   :  { %v3558_v51 = vadd.f32 %v3556_v5, %v8973_v53 }
0x2551   :  { %8015 = vtanh.f32 %v3558_v51  ;;  %v6462_v49 = vmul.f32 -1.442695, %v3558_v51 }
0x2553   :  { %8017 = vpow2.f32 %v6462_v49 }
0x255b   :  { %v8016_v56 = vpop.eup %8015 }
0x255c   :  { %3598 = vrot.lane.b32.xlu1 %v8016_v56, %s8564_s7 }
0x255d   :  { %v8018_v50 = vpop.eup %8017 }
0x255e   :  { %v3589_v52 = vadd.f32 1.0, %v8018_v50 }
0x2560   :  { %8019 = vrcp.f32 %v3589_v52 }
0x256a   :  { %v8020_v59 = vpop.eup %8019 }
0x256b   :  { %v3596_v55 = vmul.f32 %v8020_v59, %v3594_v2 }
0x2573   :  { %v3407_v47 = vpop.permute.xlu0 %3406 }
0x2574   :  { %7135 = vmatmul.mubr.msk.f32.vlgmr.msra.gmra.mrb[32].mxu1 %vm432_vm4, %v3407_v47 }
0x2575   :  { %7631 = vmatpush3.bf16.msra.mxu1 %v8922_v7  ;;  %7156 = vmatprep.mubr.msk.f32.mxu1 %vm8562_vm7, %v8563_v14 }
0x2576   :  { %7632 = vmatprep.subr.bf16.mxu1 %v8561_v6 }
0x2579   :  { %7634 = vmatpush3.bf16.msra.mxu1 %v8926_v10 }
0x257a   :  { %7641 = vmatprep.subr.bf16.mxu1 %v8561_v6 }
0x25ce   :  { %v3599_v61 = vpop.permute.xlu1 %3598 }
0x25cf   :  { %v3601_v0 = vmul.f32 %v8020_v59, %v3599_v61 }
0x25d1   :  { %3603 = vrot.lane.b32.xlu1 %v3601_v0, %s8560_s17 }
0x2643   :  { %v3604_v62 = vpop.permute.xlu1 %3603 }
0x2644   :  { %v9431_v4 = vadd.f32 %v3604_v62, %v3596_v55 }
0x2646   :  { %8021 = vtanh.f32 %v9431_v4 }
0x2647   :  { %v3476_v54 = vpop.f32.mrb[32].mxu1 }
0x2648   :  { %v3480_v8 = vadd.f32 %v3476_v54, %v8967_v46  ;;  %v7136_v13 = vpop.f32.mrb[33].mxu1 }
0x264a   :  { %8023 = vtanh.f32 %v3480_v8  ;;  %v6461_v43 = vmul.f32 -1.442695, %v3480_v8  ;;  %v3813_v8 = vrot.slane %v9431_v4, 2 }
0x264c   :  { %8025 = vpow2.f32 %v6461_v43 }
0x2650   :  { %v8022_v63 = vpop.eup %8021 }
0x2651   :  { %3609 = vrot.lane.b32.xlu1 %v8022_v63, %s8564_s7 }
0x2654   :  { %v8024_v15 = vpop.eup %8023 }
0x2655   :  { %3571 = vrot.lane.b32.xlu0 %v8024_v15, %s8564_s7 }
0x2656   :  { %v8026_v1 = vpop.eup %8025 }
0x2657   :  { %v3562_v58 = vadd.f32 1.0, %v8026_v1 }
0x2659   :  { %8027 = vrcp.f32 %v3562_v58 }
0x2663   :  { %v8028_v26 = vpop.eup %8027 }
0x2664   :  { %v3569_v41 = vmul.f32 %v8028_v26, %v3567_v30 }
0x26c3   :  { %v3610_v48 = vpop.permute.xlu1 %3609 }
0x26c4   :  { %v9437_v19 = vmul.f32 %v8020_v59, %v3610_v48 }
0x26c6   :  { %v3699_v23 = vrot.slane %v9437_v19, 6 }
0x26c7   :  { %v3572_v28 = vpop.permute.xlu0 %3571 }
0x26c8   :  { %v3574_v24 = vmul.f32 %v8028_v26, %v3572_v28  ;;  %3700 = vrot.lane.b32.xlu1 %v3699_v23, %s8560_s17 }
0x26ca   :  { %3576 = vrot.lane.b32.xlu0 %v3574_v24, %s8560_s17 }
0x273a   :  { %v3701_v34 = vpop.permute.xlu1 %3700 }
0x273b   :  { %7168 = vmatmul.mubr.msk.f32.vlgmr.msra.gmra.mrb[34].mxu0 %vm432_vm4, %v3701_v34 }
0x273c   :  { %v3577_v44 = vpop.permute.xlu0 %3576  ;;  %7649 = vmatpush3.bf16.msra.mxu0 %v8945_v35  ;;  %7189 = vmatprep.mubr.msk.f32.mxu0 %vm8562_vm7, %v8563_v14 }
0x273d   :  { %v3579_v5 = vadd.f32 %v3577_v44, %v3569_v41  ;;  %7650 = vmatprep.subr.bf16.mxu0 %v8561_v6 }
0x273f   :  { %8029 = vtanh.f32 %v3579_v5 }
0x2740   :  { %7652 = vmatpush3.bf16.msra.mxu0 %v8950_v38 }
0x2741   :  { %7659 = vmatprep.subr.bf16.mxu0 %v8561_v6 }
0x2749   :  { %v8030_v45 = vpop.eup %8029 }
0x274a   :  { %3582 = vrot.lane.b32.xlu0 %v8030_v45, %s8564_s7 }
0x27bc   :  { %v3583_v32 = vpop.permute.xlu0 %3582 }
0x27bd   :  { %v3585_v51 = vmul.f32 %v8028_v26, %v3583_v32 }
0x27bf   :  { %3614 = vrot.lane.b32.xlu0 %v3585_v51, %s8560_s17  ;;  %v3786_v51 = vrot.slane %v3579_v5, 6 }
0x280e   :  { %v3770_v56 = vpop.f32.mrb[34].mxu0 }
0x280f   :  { %v3775_v47 = vrot.slane %v3770_v56, 4  ;;  %v7169_v49 = vpop.f32.mrb[35].mxu0 }
0x2811   :  { %v3777_v50 = vadd.f32 %v3775_v47, %v8973_v53 }
0x2813   :  { %8031 = vtanh.f32 %v3777_v50  ;;  %v6466_v61 = vmul.f32 -1.442695, %v3777_v50 }
0x2815   :  { %8033 = vpow2.f32 %v6466_v61 }
0x281d   :  { %v8032_v52 = vpop.eup %8031 }
0x281e   :  { %3817 = vrot.lane.b32.xlu1 %v8032_v52, %s8564_s7 }
0x281f   :  { %v8034_v0 = vpop.eup %8033 }
0x2820   :  { %v3808_v2 = vadd.f32 1.0, %v8034_v0 }
0x2822   :  { %8035 = vrcp.f32 %v3808_v2 }
0x282c   :  { %v8036_v55 = vpop.eup %8035 }
0x282d   :  { %v3815_v13 = vmul.f32 %v8036_v55, %v3813_v8 }
0x2831   :  { %v9454_v59 = vpop.permute.xlu0 %3614 }
0x2832   :  { %7157 = vmatmul.mubr.msk.f32.vlgmr.msra.gmra.mrb[34].mxu1 %vm432_vm4, %v9454_v59 }
0x2833   :  { %7643 = vmatpush3.bf16.msra.mxu1 %v8922_v7  ;;  %7178 = vmatprep.mubr.msk.f32.mxu1 %vm8562_vm7, %v8563_v14 }
0x2834   :  { %7644 = vmatprep.subr.bf16.mxu1 %v8561_v6 }
0x2837   :  { %7646 = vmatpush3.bf16.msra.mxu1 %v8926_v10 }
0x2838   :  { %7653 = vmatprep.subr.bf16.mxu1 %v8561_v6 }
0x2890   :  { %v3818_v62 = vpop.permute.xlu1 %3817 }
0x2891   :  { %v3820_v54 = vmul.f32 %v8036_v55, %v3818_v62 }
0x2893   :  { %3822 = vrot.lane.b32.xlu1 %v3820_v54, %s8560_s17 }
0x2905   :  { %v3823_v63 = vpop.permute.xlu1 %3822  ;;  %v3691_v15 = vpop.f32.mrb[34].mxu1 }
0x2906   :  { %v9466_v43 = vadd.f32 %v3823_v63, %v3815_v13  ;;  %v3696_v1 = vrot.slane %v3691_v15, 6  ;;  %v7158_v58 = vpop.f32.mrb[35].mxu1 }
0x2908   :  { %8037 = vtanh.f32 %v9466_v43  ;;  %v3698_v48 = vadd.f32 %v3696_v1, %v8967_v46 }
0x290a   :  { %8039 = vtanh.f32 %v3698_v48  ;;  %v6465_v28 = vmul.f32 -1.442695, %v3698_v48  ;;  %v4035_v48 = vrot.slane %v9466_v43, 2 }
0x290c   :  { %8041 = vpow2.f32 %v6465_v28 }
0x2912   :  { %v8038_v23 = vpop.eup %8037 }
0x2913   :  { %3828 = vrot.lane.b32.xlu1 %v8038_v23, %s8564_s7 }
0x2914   :  { %v8040_v26 = vpop.eup %8039 }
0x2915   :  { %3790 = vrot.lane.b32.xlu0 %v8040_v26, %s8564_s7 }
0x2916   :  { %v8042_v4 = vpop.eup %8041 }
0x2917   :  { %v3781_v24 = vadd.f32 1.0, %v8042_v4 }
0x2919   :  { %8043 = vrcp.f32 %v3781_v24 }
0x2923   :  { %v8044_v41 = vpop.eup %8043 }
0x2924   :  { %v3788_v56 = vmul.f32 %v8044_v41, %v3786_v51 }
0x2985   :  { %v3829_v30 = vpop.permute.xlu1 %3828 }
0x2986   :  { %v9472_v34 = vmul.f32 %v8036_v55, %v3829_v30 }
0x2987   :  { %v3791_v44 = vpop.permute.xlu0 %3790 }
0x2988   :  { %v3921_v45 = vrot.slane %v9472_v34, 4  ;;  %v3793_v32 = vmul.f32 %v8044_v41, %v3791_v44 }
0x298a   :  { %3922 = vrot.lane.b32.xlu1 %v3921_v45, %s8560_s17  ;;  %3795 = vrot.lane.b32.xlu0 %v3793_v32, %s8560_s17 }
0x29fc   :  { %v3923_v47 = vpop.permute.xlu1 %3922  ;;  %v3796_v49 = vpop.permute.xlu0 %3795 }
0x29fd   :  { %v9477_v50 = vadd.f32 %v3796_v49, %v3788_v56  ;;  %7190 = vmatmul.mubr.msk.f32.vlgmr.msra.gmra.mrb[36].mxu0 %vm432_vm4, %v3923_v47 }
0x29fe   :  { %7661 = vmatpush3.bf16.msra.mxu0 %v8945_v35  ;;  %7211 = vmatprep.mubr.msk.f32.mxu0 %vm8562_vm7, %v8563_v14 }
0x29ff   :  { %8045 = vtanh.f32 %v9477_v50  ;;  %7662 = vmatprep.subr.bf16.mxu0 %v8561_v6 }
0x2a02   :  { %7664 = vmatpush3.bf16.msra.mxu0 %v8950_v38 }
0x2a03   :  { %7681 = vmatprep.subr.bf16.mxu0 %v8561_v6 }
0x2a09   :  { %v8046_v5 = vpop.eup %8045 }
0x2a0a   :  { %3801 = vrot.lane.b32.xlu0 %v8046_v5, %s8564_s7 }
0x2a7c   :  { %v3802_v52 = vpop.permute.xlu0 %3801 }
0x2a7d   :  { %v9488_v61 = vmul.f32 %v8044_v41, %v3802_v52  ;;  %v4008_v52 = vrot.slane %v9477_v50, 6 }
0x2a7f   :  { %v3842_v0 = vrot.slane %v9488_v61, 2 }
0x2a81   :  { %3843 = vrot.lane.b32.xlu0 %v3842_v0, %s8560_s17 }
0x2ad0   :  { %v3992_v35 = vpop.f32.mrb[36].mxu0 }
0x2ad1   :  { %v3997_v2 = vrot.slane %v3992_v35, 6  ;;  %v7191_v55 = vpop.f32.mrb[37].mxu0 }
0x2ad3   :  { %v3999_v62 = vadd.f32 %v3997_v2, %v8973_v53 }
0x2ad5   :  { %8047 = vtanh.f32 %v3999_v62  ;;  %v6470_v8 = vmul.f32 -1.442695, %v3999_v62 }
0x2ad7   :  { %8049 = vpow2.f32 %v6470_v8 }
0x2adf   :  { %v8048_v54 = vpop.eup %8047 }
0x2ae0   :  { %4039 = vrot.lane.b32.xlu1 %v8048_v54, %s8564_s7 }
0x2ae1   :  { %v8050_v13 = vpop.eup %8049 }
0x2ae2   :  { %v4030_v63 = vadd.f32 1.0, %v8050_v13 }
0x2ae4   :  { %8051 = vrcp.f32 %v4030_v63 }
0x2aee   :  { %v8052_v15 = vpop.eup %8051 }
0x2af3   :  { %v3844_v38 = vpop.permute.xlu0 %3843 }
0x2af4   :  { %7179 = vmatmul.mubr.msk.f32.vlgmr.msra.gmra.mrb[36].mxu1 %vm432_vm4, %v3844_v38 }
0x2af5   :  { %7655 = vmatpush3.bf16.msra.mxu1 %v8922_v7  ;;  %7200 = vmatprep.mubr.msk.f32.mxu1 %vm8562_vm7, %v8563_v14  ;;  %v4037_v7 = vmul.f32 %v8052_v15, %v4035_v48 }
0x2af6   :  { %7656 = vmatprep.subr.bf16.mxu1 %v8561_v6 }
0x2af9   :  { %7658 = vmatpush3.bf16.msra.mxu1 %v8926_v10 }
0x2b52   :  { %v4040_v1 = vpop.permute.xlu1 %4039 }
0x2b53   :  { %v4042_v58 = vmul.f32 %v8052_v15, %v4040_v1 }
0x2b55   :  { %4044 = vrot.lane.b32.xlu1 %v4042_v58, %s8560_s17 }
0x2bc7   :  { %v4045_v23 = vpop.permute.xlu1 %4044  ;;  %v3913_v26 = vpop.f32.mrb[36].mxu1 }
0x2bc8   :  { %v9502_v28 = vadd.f32 %v4045_v23, %v4037_v7  ;;  %v3918_v4 = vrot.slane %v3913_v26, 4  ;;  %v7180_v24 = vpop.f32.mrb[37].mxu1 }
0x2bca   :  { %8053 = vtanh.f32 %v9502_v28  ;;  %v3920_v10 = vadd.f32 %v3918_v4, %v8967_v46  ;;  %v4254_v26 = vrot.slane %v9502_v28, 2  ;;  %v4287_v28 = vld [vmem:[%s9975_s13] sm:$0xff] }
0x2bcc   :  { %8055 = vtanh.f32 %v3920_v10  ;;  %v6469_v44 = vmul.f32 -1.442695, %v3920_v10 }
0x2bce   :  { %8057 = vpow2.f32 %v6469_v44 }
0x2bd4   :  { %v8054_v30 = vpop.eup %8053 }
0x2bd5   :  { %4050 = vrot.lane.b32.xlu1 %v8054_v30, %s8564_s7 }
0x2bd6   :  { %v8056_v41 = vpop.eup %8055 }
0x2bd7   :  { %4012 = vrot.lane.b32.xlu0 %v8056_v41, %s8564_s7 }
0x2bd8   :  { %v8058_v43 = vpop.eup %8057 }
0x2bd9   :  { %v4003_v45 = vadd.f32 1.0, %v8058_v43  ;;  %v4288_v43 = vld [vmem:[%s9975_s13 + $0x8] sm:$0xff] }
0x2bdb   :  { %8059 = vrcp.f32 %v4003_v45  ;;  %v7665_v45 = vpack.c.bf16 %v4288_v43, %v4287_v28 }
0x2bdd   :  { %7666 = vmatprep.subr.bf16.mxu1 %v7665_v45 }
0x2be5   :  { %v8060_v56 = vpop.eup %8059 }
0x2be6   :  { %v4010_v0 = vmul.f32 %v8060_v56, %v4008_v52  ;;  %v4402_v52 = vld [vmem:[#allocation20 + $0x10] sm:$0xff] }
0x2c47   :  { %v4051_v32 = vpop.permute.xlu1 %4050 }
0x2c48   :  { %v9508_v51 = vmul.f32 %v8052_v15, %v4051_v32  ;;  %v4400_v32 = vld [vmem:[#allocation20] sm:$0xff] }
0x2c49   :  { %v4013_v47 = vpop.permute.xlu0 %4012 }
0x2c4a   :  { %v4143_v49 = vrot.slane %v9508_v51, 2  ;;  %v4015_v5 = vmul.f32 %v8060_v56, %v4013_v47 }
0x2c4c   :  { %4144 = vrot.lane.b32.xlu1 %v4143_v49, %s8560_s17  ;;  %4017 = vrot.lane.b32.xlu0 %v4015_v5, %s8560_s17  ;;  %v4294_v49 = vld [vmem:[%s9975_s13 + $0x38] sm:$0xff] }
0x2cbe   :  { %v4145_v35 = vpop.permute.xlu1 %4144  ;;  %v4018_v2 = vpop.permute.xlu0 %4017 }
0x2cbf   :  { %v9514_v55 = vadd.f32 %v4018_v2, %v4010_v0  ;;  %7212 = vmatmul.mubr.msk.f32.vlgmr.msra.gmra.mrb[38].mxu0 %vm432_vm4, %v4145_v35  ;;  %v4403_v0 = vld [vmem:[#allocation20 + $0x18] sm:$0xff] }
0x2cc0   :  { %7244 = vmatprep.mubr.msk.f32.mxu0 %vm8562_vm7, %v8563_v14  ;;  %v9589_v35 = vpack.c.bf16 %v4403_v0, %v4402_v52 }
0x2cc1   :  { %8061 = vtanh.f32 %v9514_v55 }
0x2ccb   :  { %v8062_v62 = vpop.eup %8061 }
0x2ccc   :  { %4023 = vrot.lane.b32.xlu0 %v8062_v62, %s8564_s7 }
0x2d3e   :  { %v4024_v54 = vpop.permute.xlu0 %4023 }
0x2d3f   :  { %v9521_v38 = vmul.f32 %v8060_v56, %v4024_v54  ;;  %v4293_v56 = vld [vmem:[%s9975_s13 + $0x30] sm:$0xff] }
0x2d40   :  { %v7677_v5 = vpack.c.bf16 %v4294_v49, %v4293_v56 }
0x2d41   :  { %v4064_v50 = vrot.slane %v9521_v38, 4 }
0x2d43   :  { %4065 = vrot.lane.b32.xlu0 %v4064_v50, %s8560_s17 }
0x2d47   :  { %1417 = vrot.lane.b32.xlu0 %v9080_v11, %s8560_s17 }
0x2d4b   :  { %2077 = vrot.lane.b32.xlu0 %v9192_v40, %s8560_s17 }
0x2d4f   :  { %2518 = vrot.lane.b32.xlu0 %v9268_v29, %s8560_s17 }
0x2d53   :  { %3838 = vrot.lane.b32.xlu0 %v9472_v34, %s8564_s7 }
0x2d57   :  { %2960 = vrot.lane.b32.xlu0 %v9324_v9, %s8564_s7 }
0x2d92   :  { %v4214_v8 = vpop.f32.mrb[38].mxu0 }
0x2d93   :  { %v4218_v13 = vadd.f32 %v4214_v8, %v8973_v53  ;;  %v7213_v63 = vpop.f32.mrb[39].mxu0 }
0x2d95   :  { %8063 = vtanh.f32 %v4218_v13  ;;  %v6474_v34 = vmul.f32 -1.442695, %v4218_v13 }
0x2d97   :  { %8065 = vpow2.f32 %v6474_v34 }
0x2d9f   :  { %v8064_v15 = vpop.eup %8063 }
0x2da0   :  { %4258 = vrot.lane.b32.xlu1 %v8064_v15, %s8564_s7 }
0x2da1   :  { %v8066_v1 = vpop.eup %8065 }
0x2da2   :  { %v4249_v58 = vadd.f32 1.0, %v8066_v1 }
0x2da4   :  { %8067 = vrcp.f32 %v4249_v58  ;;  %v9620_v58 = vld [vmem:[#allocation21] ss:$0 sm:$0xff] }
0x2dae   :  { %v8068_v48 = vpop.eup %8067 }
0x2daf   :  { %v4256_v4 = vmul.f32 %v8068_v48, %v4254_v26 }
0x2db5   :  { %v4066_v11 = vpop.permute.xlu0 %4065 }
0x2db6   :  { %7201 = vmatmul.mubr.msk.f32.vlgmr.msra.gmra.mrb[38].mxu1 %vm432_vm4, %v4066_v11 }
0x2db7   :  { %7668 = vmatpush3.bf16.msra.mxu1 %v7665_v45 }
0x2db9   :  { %v1418_v40 = vpop.permute.xlu0 %1417 }
0x2dba   :  { %1421 = vst.msk [vmem:[#allocation2] sm:$0x30] %vm1420_vm9, %v1418_v40 }
0x2dbd   :  { %v2078_v29 = vpop.permute.xlu0 %2077 }
0x2dbe   :  { %2080 = vst.msk [vmem:[#allocation2 + $0x8] sm:$0xc] %vm1196_vm10, %v2078_v29 }
0x2dc1   :  { %v2519_v9 = vpop.permute.xlu0 %2518 }
0x2dc2   :  { %2521 = vst.msk [vmem:[#allocation2 + $0x8] sm:$0xc0] %vm1641_vm11, %v2519_v9 }
0x2dc5   :  { %v3839_v53 = vpop.permute.xlu0 %3838 }
0x2dc6   :  { %3841 = vst.msk [vmem:[#allocation2] sm:$0x30] %vm1202_vm12, %v3839_v53 }
0x2dc9   :  { %v2961_v13 = vpop.permute.xlu0 %2960 }
0x2e12   :  { %v4259_v7 = vpop.permute.xlu1 %4258 }
0x2e13   :  { %v4261_v23 = vmul.f32 %v8068_v48, %v4259_v7 }
0x2e15   :  { %4263 = vrot.lane.b32.xlu1 %v4261_v23, %s8560_s17 }
0x2e87   :  { %v4264_v24 = vpop.permute.xlu1 %4263 }
0x2e88   :  { %v4266_v10 = vadd.f32 %v4264_v24, %v4256_v4 }
0x2e89   :  { %v9544_v30 = vpop.f32.mrb[38].mxu1 }
0x2e8a   :  { %8069 = vtanh.f32 %v4266_v10  ;;  %v7202_v41 = vpop.f32.mrb[39].mxu1  ;;  %v4140_v45 = vrot.slane %v9544_v30, 2 }
0x2e94   :  { %v8070_v44 = vpop.eup %8069 }
0x2e95   :  { %4269 = vrot.lane.b32.xlu1 %v8070_v44, %s8564_s7 }
0x2e99   :  { %1193 = vrot.lane.b32.xlu1 %v9042_v21, %s8560_s17  ;;  %v4289_v21 = vld [vmem:[%s9975_s13 + $0x10] sm:$0xff] }
0x2e9d   :  { %1638 = vrot.lane.b32.xlu1 %v9118_v60, %s8560_s17  ;;  %v4290_v60 = vld [vmem:[%s9975_s13 + $0x18] sm:$0xff] }
0x2ea1   :  { %2299 = vrot.lane.b32.xlu1 %v9230_v36, %s8560_s17  ;;  %v7669_v36 = vpack.c.bf16 %v4290_v60, %v4289_v21 }
0x2ea3   :  { %7670 = vmatprep.subr.bf16.mxu1 %v7669_v36 }
0x2ea4   :  { %7672 = vmatpush3.bf16.msra.mxu1 %v7669_v36 }
0x2ea5   :  { %3619 = vrot.lane.b32.xlu1 %v9437_v19, %s8564_s7  ;;  %v4291_v19 = vld [vmem:[%s9975_s13 + $0x20] sm:$0xff] }
0x2ea9   :  { %4060 = vrot.lane.b32.xlu1 %v9508_v51, %s8564_s7  ;;  %v4401_v51 = vld [vmem:[#allocation20 + $0x8] sm:$0xff] }
0x2eaa   :  { %v9582_v47 = vpack.c.bf16 %v4401_v51, %v4400_v32 }
0x2eac   :  { %7683 = vmatpush3.bf16.msra.mxu0 %v9582_v47 }
0x2ead   :  { %2741 = vrot.lane.b32.xlu1 %v9289_v12, %s8564_s7  ;;  %v4292_v12 = vld [vmem:[%s9975_s13 + $0x28] sm:$0xff]  ;;  %7684 = vmatprep.subr.bf16.mxu0 %v8561_v6 }
0x2eb0   :  { %7686 = vmatpush3.bf16.msra.mxu0 %v9589_v35 }
0x2eb1   :  { %3182 = vrot.lane.b32.xlu1 %v9361_v16, %s8564_s7  ;;  %v7673_v16 = vpack.c.bf16 %v4292_v12, %v4291_v19  ;;  %7687 = vmatprep.subr.bf16.mxu0 %v8561_v6  ;;  %v4142_v19 = vadd.f32 %v4140_v45, %v8967_v46 }
0x2eb3   :  { %7674 = vmatprep.subr.bf16.mxu1 %v7673_v16  ;;  %7245 = vmatmul.mubr.f32.vlgmr.msra.gmra.mrb[40].mxu0 %v8563_v14  ;;  %v6473_v32 = vmul.f32 -1.442695, %v4142_v19 }
0x2eb4   :  { %7676 = vmatpush3.bf16.msra.mxu1 %v7673_v16  ;;  %7689 = vmatpush3.bf16.msra.mxu0 %v9582_v47 }
0x2eb5   :  { %7678 = vmatprep.subr.bf16.mxu1 %v7677_v5  ;;  %7255 = vmatprep.mubr.msk.f32.mxu0 %vm8562_vm7, %v8563_v14 }
0x2eb6   :  { %7690 = vmatprep.subr.bf16.mxu0 %v8561_v6 }
0x2eb8   :  { %7680 = vmatpush3.bf16.msra.mxu1 %v7677_v5  ;;  %7692 = vmatpush3.bf16.msra.mxu0 %v9589_v35 }
0x2eb9   :  { %7693 = vmatprep.subr.bf16.mxu1 %v8561_v6  ;;  %7699 = vmatprep.subr.bf16.mxu0 %v8561_v6 }
0x2f07   :  { %v4270_v2 = vpop.permute.xlu1 %4269 }
0x2f08   :  { %v4272_v62 = vmul.f32 %v8068_v48, %v4270_v2  ;;  %v4227_v2 = vrot.slane %v9514_v55, 6 }
0x2f0a   :  { %4279 = vrot.lane.b32.xlu0 %v4272_v62, %s8564_s7 }
0x2f0b   :  { %v1194_v54 = vpop.permute.xlu1 %1193 }
0x2f0c   :  { %1197 = vst.msk [vmem:[#allocation2] sm:$0xc] %vm1196_vm10, %v1194_v54 }
0x2f0e   :  { %3401 = vrot.lane.b32.xlu0 %v9399_v18, %s8564_s7 }
0x2f0f   :  { %v1639_v50 = vpop.permute.xlu1 %1638 }
0x2f10   :  { %1642 = vst.msk [vmem:[#allocation2] sm:$0xc0] %vm1641_vm11, %v1639_v50 }
0x2f13   :  { %v2300_v8 = vpop.permute.xlu1 %2299 }
0x2f14   :  { %2302 = vst.msk [vmem:[#allocation2 + $0x8] sm:$0x30] %vm1420_vm9, %v2300_v8 }
0x2f15   :  { %2963 = vst.msk [vmem:[#allocation2 + $0x8] sm:$0x30] %vm1202_vm12, %v2961_v13 }
0x2f17   :  { %v3620_v63 = vpop.permute.xlu1 %3619 }
0x2f18   :  { %3622 = vst.msk [vmem:[#allocation2] sm:$0xc0] %vm981_vm13, %v3620_v63 }
0x2f1b   :  { %v4061_v15 = vpop.permute.xlu1 %4060 }
0x2f1c   :  { %4063 = vst.msk [vmem:[#allocation2] sm:$0xc] %vm1426_vm14, %v4061_v15 }
0x2f1f   :  { %v2742_v18 = vpop.permute.xlu1 %2741 }
0x2f20   :  { %2744 = vst.msk [vmem:[#allocation2 + $0x8] sm:$0xc0] %vm981_vm13, %v2742_v18 }
0x2f23   :  { %v3183_v11 = vpop.permute.xlu1 %3182 }
0x2f24   :  { %3185 = vst.msk [vmem:[#allocation2 + $0x8] sm:$0xc] %vm1426_vm14, %v3183_v11 }
0x2f7c   :  { %v4280_v40 = vpop.permute.xlu0 %4279 }
0x2f7d   :  { %4282 = vst.msk [vmem:[#allocation2] sm:$0x3] %vm1647_vm15, %v4280_v40 }
0x2f80   :  { %v3402_v29 = vpop.permute.xlu0 %3401 }
0x2f81   :  { %3404 = vst.msk [vmem:[#allocation2 + $0x8] sm:$0x3] %vm1647_vm15, %v3402_v29 }
0x2f84   :  { %v4283_v9 = vld [vmem:[#allocation2] sm:$0xff] }
0x2f85   :  { %7230 = vmatprep.mubr.msk.f32.mxu1 %vm4302_vm0, %v4283_v9 }
0x2f86   :  { %v4470_v34 = vpop.f32.mrb[40].mxu0 }
0x2f87   :  { %v7246_v1 = vpop.f32.mrb[41].mxu0 }
0x2f88   :  { %v4284_v53 = vld [vmem:[#allocation2 + $0x8] sm:$0xff] }
0x2f89   :  { %7231 = vmatmul.mubr.msk.f32.vlgmr.msra.gmra.mrb[40].mxu1 %vm4302_vm0, %v4284_v53 }
0x2f8a   :  { %7695 = vmatpush3.bf16.msra.mxu1 %v9582_v47 }
0x2f8b   :  { %7696 = vmatprep.subr.bf16.mxu1 %v8561_v6 }
0x2f8e   :  { %7698 = vmatpush3.bf16.msra.mxu1 %v9589_v35 }
0x2f8f   :  { %7705 = vmatprep.subr.bf16.mxu1 %v8561_v6 }
0x305c   :  { %v9622_v48 = vpop.f32.mrb[40].mxu1 }
0x305d   :  { %v4381_v7 = vpop.f32.mrb[41].mxu1 }
0x305e   :  { %v9625_v23 = vadd.f32 %v9620_v58, %v4381_v7 }
0x3060   :  { %v4474_v26 = vadd.f32 %v4470_v34, %v9625_v23 }
0x3062   :  { %8071 = vtanh.f32 %v4474_v26  ;;  %v6480_v24 = vmul.f32 -1.442695, %v4474_v26 }
0x3064   :  { %8073 = vpow2.f32 %v6480_v24 }
0x306c   :  { %v8072_v4 = vpop.eup %8071 }
0x306d   :  { %4484 = vrot.lane.b32.xlu1 %v8072_v4, %s8564_s7 }
0x306e   :  { %v8074_v10 = vpop.eup %8073 }
0x306f   :  { %v4478_v41 = vadd.f32 1.0, %v8074_v10 }
0x3071   :  { %8075 = vrcp.f32 %v4478_v41 }
0x307b   :  { %v8076_v44 = vpop.eup %8075 }
0x307c   :  { %v4482_v21 = vmul.f32 0.0, %v8076_v44 }
0x30df   :  { %v4485_v28 = vpop.permute.xlu1 %4484 }
0x30e0   :  { %v4487_v43 = vmul.f32 %v8076_v44, %v4485_v28 }
0x30e2   :  { %4489 = vrot.lane.b32.xlu0 %v4487_v43, %s8560_s17 }
0x3154   :  { %v4490_v60 = vpop.permute.xlu0 %4489 }
0x3155   :  { %v9631_v36 = vadd.f32 %v4490_v60, %v4482_v21 }
0x3157   :  { %8077 = vtanh.f32 %v9631_v36  ;;  %v4586_v1 = vrot.slane %v9631_v36, 6 }
0x3158   :  { %8079 = vtanh.f32 %v4142_v19 }
0x3159   :  { %8081 = vpow2.f32 %v6473_v32 }
0x3161   :  { %v8078_v12 = vpop.eup %8077 }
0x3162   :  { %4495 = vrot.lane.b32.xlu1 %v8078_v12, %s8564_s7  ;;  %v8080_v16 = vpop.eup %8079 }
0x3163   :  { %v8082_v51 = vpop.eup %8081 }
0x3164   :  { %v4222_v56 = vadd.f32 1.0, %v8082_v51 }
0x3166   :  { %4231 = vrot.lane.b32.xlu1 %v8080_v16, %s8564_s7  ;;  %8083 = vrcp.f32 %v4222_v56 }
0x3170   :  { %v9638_v5 = vpop.eup %8083 }
0x3171   :  { %v4229_v62 = vmul.f32 %v9638_v5, %v4227_v2 }
0x31d4   :  { %v4496_v30 = vpop.permute.xlu1 %4495 }
0x31d5   :  { %v4498_v49 = vmul.f32 %v8076_v44, %v4496_v30 }
0x31d7   :  { %4500 = vrot.lane.b32.xlu0 %v4498_v49, %s8560_s17 }
0x31d8   :  { %v4232_v46 = vpop.permute.xlu1 %4231 }
0x31d9   :  { %v4234_v52 = vmul.f32 %v9638_v5, %v4232_v46 }
0x31db   :  { %4236 = vrot.lane.b32.xlu1 %v4234_v52, %s8560_s17 }
0x3249   :  { %v4501_v0 = vpop.permute.xlu0 %4500 }
0x324a   :  { %7256 = vmatmul.mubr.msk.f32.vlgmr.msra.gmra.mrb[42].mxu0 %vm432_vm4, %v4501_v0 }
0x324b   :  { %7701 = vmatpush3.bf16.msra.mxu0 %v9582_v47  ;;  %7277 = vmatprep.mubr.msk.f32.mxu0 %vm8562_vm7, %v8563_v14 }
0x324c   :  { %7702 = vmatprep.subr.bf16.mxu0 %v8561_v6 }
0x324d   :  { %v4237_v54 = vpop.permute.xlu1 %4236 }
0x324e   :  { %v4239_v50 = vadd.f32 %v4237_v54, %v4229_v62 }
0x324f   :  { %7704 = vmatpush3.bf16.msra.mxu0 %v9589_v35 }
0x3250   :  { %8085 = vtanh.f32 %v4239_v50  ;;  %7711 = vmatprep.subr.bf16.mxu0 %v8561_v6 }
0x325a   :  { %v8086_v8 = vpop.eup %8085 }
0x325b   :  { %4242 = vrot.lane.b32.xlu1 %v8086_v8, %s8564_s7 }
0x325f   :  { %1863 = vrot.lane.b32.xlu1 %v9139_v31, %s8564_s7 }
0x3263   :  { %2304 = vrot.lane.b32.xlu1 %v9213_v22, %s8564_s7 }
0x3267   :  { %978 = vrot.lane.b32.xlu1 %v8990_v20, %s8564_s7 }
0x326b   :  { %1423 = vrot.lane.b32.xlu1 %v9063_v57, %s8564_s7 }
0x326f   :  { %2955 = vrot.lane.b32.xlu1 %v9340_v27, %s8560_s17 }
0x3273   :  { %3396 = vrot.lane.b32.xlu1 %v9416_v39, %s8560_s17 }
0x3277   :  { %4055 = vrot.lane.b32.xlu1 %v9521_v38, %s8560_s17 }
0x32cd   :  { %v4243_v55 = vpop.permute.xlu1 %4242 }
0x32ce   :  { %v4245_v10 = vmul.f32 %v9638_v5, %v4243_v55 }
0x32d1   :  { %v1864_v31 = vpop.permute.xlu1 %1863 }
0x32d2   :  { %1866 = vst.msk [vmem:[#allocation2 + $0x10] sm:$0xc0] %vm981_vm13, %v1864_v31 }
0x32d5   :  { %v2305_v22 = vpop.permute.xlu1 %2304 }
0x32d6   :  { %2307 = vst.msk [vmem:[#allocation2 + $0x10] sm:$0xc] %vm1426_vm14, %v2305_v22 }
0x32d9   :  { %v979_v20 = vpop.permute.xlu1 %978 }
0x32da   :  { %982 = vst.msk [vmem:[#allocation2 + $0x18] sm:$0xc0] %vm981_vm13, %v979_v20 }
0x32dd   :  { %v1424_v57 = vpop.permute.xlu1 %1423 }
0x32de   :  { %1427 = vst.msk [vmem:[#allocation2 + $0x18] sm:$0xc] %vm1426_vm14, %v1424_v57 }
0x32e1   :  { %v2956_v27 = vpop.permute.xlu1 %2955 }
0x32e2   :  { %2958 = vst.msk [vmem:[#allocation2 + $0x10] sm:$0xc] %vm1196_vm10, %v2956_v27 }
0x32e5   :  { %v3397_v39 = vpop.permute.xlu1 %3396 }
0x32e6   :  { %3399 = vst.msk [vmem:[#allocation2 + $0x10] sm:$0xc0] %vm1641_vm11, %v3397_v39 }
0x331d   :  { %v4570_v38 = vpop.f32.mrb[42].mxu0 }
0x331e   :  { %v4575_v13 = vrot.slane %v4570_v38, 6  ;;  %v7257_v63 = vpop.f32.mrb[43].mxu0 }
0x3320   :  { %v4577_v15 = vadd.f32 %v4575_v13, %v9625_v23 }
0x3322   :  { %8087 = vtanh.f32 %v4577_v15  ;;  %v6482_v11 = vmul.f32 -1.442695, %v4577_v15 }
0x3324   :  { %8089 = vpow2.f32 %v6482_v11 }
0x332c   :  { %v8088_v18 = vpop.eup %8087 }
0x332d   :  { %4590 = vrot.lane.b32.xlu0 %v8088_v18, %s8564_s7 }
0x332e   :  { %v8090_v40 = vpop.eup %8089 }
0x332f   :  { %v4581_v29 = vadd.f32 1.0, %v8090_v40 }
0x3331   :  { %8091 = vrcp.f32 %v4581_v29 }
0x333b   :  { %v8092_v9 = vpop.eup %8091 }
0x333c   :  { %v4588_v7 = vmul.f32 %v8092_v9, %v4586_v1 }
0x339f   :  { %v4591_v53 = vpop.permute.xlu0 %4590 }
0x33a0   :  { %v4593_v34 = vmul.f32 %v8092_v9, %v4591_v53 }
0x33a2   :  { %4595 = vrot.lane.b32.xlu0 %v4593_v34, %s8560_s17 }
0x3414   :  { %v4596_v26 = vpop.permute.xlu0 %4595 }
0x3415   :  { %v9676_v4 = vadd.f32 %v4596_v26, %v4588_v7 }
0x3417   :  { %8093 = vtanh.f32 %v9676_v4  ;;  %v4693_v0 = vrot.slane %v9676_v4, 6 }
0x3421   :  { %v8094_v24 = vpop.eup %8093 }
0x3422   :  { %4601 = vrot.lane.b32.xlu0 %v8094_v24, %s8564_s7  ;;  %v9752_v24 = vadd.f32 %v9622_v48, %v9620_v58 }
0x3426   :  { %2082 = vrot.lane.b32.xlu0 %v9175_v25, %s8564_s7 }
0x342a   :  { %2523 = vrot.lane.b32.xlu0 %v9251_v17, %s8564_s7 }
0x342e   :  { %1199 = vrot.lane.b32.xlu0 %v9025_v3, %s8564_s7 }
0x3432   :  { %1644 = vrot.lane.b32.xlu0 %v9101_v42, %s8564_s7 }
0x3436   :  { %3177 = vrot.lane.b32.xlu0 %v9378_v33, %s8560_s17  ;;  %v4056_v33 = vpop.permute.xlu1 %4055 }
0x343a   :  { %3833 = vrot.lane.b32.xlu0 %v9488_v61, %s8560_s17 }
0x343e   :  { %4274 = vrot.lane.b32.xlu0 %v4245_v10, %s8560_s17 }
0x3494   :  { %v4602_v25 = vpop.permute.xlu0 %4601 }
0x3495   :  { %v4604_v41 = vmul.f32 %v8092_v9, %v4602_v25 }
0x3497   :  { %v4606_v44 = vrot.slane %v4604_v41, 2 }
0x3498   :  { %v2083_v17 = vpop.permute.xlu0 %2082 }
0x3499   :  { %2085 = vst.msk [vmem:[#allocation2 + $0x10] sm:$0x30] %vm1202_vm12, %v2083_v17  ;;  %4607 = vrot.lane.b32.xlu1 %v4606_v44, %s8560_s17 }
0x349c   :  { %v2524_v3 = vpop.permute.xlu0 %2523 }
0x349d   :  { %2526 = vst.msk [vmem:[#allocation2 + $0x10] sm:$0x3] %vm1647_vm15, %v2524_v3 }
0x349e   :  { %2739 = vst.msk [vmem:[#allocation2 + $0x10] sm:$0x3] %vm975_vm8, %v9306_v37 }
0x34a0   :  { %v1200_v42 = vpop.permute.xlu0 %1199 }
0x34a1   :  { %1203 = vst.msk [vmem:[#allocation2 + $0x18] sm:$0x30] %vm1202_vm12, %v1200_v42 }
0x34a2   :  { %4058 = vst.msk [vmem:[#allocation2 + $0x18] sm:$0x30] %vm1420_vm9, %v4056_v33 }
0x34a4   :  { %v1645_v61 = vpop.permute.xlu0 %1644 }
0x34a5   :  { %1648 = vst.msk [vmem:[#allocation2 + $0x18] sm:$0x3] %vm1647_vm15, %v1645_v61 }
0x34a6   :  { %3617 = vst.msk [vmem:[#allocation2 + $0x18] sm:$0x3] %vm975_vm8, %v9454_v59 }
0x34a8   :  { %v3178_v28 = vpop.permute.xlu0 %3177 }
0x34a9   :  { %3180 = vst.msk [vmem:[#allocation2 + $0x10] sm:$0x30] %vm1420_vm9, %v3178_v28 }
0x34ac   :  { %v3834_v43 = vpop.permute.xlu0 %3833 }
0x34ad   :  { %3836 = vst.msk [vmem:[#allocation2 + $0x18] sm:$0xc] %vm1196_vm10, %v3834_v43 }
0x34b0   :  { %v4275_v45 = vpop.permute.xlu0 %4274  ;;  %v4285_v37 = vld [vmem:[#allocation2 + $0x10] sm:$0xff] }
0x34b1   :  { %4277 = vst.msk [vmem:[#allocation2 + $0x18] sm:$0xc0] %vm1641_vm11, %v4275_v45  ;;  %7233 = vmatprep.mubr.msk.f32.mxu1 %vm4302_vm0, %v4285_v37 }
0x34b8   :  { %v9708_v21 = vld [vmem:[#allocation2 + $0x18] sm:$0xff] }
0x34b9   :  { %7234 = vmatmul.mubr.msk.f32.gmra.mrb[42].mxu1 %vm4302_vm0, %v9708_v21 }
0x34ba   :  { %7266 = vmatprep.mubr.msk.f32.mxu1 %vm8562_vm7, %v8563_v14 }
0x350b   :  { %v4608_v59 = vpop.permute.xlu1 %4607 }
0x350c   :  { %7267 = vmatmul.mubr.msk.f32.vlgmr.msra.gmra.mrb[44].mxu1 %vm432_vm4, %v4608_v59 }
0x350d   :  { %7707 = vmatpush3.bf16.msra.mxu1 %v9582_v47  ;;  %7288 = vmatprep.mubr.msk.f32.mxu1 %vm8562_vm7, %v8563_v14 }
0x350e   :  { %7708 = vmatprep.subr.bf16.mxu1 %v8561_v6 }
0x3511   :  { %7710 = vmatpush3.bf16.msra.mxu1 %v9589_v35 }
0x3512   :  { %7717 = vmatprep.subr.bf16.mxu1 %v8561_v6 }
0x358c   :  { %v9721_v60 = vpop.f32.mrb[42].mxu1 }
0x358d   :  { %v9723_v36 = vpop.f32.mrb[43].mxu1 }
0x35df   :  { %v4677_v19 = vpop.f32.mrb[44].mxu1 }
0x35e0   :  { %v4682_v12 = vrot.slane %v4677_v19, 4  ;;  %v7268_v16 = vpop.f32.mrb[45].mxu1 }
0x35e2   :  { %v4684_v32 = vadd.f32 %v4682_v12, %v9625_v23 }
0x35e4   :  { %8095 = vtanh.f32 %v4684_v32  ;;  %v6484_v56 = vmul.f32 -1.442695, %v4684_v32 }
0x35e6   :  { %8097 = vpow2.f32 %v6484_v56 }
0x35ee   :  { %v8096_v51 = vpop.eup %8095 }
0x35ef   :  { %4697 = vrot.lane.b32.xlu0 %v8096_v51, %s8564_s7 }
0x35f0   :  { %v8098_v30 = vpop.eup %8097 }
0x35f1   :  { %v4688_v49 = vadd.f32 1.0, %v8098_v30 }
0x35f3   :  { %8099 = vrcp.f32 %v4688_v49 }
0x35fd   :  { %v8100_v5 = vpop.eup %8099 }
0x35fe   :  { %v4695_v2 = vmul.f32 %v8100_v5, %v4693_v0 }
0x3661   :  { %v4698_v46 = vpop.permute.xlu0 %4697 }
0x3662   :  { %v4700_v52 = vmul.f32 %v8100_v5, %v4698_v46 }
0x3664   :  { %4702 = vrot.lane.b32.xlu1 %v4700_v52, %s8560_s17 }
0x36d6   :  { %v4703_v62 = vpop.permute.xlu1 %4702 }
0x36d7   :  { %v4705_v54 = vadd.f32 %v4703_v62, %v4695_v2 }
0x36d9   :  { %8101 = vtanh.f32 %v4705_v54  ;;  %v4800_v29 = vrot.slane %v4705_v54, 6 }
0x36e3   :  { %v8102_v50 = vpop.eup %8101 }
0x36e4   :  { %4708 = vrot.lane.b32.xlu0 %v8102_v50, %s8564_s7 }
0x3756   :  { %v4709_v8 = vpop.permute.xlu0 %4708 }
0x3757   :  { %v4711_v55 = vmul.f32 %v8100_v5, %v4709_v8 }
0x3759   :  { %v4713_v31 = vrot.slane %v4711_v55, 4 }
0x375b   :  { %4714 = vrot.lane.b32.xlu1 %v4713_v31, %s8560_s17 }
0x37cd   :  { %v4715_v22 = vpop.permute.xlu1 %4714 }
0x37ce   :  { %7278 = vmatmul.mubr.msk.f32.vlgmr.msra.gmra.mrb[44].mxu0 %vm432_vm4, %v4715_v22 }
0x37cf   :  { %7713 = vmatpush3.bf16.msra.mxu0 %v9582_v47  ;;  %7299 = vmatprep.mubr.msk.f32.mxu0 %vm8562_vm7, %v8563_v14 }
0x37d0   :  { %7714 = vmatprep.subr.bf16.mxu0 %v8561_v6 }
0x37d3   :  { %7716 = vmatpush3.bf16.msra.mxu0 %v9589_v35 }
0x37d4   :  { %7723 = vmatprep.subr.bf16.mxu0 %v8561_v6 }
0x38a1   :  { %v4784_v20 = vpop.f32.mrb[44].mxu0 }
0x38a2   :  { %v4789_v57 = vrot.slane %v4784_v20, 2  ;;  %v7279_v27 = vpop.f32.mrb[45].mxu0 }
0x38a4   :  { %v4791_v39 = vadd.f32 %v4789_v57, %v9625_v23 }
0x38a6   :  { %8103 = vtanh.f32 %v4791_v39  ;;  %v6486_v13 = vmul.f32 -1.442695, %v4791_v39 }
0x38a8   :  { %8105 = vpow2.f32 %v6486_v13 }
0x38b0   :  { %v8104_v38 = vpop.eup %8103 }
0x38b1   :  { %4804 = vrot.lane.b32.xlu0 %v8104_v38, %s8564_s7 }
0x38b2   :  { %v8106_v63 = vpop.eup %8105 }
0x38b3   :  { %v4795_v15 = vadd.f32 1.0, %v8106_v63 }
0x38b5   :  { %8107 = vrcp.f32 %v4795_v15 }
0x38bf   :  { %v8108_v18 = vpop.eup %8107 }
0x38c0   :  { %v4802_v9 = vmul.f32 %v8108_v18, %v4800_v29 }
0x3923   :  { %v4805_v11 = vpop.permute.xlu0 %4804 }
0x3924   :  { %v4807_v40 = vmul.f32 %v8108_v18, %v4805_v11 }
0x3926   :  { %4809 = vrot.lane.b32.xlu1 %v4807_v40, %s8560_s17 }
0x3998   :  { %v4810_v53 = vpop.permute.xlu1 %4809 }
0x3999   :  { %v4812_v34 = vadd.f32 %v4810_v53, %v4802_v9 }
0x399b   :  { %8109 = vtanh.f32 %v4812_v34  ;;  %v4904_v48 = vrot.slane %v4812_v34, 6 }
0x39a5   :  { %v8110_v23 = vpop.eup %8109 }
0x39a6   :  { %4815 = vrot.lane.b32.xlu0 %v8110_v23, %s8564_s7 }
0x3a18   :  { %v4816_v1 = vpop.permute.xlu0 %4815 }
0x3a19   :  { %v4818_v7 = vmul.f32 %v8108_v18, %v4816_v1 }
0x3a1b   :  { %v4820_v26 = vrot.slane %v4818_v7, 6 }
0x3a1d   :  { %4821 = vrot.lane.b32.xlu1 %v4820_v26, %s8560_s17 }
0x3a8f   :  { %v4822_v4 = vpop.permute.xlu1 %4821 }
0x3a90   :  { %7289 = vmatmul.mubr.msk.f32.vlgmr.msra.gmra.mrb[46].mxu1 %vm432_vm4, %v4822_v4 }
0x3a91   :  { %7719 = vmatpush3.bf16.msra.mxu1 %v9582_v47  ;;  %7310 = vmatprep.mubr.msk.f32.mxu1 %vm8562_vm7, %v8563_v14 }
0x3a92   :  { %7720 = vmatprep.subr.bf16.mxu1 %v8561_v6 }
0x3a95   :  { %7722 = vmatpush3.bf16.msra.mxu1 %v9589_v35 }
0x3a96   :  { %7729 = vmatprep.subr.bf16.mxu1 %v8561_v6 }
0x3b63   :  { %v4891_v10 = vpop.f32.mrb[46].mxu1 }
0x3b64   :  { %v4895_v25 = vadd.f32 %v4891_v10, %v9752_v24  ;;  %v7290_v41 = vpop.f32.mrb[47].mxu1 }
0x3b66   :  { %8111 = vtanh.f32 %v4895_v25  ;;  %v6488_v17 = vmul.f32 -1.442695, %v4895_v25 }
0x3b68   :  { %8113 = vpow2.f32 %v6488_v17 }
0x3b70   :  { %v8112_v44 = vpop.eup %8111 }
0x3b71   :  { %4908 = vrot.lane.b32.xlu0 %v8112_v44, %s8564_s7 }
0x3b72   :  { %v8114_v3 = vpop.eup %8113 }
0x3b73   :  { %v4899_v42 = vadd.f32 1.0, %v8114_v3 }
0x3b75   :  { %8115 = vrcp.f32 %v4899_v42 }
0x3b7f   :  { %v8116_v33 = vpop.eup %8115 }
0x3b80   :  { %v4906_v43 = vmul.f32 %v8116_v33, %v4904_v48 }
0x3be3   :  { %v4909_v61 = vpop.permute.xlu0 %4908 }
0x3be4   :  { %v4911_v28 = vmul.f32 %v8116_v33, %v4909_v61 }
0x3be6   :  { %4913 = vrot.lane.b32.xlu1 %v4911_v28, %s8560_s17 }
0x3c58   :  { %v4914_v45 = vpop.permute.xlu1 %4913 }
0x3c59   :  { %v4916_v37 = vadd.f32 %v4914_v45, %v4906_v43 }
0x3c5b   :  { %8117 = vtanh.f32 %v4916_v37  ;;  %v5010_v54 = vrot.slane %v4916_v37, 6 }
0x3c65   :  { %v8118_v59 = vpop.eup %8117 }
0x3c66   :  { %4919 = vrot.lane.b32.xlu0 %v8118_v59, %s8564_s7 }
0x3cd8   :  { %v4920_v19 = vpop.permute.xlu0 %4919 }
0x3cd9   :  { %v4922_v12 = vmul.f32 %v8116_v33, %v4920_v19 }
0x3cdb   :  { %4924 = vrot.lane.b32.xlu1 %v4922_v12, %s8560_s17 }
0x3d4d   :  { %v4925_v16 = vpop.permute.xlu1 %4924 }
0x3d4e   :  { %7300 = vmatmul.mubr.msk.f32.vlgmr.msra.gmra.mrb[46].mxu0 %vm432_vm4, %v4925_v16 }
0x3d4f   :  { %7725 = vmatpush3.bf16.msra.mxu0 %v9582_v47  ;;  %7321 = vmatprep.mubr.msk.f32.mxu0 %vm8562_vm7, %v8563_v14 }
0x3d50   :  { %7726 = vmatprep.subr.bf16.mxu0 %v8561_v6 }
0x3d53   :  { %7728 = vmatpush3.bf16.msra.mxu0 %v9589_v35 }
0x3d54   :  { %7735 = vmatprep.subr.bf16.mxu0 %v8561_v6 }
0x3e21   :  { %v4994_v32 = vpop.f32.mrb[46].mxu0 }
0x3e22   :  { %v4999_v51 = vrot.slane %v4994_v32, 6  ;;  %v7301_v56 = vpop.f32.mrb[47].mxu0 }
0x3e24   :  { %v5001_v30 = vadd.f32 %v4999_v51, %v9752_v24 }
0x3e26   :  { %8119 = vtanh.f32 %v5001_v30  ;;  %v6490_v5 = vmul.f32 -1.442695, %v5001_v30 }
0x3e28   :  { %8121 = vpow2.f32 %v6490_v5 }
0x3e30   :  { %v8120_v49 = vpop.eup %8119 }
0x3e31   :  { %5014 = vrot.lane.b32.xlu0 %v8120_v49, %s8564_s7  ;;  %v9804_v49 = vadd.f32 %v9620_v58, %v9723_v36 }
0x3e32   :  { %v8122_v46 = vpop.eup %8121 }
0x3e33   :  { %v5005_v52 = vadd.f32 1.0, %v8122_v46 }
0x3e35   :  { %8123 = vrcp.f32 %v5005_v52 }
0x3e3f   :  { %v8124_v0 = vpop.eup %8123 }
0x3e40   :  { %v5012_v50 = vmul.f32 %v8124_v0, %v5010_v54 }
0x3ea3   :  { %v5015_v2 = vpop.permute.xlu0 %5014 }
0x3ea4   :  { %v5017_v62 = vmul.f32 %v8124_v0, %v5015_v2 }
0x3ea6   :  { %5019 = vrot.lane.b32.xlu1 %v5017_v62, %s8560_s17 }
0x3f18   :  { %v5020_v8 = vpop.permute.xlu1 %5019 }
0x3f19   :  { %v5022_v55 = vadd.f32 %v5020_v8, %v5012_v50 }
0x3f1b   :  { %8125 = vtanh.f32 %v5022_v55  ;;  %v5117_v34 = vrot.slane %v5022_v55, 6 }
0x3f25   :  { %v8126_v31 = vpop.eup %8125 }
0x3f26   :  { %5025 = vrot.lane.b32.xlu0 %v8126_v31, %s8564_s7 }
0x3f98   :  { %v5026_v22 = vpop.permute.xlu0 %5025 }
0x3f99   :  { %v5028_v20 = vmul.f32 %v8124_v0, %v5026_v22 }
0x3f9b   :  { %v5030_v57 = vrot.slane %v5028_v20, 2 }
0x3f9d   :  { %5031 = vrot.lane.b32.xlu1 %v5030_v57, %s8560_s17 }
0x400f   :  { %v5032_v27 = vpop.permute.xlu1 %5031 }
0x4010   :  { %7311 = vmatmul.mubr.msk.f32.vlgmr.msra.gmra.mrb[48].mxu1 %vm432_vm4, %v5032_v27 }
0x4011   :  { %7731 = vmatpush3.bf16.msra.mxu1 %v9582_v47  ;;  %7332 = vmatprep.mubr.msk.f32.mxu1 %vm8562_vm7, %v8563_v14 }
0x4012   :  { %7732 = vmatprep.subr.bf16.mxu1 %v8561_v6 }
0x4015   :  { %7734 = vmatpush3.bf16.msra.mxu1 %v9589_v35 }
0x4016   :  { %7741 = vmatprep.subr.bf16.mxu1 %v8561_v6 }
0x40e3   :  { %v5101_v39 = vpop.f32.mrb[48].mxu1 }
0x40e4   :  { %v5106_v38 = vrot.slane %v5101_v39, 4  ;;  %v7312_v13 = vpop.f32.mrb[49].mxu1 }
0x40e6   :  { %v5108_v63 = vadd.f32 %v5106_v38, %v9752_v24 }
0x40e8   :  { %8127 = vtanh.f32 %v5108_v63  ;;  %v6492_v18 = vmul.f32 -1.442695, %v5108_v63 }
0x40ea   :  { %8129 = vpow2.f32 %v6492_v18 }
0x40f2   :  { %v8128_v15 = vpop.eup %8127 }
0x40f3   :  { %5121 = vrot.lane.b32.xlu0 %v8128_v15, %s8564_s7 }
0x40f4   :  { %v8130_v11 = vpop.eup %8129 }
0x40f5   :  { %v5112_v40 = vadd.f32 1.0, %v8130_v11 }
0x40f7   :  { %8131 = vrcp.f32 %v5112_v40 }
0x4101   :  { %v8132_v29 = vpop.eup %8131 }
0x4102   :  { %v5119_v23 = vmul.f32 %v8132_v29, %v5117_v34 }
0x4165   :  { %v5122_v9 = vpop.permute.xlu0 %5121 }
0x4166   :  { %v5124_v53 = vmul.f32 %v8132_v29, %v5122_v9 }
0x4168   :  { %5126 = vrot.lane.b32.xlu1 %v5124_v53, %s8560_s17 }
0x41da   :  { %v5127_v1 = vpop.permute.xlu1 %5126 }
0x41db   :  { %v5129_v7 = vadd.f32 %v5127_v1, %v5119_v23 }
0x41dd   :  { %8133 = vtanh.f32 %v5129_v7  ;;  %v5224_v59 = vrot.slane %v5129_v7, 6 }
0x41e7   :  { %v8134_v26 = vpop.eup %8133 }
0x41e8   :  { %5132 = vrot.lane.b32.xlu0 %v8134_v26, %s8564_s7 }
0x425a   :  { %v5133_v4 = vpop.permute.xlu0 %5132 }
0x425b   :  { %v5135_v10 = vmul.f32 %v8132_v29, %v5133_v4 }
0x425d   :  { %v5137_v25 = vrot.slane %v5135_v10, 4 }
0x425f   :  { %5138 = vrot.lane.b32.xlu1 %v5137_v25, %s8560_s17 }
0x42d1   :  { %v5139_v41 = vpop.permute.xlu1 %5138 }
0x42d2   :  { %7322 = vmatmul.mubr.msk.f32.vlgmr.msra.gmra.mrb[48].mxu0 %vm432_vm4, %v5139_v41 }
0x42d3   :  { %7737 = vmatpush3.bf16.msra.mxu0 %v9582_v47  ;;  %7343 = vmatprep.mubr.msk.f32.mxu0 %vm8562_vm7, %v8563_v14 }
0x42d4   :  { %7738 = vmatprep.subr.bf16.mxu0 %v8561_v6 }
0x42d7   :  { %7740 = vmatpush3.bf16.msra.mxu0 %v9589_v35 }
0x42d8   :  { %7747 = vmatprep.subr.bf16.mxu0 %v8561_v6 }
0x43a5   :  { %v5208_v44 = vpop.f32.mrb[48].mxu0 }
0x43a6   :  { %v5213_v17 = vrot.slane %v5208_v44, 2  ;;  %v7323_v3 = vpop.f32.mrb[49].mxu0 }
0x43a8   :  { %v5215_v42 = vadd.f32 %v5213_v17, %v9752_v24 }
0x43aa   :  { %8135 = vtanh.f32 %v5215_v42  ;;  %v6494_v61 = vmul.f32 -1.442695, %v5215_v42 }
0x43ac   :  { %8137 = vpow2.f32 %v6494_v61 }
0x43b4   :  { %v8136_v33 = vpop.eup %8135 }
0x43b5   :  { %5228 = vrot.lane.b32.xlu0 %v8136_v33, %s8564_s7 }
0x43b6   :  { %v8138_v28 = vpop.eup %8137 }
0x43b7   :  { %v5219_v48 = vadd.f32 1.0, %v8138_v28 }
0x43b9   :  { %8139 = vrcp.f32 %v5219_v48 }
0x43c3   :  { %v8140_v43 = vpop.eup %8139 }
0x43c4   :  { %v5226_v19 = vmul.f32 %v8140_v43, %v5224_v59 }
0x4427   :  { %v5229_v45 = vpop.permute.xlu0 %5228 }
0x4428   :  { %v5231_v37 = vmul.f32 %v8140_v43, %v5229_v45 }
0x442a   :  { %5233 = vrot.lane.b32.xlu1 %v5231_v37, %s8560_s17 }
0x449c   :  { %v5234_v12 = vpop.permute.xlu1 %5233 }
0x449d   :  { %v5236_v16 = vadd.f32 %v5234_v12, %v5226_v19 }
0x449f   :  { %8141 = vtanh.f32 %v5236_v16  ;;  %v5328_v36 = vrot.slane %v5236_v16, 6 }
0x44a9   :  { %v8142_v24 = vpop.eup %8141 }
0x44aa   :  { %5239 = vrot.lane.b32.xlu0 %v8142_v24, %s8564_s7 }
0x451c   :  { %v5240_v32 = vpop.permute.xlu0 %5239 }
0x451d   :  { %v5242_v51 = vmul.f32 %v8140_v43, %v5240_v32 }
0x451f   :  { %v5244_v56 = vrot.slane %v5242_v51, 6 }
0x4521   :  { %5245 = vrot.lane.b32.xlu1 %v5244_v56, %s8560_s17 }
0x4593   :  { %v5246_v30 = vpop.permute.xlu1 %5245 }
0x4594   :  { %7333 = vmatmul.mubr.msk.f32.vlgmr.msra.gmra.mrb[50].mxu1 %vm432_vm4, %v5246_v30 }
0x4595   :  { %7743 = vmatpush3.bf16.msra.mxu1 %v9582_v47  ;;  %7354 = vmatprep.mubr.msk.f32.mxu1 %vm8562_vm7, %v8563_v14 }
0x4596   :  { %7744 = vmatprep.subr.bf16.mxu1 %v8561_v6 }
0x4599   :  { %7746 = vmatpush3.bf16.msra.mxu1 %v9589_v35 }
0x459a   :  { %7753 = vmatprep.subr.bf16.mxu1 %v8561_v6 }
0x4667   :  { %v5315_v5 = vpop.f32.mrb[50].mxu1 }
0x4668   :  { %v5319_v46 = vadd.f32 %v5315_v5, %v9804_v49  ;;  %v7334_v52 = vpop.f32.mrb[51].mxu1 }
0x466a   :  { %8143 = vtanh.f32 %v5319_v46  ;;  %v6496_v2 = vmul.f32 -1.442695, %v5319_v46 }
0x466c   :  { %8145 = vpow2.f32 %v6496_v2 }
0x4674   :  { %v8144_v0 = vpop.eup %8143 }
0x4675   :  { %5332 = vrot.lane.b32.xlu0 %v8144_v0, %s8564_s7 }
0x4676   :  { %v8146_v62 = vpop.eup %8145 }
0x4677   :  { %v5323_v54 = vadd.f32 1.0, %v8146_v62 }
0x4679   :  { %8147 = vrcp.f32 %v5323_v54 }
0x4683   :  { %v8148_v50 = vpop.eup %8147 }
0x4684   :  { %v5330_v31 = vmul.f32 %v8148_v50, %v5328_v36 }
0x46e7   :  { %v5333_v8 = vpop.permute.xlu0 %5332 }
0x46e8   :  { %v5335_v55 = vmul.f32 %v8148_v50, %v5333_v8 }
0x46ea   :  { %5337 = vrot.lane.b32.xlu1 %v5335_v55, %s8560_s17 }
0x475c   :  { %v5338_v22 = vpop.permute.xlu1 %5337 }
0x475d   :  { %v5340_v20 = vadd.f32 %v5338_v22, %v5330_v31 }
0x475f   :  { %8149 = vtanh.f32 %v5340_v20  ;;  %v5434_v1 = vrot.slane %v5340_v20, 6 }
0x4769   :  { %v8150_v57 = vpop.eup %8149 }
0x476a   :  { %5343 = vrot.lane.b32.xlu0 %v8150_v57, %s8564_s7 }
0x47dc   :  { %v5344_v27 = vpop.permute.xlu0 %5343 }
0x47dd   :  { %v5346_v39 = vmul.f32 %v8148_v50, %v5344_v27 }
0x47df   :  { %5348 = vrot.lane.b32.xlu1 %v5346_v39, %s8560_s17 }
0x4851   :  { %v5349_v38 = vpop.permute.xlu1 %5348 }
0x4852   :  { %7344 = vmatmul.mubr.msk.f32.vlgmr.msra.gmra.mrb[50].mxu0 %vm432_vm4, %v5349_v38 }
0x4853   :  { %7749 = vmatpush3.bf16.msra.mxu0 %v9582_v47  ;;  %7365 = vmatprep.mubr.msk.f32.mxu0 %vm8562_vm7, %v8563_v14 }
0x4854   :  { %7750 = vmatprep.subr.bf16.mxu0 %v8561_v6 }
0x4857   :  { %7752 = vmatpush3.bf16.msra.mxu0 %v9589_v35 }
0x4858   :  { %7759 = vmatprep.subr.bf16.mxu0 %v8561_v6 }
0x4925   :  { %v5418_v13 = vpop.f32.mrb[50].mxu0 }
0x4926   :  { %v5423_v63 = vrot.slane %v5418_v13, 6  ;;  %v7345_v15 = vpop.f32.mrb[51].mxu0 }
0x4928   :  { %v5425_v18 = vadd.f32 %v5423_v63, %v9804_v49 }
0x492a   :  { %8151 = vtanh.f32 %v5425_v18  ;;  %v6498_v40 = vmul.f32 -1.442695, %v5425_v18  ;;  %v9856_v18 = vadd.f32 %v9721_v60, %v9620_v58 }
0x492c   :  { %8153 = vpow2.f32 %v6498_v40 }
0x4934   :  { %v8152_v11 = vpop.eup %8151 }
0x4935   :  { %5438 = vrot.lane.b32.xlu0 %v8152_v11, %s8564_s7 }
0x4936   :  { %v8154_v29 = vpop.eup %8153 }
0x4937   :  { %v5429_v9 = vadd.f32 1.0, %v8154_v29 }
0x4939   :  { %8155 = vrcp.f32 %v5429_v9 }
0x4943   :  { %v8156_v53 = vpop.eup %8155 }
0x4944   :  { %v5436_v7 = vmul.f32 %v8156_v53, %v5434_v1 }
0x49a7   :  { %v5439_v34 = vpop.permute.xlu0 %5438 }
0x49a8   :  { %v5441_v23 = vmul.f32 %v8156_v53, %v5439_v34 }
0x49aa   :  { %5443 = vrot.lane.b32.xlu1 %v5441_v23, %s8560_s17 }
0x4a1c   :  { %v5444_v26 = vpop.permute.xlu1 %5443 }
0x4a1d   :  { %v5446_v4 = vadd.f32 %v5444_v26, %v5436_v7 }
0x4a1f   :  { %8157 = vtanh.f32 %v5446_v4  ;;  %v5541_v12 = vrot.slane %v5446_v4, 6 }
0x4a29   :  { %v8158_v10 = vpop.eup %8157 }
0x4a2a   :  { %5449 = vrot.lane.b32.xlu0 %v8158_v10, %s8564_s7 }
0x4a9c   :  { %v5450_v25 = vpop.permute.xlu0 %5449 }
0x4a9d   :  { %v5452_v41 = vmul.f32 %v8156_v53, %v5450_v25 }
0x4a9f   :  { %v5454_v44 = vrot.slane %v5452_v41, 2 }
0x4aa1   :  { %5455 = vrot.lane.b32.xlu1 %v5454_v44, %s8560_s17 }
0x4b13   :  { %v5456_v17 = vpop.permute.xlu1 %5455 }
0x4b14   :  { %7355 = vmatmul.mubr.msk.f32.vlgmr.msra.gmra.mrb[52].mxu1 %vm432_vm4, %v5456_v17 }
0x4b15   :  { %7755 = vmatpush3.bf16.msra.mxu1 %v9582_v47  ;;  %7376 = vmatprep.mubr.msk.f32.mxu1 %vm8562_vm7, %v8563_v14 }
0x4b16   :  { %7756 = vmatprep.subr.bf16.mxu1 %v8561_v6 }
0x4b19   :  { %7758 = vmatpush3.bf16.msra.mxu1 %v9589_v35 }
0x4b1a   :  { %7765 = vmatprep.subr.bf16.mxu1 %v8561_v6 }
0x4be7   :  { %v5525_v3 = vpop.f32.mrb[52].mxu1 }
0x4be8   :  { %v5530_v42 = vrot.slane %v5525_v3, 4  ;;  %v7356_v33 = vpop.f32.mrb[53].mxu1 }
0x4bea   :  { %v5532_v61 = vadd.f32 %v5530_v42, %v9804_v49 }
0x4bec   :  { %8159 = vtanh.f32 %v5532_v61  ;;  %v6500_v48 = vmul.f32 -1.442695, %v5532_v61 }
0x4bee   :  { %8161 = vpow2.f32 %v6500_v48 }
0x4bf6   :  { %v8160_v28 = vpop.eup %8159 }
0x4bf7   :  { %5545 = vrot.lane.b32.xlu0 %v8160_v28, %s8564_s7 }
0x4bf8   :  { %v8162_v43 = vpop.eup %8161 }
0x4bf9   :  { %v5536_v45 = vadd.f32 1.0, %v8162_v43 }
0x4bfb   :  { %8163 = vrcp.f32 %v5536_v45 }
0x4c05   :  { %v8164_v37 = vpop.eup %8163 }
0x4c06   :  { %v5543_v16 = vmul.f32 %v8164_v37, %v5541_v12 }
0x4c69   :  { %v5546_v59 = vpop.permute.xlu0 %5545 }
0x4c6a   :  { %v5548_v19 = vmul.f32 %v8164_v37, %v5546_v59 }
0x4c6c   :  { %5550 = vrot.lane.b32.xlu1 %v5548_v19, %s8560_s17 }
0x4cde   :  { %v5551_v24 = vpop.permute.xlu1 %5550 }
0x4cdf   :  { %v5553_v32 = vadd.f32 %v5551_v24, %v5543_v16 }
0x4ce1   :  { %8165 = vtanh.f32 %v5553_v32  ;;  %v5648_v20 = vrot.slane %v5553_v32, 6 }
0x4ceb   :  { %v8166_v51 = vpop.eup %8165 }
0x4cec   :  { %5556 = vrot.lane.b32.xlu0 %v8166_v51, %s8564_s7 }
0x4d5e   :  { %v5557_v56 = vpop.permute.xlu0 %5556 }
0x4d5f   :  { %v5559_v30 = vmul.f32 %v8164_v37, %v5557_v56 }
0x4d61   :  { %v5561_v5 = vrot.slane %v5559_v30, 4  ;;  %v6091_v30 = vld [vmem:[%s9978_s16] sm:$0xff] }
0x4d63   :  { %5562 = vrot.lane.b32.xlu1 %v5561_v5, %s8560_s17  ;;  %v6092_v5 = vld [vmem:[%s9978_s16 + $0x8] sm:$0xff] }
0x4dd5   :  { %v5563_v46 = vpop.permute.xlu1 %5562 }
0x4dd6   :  { %7366 = vmatmul.mubr.msk.f32.vlgmr.msra.gmra.mrb[52].mxu0 %vm432_vm4, %v5563_v46  ;;  %v7778_v46 = vpack.c.bf16 %v6092_v5, %v6091_v30 }
0x4dd7   :  { %7761 = vmatpush3.bf16.msra.mxu0 %v9582_v47  ;;  %7387 = vmatprep.mubr.msk.f32.mxu0 %vm8562_vm7, %v8563_v14 }
0x4dd8   :  { %7762 = vmatprep.subr.bf16.mxu0 %v8561_v6 }
0x4ddb   :  { %7764 = vmatpush3.bf16.msra.mxu0 %v9589_v35 }
0x4ddc   :  { %7771 = vmatprep.subr.bf16.mxu0 %v8561_v6 }
0x4ea9   :  { %v5632_v52 = vpop.f32.mrb[52].mxu0 }
0x4eaa   :  { %v5637_v0 = vrot.slane %v5632_v52, 2  ;;  %v7367_v2 = vpop.f32.mrb[53].mxu0  ;;  %v6093_v52 = vld [vmem:[%s9978_s16 + $0x10] sm:$0xff] }
0x4eac   :  { %v5639_v62 = vadd.f32 %v5637_v0, %v9804_v49  ;;  %v6094_v0 = vld [vmem:[%s9978_s16 + $0x18] sm:$0xff] }
0x4eae   :  { %8167 = vtanh.f32 %v5639_v62  ;;  %v6502_v50 = vmul.f32 -1.442695, %v5639_v62  ;;  %v7781_v62 = vpack.c.bf16 %v6094_v0, %v6093_v52 }
0x4eb0   :  { %8169 = vpow2.f32 %v6502_v50  ;;  %v6096_v50 = vld [vmem:[%s9978_s16 + $0x28] sm:$0xff] }
0x4eb8   :  { %v8168_v54 = vpop.eup %8167 }
0x4eb9   :  { %5652 = vrot.lane.b32.xlu0 %v8168_v54, %s8564_s7  ;;  %v6095_v54 = vld [vmem:[%s9978_s16 + $0x20] sm:$0xff] }
0x4eba   :  { %v8170_v8 = vpop.eup %8169 }
0x4ebb   :  { %v5643_v55 = vadd.f32 1.0, %v8170_v8  ;;  %v7784_v8 = vpack.c.bf16 %v6096_v50, %v6095_v54 }
0x4ebd   :  { %8171 = vrcp.f32 %v5643_v55  ;;  %v6097_v55 = vld [vmem:[%s9978_s16 + $0x30] sm:$0xff] }
0x4ec7   :  { %v8172_v36 = vpop.eup %8171 }
0x4ec8   :  { %v5650_v57 = vmul.f32 %v8172_v36, %v5648_v20 }
0x4f2b   :  { %v5653_v31 = vpop.permute.xlu0 %5652 }
0x4f2c   :  { %v5655_v22 = vmul.f32 %v8172_v36, %v5653_v31 }
0x4f2e   :  { %5657 = vrot.lane.b32.xlu1 %v5655_v22, %s8560_s17  ;;  %v6106_v22 = vrot.slane %v9708_v21, 6 }
0x4fa0   :  { %v5658_v27 = vpop.permute.xlu1 %5657 }
0x4fa1   :  { %v5660_v39 = vadd.f32 %v5658_v27, %v5650_v57 }
0x4fa3   :  { %8173 = vtanh.f32 %v5660_v39  ;;  %v5752_v58 = vrot.slane %v5660_v39, 6 }
0x4fad   :  { %v8174_v49 = vpop.eup %8173 }
0x4fae   :  { %5663 = vrot.lane.b32.xlu0 %v8174_v49, %s8564_s7 }
0x5020   :  { %v5664_v38 = vpop.permute.xlu0 %5663 }
0x5021   :  { %v5666_v13 = vmul.f32 %v8172_v36, %v5664_v38  ;;  %v6098_v36 = vld [vmem:[%s9978_s16 + $0x38] sm:$0xff] }
0x5022   :  { %v7787_v31 = vpack.c.bf16 %v6098_v36, %v6097_v55 }
0x5023   :  { %v5668_v63 = vrot.slane %v5666_v13, 6 }
0x5025   :  { %5669 = vrot.lane.b32.xlu1 %v5668_v63, %s8560_s17 }
0x5097   :  { %v5670_v15 = vpop.permute.xlu1 %5669 }
0x5098   :  { %7377 = vmatmul.mubr.msk.f32.vlgmr.msra.gmra.mrb[54].mxu1 %vm432_vm4, %v5670_v15 }
0x5099   :  { %7767 = vmatpush3.bf16.msra.mxu1 %v9582_v47  ;;  %7398 = vmatprep.mubr.msk.f32.mxu1 %vm8562_vm7, %v8563_v14 }
0x509a   :  { %7768 = vmatprep.subr.bf16.mxu1 %v8561_v6 }
0x509d   :  { %7770 = vmatpush3.bf16.msra.mxu1 %v9589_v35 }
0x509e   :  { %7777 = vmatprep.subr.bf16.mxu1 %v8561_v6 }
0x516b   :  { %v5739_v11 = vpop.f32.mrb[54].mxu1 }
0x516c   :  { %v5743_v40 = vadd.f32 %v5739_v11, %v9856_v18  ;;  %v7378_v29 = vpop.f32.mrb[55].mxu1 }
0x516e   :  { %8175 = vtanh.f32 %v5743_v40  ;;  %v6504_v53 = vmul.f32 -1.442695, %v5743_v40 }
0x5170   :  { %8177 = vpow2.f32 %v6504_v53 }
0x5178   :  { %v8176_v9 = vpop.eup %8175 }
0x5179   :  { %5756 = vrot.lane.b32.xlu0 %v8176_v9, %s8564_s7 }
0x517a   :  { %v8178_v34 = vpop.eup %8177 }
0x517b   :  { %v5747_v23 = vadd.f32 1.0, %v8178_v34  ;;  %v6511_v34 = vld [vmem:[#allocation24] ss:$0 sm:$0xff] }
0x517d   :  { %8179 = vrcp.f32 %v5747_v23 }
0x5187   :  { %v8180_v1 = vpop.eup %8179 }
0x5188   :  { %v5754_v60 = vmul.f32 %v8180_v1, %v5752_v58 }
0x51eb   :  { %v5757_v7 = vpop.permute.xlu0 %5756 }
0x51ec   :  { %v5759_v26 = vmul.f32 %v8180_v1, %v5757_v7 }
0x51ee   :  { %5761 = vrot.lane.b32.xlu1 %v5759_v26, %s8560_s17 }
0x5260   :  { %v5762_v4 = vpop.permute.xlu1 %5761 }
0x5261   :  { %v5764_v10 = vadd.f32 %v5762_v4, %v5754_v60 }
0x5263   :  { %8181 = vtanh.f32 %v5764_v10 }
0x526d   :  { %v8182_v25 = vpop.eup %8181 }
0x526e   :  { %5767 = vrot.lane.b32.xlu0 %v8182_v25, %s8564_s7 }
0x52e0   :  { %v5768_v41 = vpop.permute.xlu0 %5767 }
0x52e1   :  { %v5770_v44 = vmul.f32 %v8180_v1, %v5768_v41 }
0x52e3   :  { %5772 = vrot.lane.b32.xlu1 %v5770_v44, %s8560_s17 }
0x5355   :  { %v5773_v17 = vpop.permute.xlu1 %5772 }
0x5356   :  { %7388 = vmatmul.mubr.msk.f32.vlgmr.msra.gmra.mrb[54].mxu0 %vm432_vm4, %v5773_v17 }
0x5357   :  { %7773 = vmatpush3.bf16.msra.mxu0 %v9582_v47  ;;  %7409 = vmatprep.mubr.msk.f32.mxu0 %vm8562_vm7, %v8563_v14 }
0x5358   :  { %7774 = vmatprep.subr.bf16.mxu0 %v8561_v6 }
0x535b   :  { %7776 = vmatpush3.bf16.msra.mxu0 %v9589_v35  ;;  %v5858_v35 = vrot.slane %v5764_v10, 6 }
0x535c   :  { %7789 = vmatprep.subr.bf16.mxu0 %v8561_v6 }
0x5429   :  { %v5842_v3 = vpop.f32.mrb[54].mxu0 }
0x542a   :  { %v5847_v42 = vrot.slane %v5842_v3, 6  ;;  %v7389_v33 = vpop.f32.mrb[55].mxu0 }
0x542c   :  { %v5849_v61 = vadd.f32 %v5847_v42, %v9856_v18 }
0x542e   :  { %8183 = vtanh.f32 %v5849_v61  ;;  %v6506_v48 = vmul.f32 -1.442695, %v5849_v61 }
0x5430   :  { %8185 = vpow2.f32 %v6506_v48 }
0x5438   :  { %v8184_v28 = vpop.eup %8183 }
0x5439   :  { %5862 = vrot.lane.b32.xlu0 %v8184_v28, %s8564_s7 }
0x543a   :  { %v8186_v47 = vpop.eup %8185 }
0x543b   :  { %v5853_v43 = vadd.f32 1.0, %v8186_v47 }
0x543d   :  { %8187 = vrcp.f32 %v5853_v43  ;;  %v6207_v43 = vld [vmem:[%s9981_s19 + $0x20] sm:$0xff] }
0x5447   :  { %v8188_v45 = vpop.eup %8187 }
0x5448   :  { %v5860_v19 = vmul.f32 %v8188_v45, %v5858_v35  ;;  %v6210_v35 = vld [vmem:[%s9981_s19 + $0x38] sm:$0xff] }
0x54ab   :  { %v5863_v37 = vpop.permute.xlu0 %5862 }
0x54ac   :  { %v5865_v59 = vmul.f32 %v8188_v45, %v5863_v37  ;;  %v6209_v37 = vld [vmem:[%s9981_s19 + $0x30] sm:$0xff] }
0x54ae   :  { %5867 = vrot.lane.b32.xlu1 %v5865_v59, %s8560_s17 }
0x5520   :  { %v5868_v12 = vpop.permute.xlu1 %5867 }
0x5521   :  { %v5870_v16 = vadd.f32 %v5868_v12, %v5860_v19  ;;  %v7793_v19 = vpack.c.bf16 %v6210_v35, %v6209_v37 }
0x5523   :  { %8189 = vtanh.f32 %v5870_v16  ;;  %v5965_v9 = vrot.slane %v5870_v16, 6 }
0x552d   :  { %v8190_v24 = vpop.eup %8189 }
0x552e   :  { %5873 = vrot.lane.b32.xlu0 %v8190_v24, %s8564_s7 }
0x55a0   :  { %v5874_v32 = vpop.permute.xlu0 %5873 }
0x55a1   :  { %v5876_v51 = vmul.f32 %v8188_v45, %v5874_v32  ;;  %v6208_v45 = vld [vmem:[%s9981_s19 + $0x28] sm:$0xff] }
0x55a2   :  { %v7790_v59 = vpack.c.bf16 %v6208_v45, %v6207_v43 }
0x55a3   :  { %v5878_v56 = vrot.slane %v5876_v51, 2 }
0x55a5   :  { %5879 = vrot.lane.b32.xlu1 %v5878_v56, %s8560_s17 }
0x5617   :  { %v5880_v2 = vpop.permute.xlu1 %5879 }
0x5618   :  { %7399 = vmatmul.mubr.msk.f32.vlgmr.msra.gmra.mrb[56].mxu1 %vm432_vm4, %v5880_v2 }
0x5619   :  { %7779 = vmatpush3.bf16.msra.mxu1 %v7778_v46  ;;  %7428 = vmatprep.mubr.msk.f32.mxu1 %vm8562_vm7, %v8563_v14 }
0x561a   :  { %7780 = vmatprep.subr.bf16.mxu1 %v8561_v6 }
0x561d   :  { %7782 = vmatpush3.bf16.msra.mxu1 %v7781_v62 }
0x561e   :  { %7783 = vmatprep.subr.bf16.mxu1 %v8561_v6 }
0x5621   :  { %7785 = vmatpush3.bf16.msra.mxu1 %v7784_v8 }
0x5622   :  { %7786 = vmatprep.subr.bf16.mxu1 %v8561_v6 }
0x5625   :  { %7788 = vmatpush3.bf16.msra.mxu1 %v7787_v31 }
0x5628   :  { %7429 = vmatmul.mubr.msk.f32.vlgmr.msra.gmra.mrb[58].mxu1 %vm4302_vm0, %v6106_v22  ;;  %v6204_v22 = vld [vmem:[%s9981_s19 + $0x8] sm:$0xff] }
0x56eb   :  { %v5949_v20 = vpop.f32.mrb[56].mxu1 }
0x56ec   :  { %v5954_v57 = vrot.slane %v5949_v20, 4  ;;  %v7400_v27 = vpop.f32.mrb[57].mxu1  ;;  %v6205_v20 = vld [vmem:[%s9981_s19 + $0x10] sm:$0xff] }
0x56ed   :  { %v6206_v27 = vld [vmem:[%s9981_s19 + $0x18] sm:$0xff] }
0x56ee   :  { %v5956_v39 = vadd.f32 %v5954_v57, %v9856_v18 }
0x56f0   :  { %8191 = vtanh.f32 %v5956_v39  ;;  %v6508_v63 = vmul.f32 -1.442695, %v5956_v39  ;;  %v7799_v39 = vpack.c.bf16 %v6206_v27, %v6205_v20 }
0x56f2   :  { %8193 = vpow2.f32 %v6508_v63 }
0x56fa   :  { %v8192_v49 = vpop.eup %8191 }
0x56fb   :  { %v6175_v38 = vpop.f32.mrb[58].mxu1  ;;  %5969 = vrot.lane.b32.xlu0 %v8192_v49, %s8564_s7 }
0x56fc   :  { %v7430_v13 = vpop.f32.mrb[59].mxu1  ;;  %v8194_v15 = vpop.eup %8193  ;;  %v6176_v7 = vadd.f32 %v6511_v34, %v6175_v38 }
0x56fd   :  { %v5960_v11 = vadd.f32 1.0, %v8194_v15 }
0x56fe   :  { %v6513_v60 = vmul.f32 -1.442695, %v6176_v7 }
0x56ff   :  { %8195 = vrcp.f32 %v5960_v11 }
0x5709   :  { %v8196_v40 = vpop.eup %8195 }
0x570a   :  { %v5967_v53 = vmul.f32 %v8196_v40, %v5965_v9 }
0x576d   :  { %v5970_v21 = vpop.permute.xlu0 %5969 }
0x576e   :  { %v5972_v29 = vmul.f32 %v8196_v40, %v5970_v21 }
0x5770   :  { %5974 = vrot.lane.b32.xlu1 %v5972_v29, %s8560_s17 }
0x57e2   :  { %v5975_v23 = vpop.permute.xlu1 %5974 }
0x57e3   :  { %v9910_v1 = vadd.f32 %v5975_v23, %v5967_v53 }
0x57e5   :  { %8197 = vtanh.f32 %v9910_v1 }
0x57e6   :  { %8199 = vtanh.f32 %v6176_v7 }
0x57e7   :  { %8201 = vpow2.f32 %v6513_v60 }
0x57ef   :  { %v8198_v26 = vpop.eup %8197 }
0x57f0   :  { %5980 = vrot.lane.b32.xlu0 %v8198_v26, %s8564_s7  ;;  %v8200_v58 = vpop.eup %8199 }
0x57f1   :  { %v8202_v4 = vpop.eup %8201 }
0x57f2   :  { %v6182_v10 = vadd.f32 1.0, %v8202_v4 }
0x57f4   :  { %6188 = vrot.lane.b32.xlu0 %v8200_v58, %s8564_s7  ;;  %8203 = vrcp.f32 %v6182_v10 }
0x57fe   :  { %v8204_v17 = vpop.eup %8203 }
0x57ff   :  { %v6186_v61 = vmul.f32 0.0, %v8204_v17 }
0x5862   :  { %v5981_v25 = vpop.permute.xlu0 %5980 }
0x5863   :  { %v5983_v41 = vmul.f32 %v8196_v40, %v5981_v25  ;;  %v6516_v40 = vld [vmem:[#allocation3] ss:$0 sm:$0xff] }
0x5865   :  { %v5985_v44 = vrot.slane %v5983_v41, 4 }
0x5866   :  { %v6189_v3 = vpop.permute.xlu0 %6188 }
0x5867   :  { %v6191_v42 = vmul.f32 %v8204_v17, %v6189_v3  ;;  %5986 = vrot.lane.b32.xlu1 %v5985_v44, %s8560_s17 }
0x5869   :  { %6193 = vrot.lane.b32.xlu0 %v6191_v42, %s8560_s17 }
0x58d9   :  { %v5987_v33 = vpop.permute.xlu1 %5986 }
0x58da   :  { %7410 = vmatmul.mubr.msk.f32.vlgmr.msra.gmra.mrb[56].mxu0 %vm432_vm4, %v5987_v33 }
0x58db   :  { %v6194_v28 = vpop.permute.xlu0 %6193  ;;  %7439 = vmatprep.mubr.msk.f32.mxu0 %vm8562_vm7, %v8563_v14  ;;  %7791 = vmatpush3.bf16.msra.mxu0 %v7790_v59 }
0x58dc   :  { %v6196_v48 = vadd.f32 %v6194_v28, %v6186_v61  ;;  %7792 = vmatprep.subr.bf16.mxu0 %v8561_v6 }
0x58de   :  { %8205 = vtanh.f32 %v6196_v48 }
0x58df   :  { %7794 = vmatpush3.bf16.msra.mxu0 %v7793_v19 }
0x58e0   :  { %7795 = vmatprep.subr.bf16.mxu0 %v8561_v6 }
0x58e8   :  { %v8206_v47 = vpop.eup %8205 }
0x58e9   :  { %6199 = vrot.lane.b32.xlu0 %v8206_v47, %s8564_s7 }
0x595b   :  { %v6200_v12 = vpop.permute.xlu0 %6199 }
0x595c   :  { %v6202_v16 = vmul.f32 %v8204_v17, %v6200_v12 }
0x595e   :  { %6212 = vrot.lane.b32.xlu0 %v6202_v16, %s8560_s17 }
0x59ad   :  { %v6056_v24 = vpop.f32.mrb[56].mxu0 }
0x59ae   :  { %v6061_v32 = vrot.slane %v6056_v24, 2  ;;  %v7411_v51 = vpop.f32.mrb[57].mxu0 }
0x59b0   :  { %v6063_v56 = vadd.f32 %v6061_v32, %v9856_v18  ;;  %v6072_v18 = vrot.slane %v9910_v1, 6 }
0x59b2   :  { %8207 = vtanh.f32 %v6063_v56  ;;  %v6510_v46 = vmul.f32 -1.442695, %v6063_v56 }
0x59b4   :  { %8209 = vpow2.f32 %v6510_v46 }
0x59bc   :  { %v8208_v30 = vpop.eup %8207 }
0x59bd   :  { %6076 = vrot.lane.b32.xlu1 %v8208_v30, %s8564_s7 }
0x59be   :  { %v8210_v52 = vpop.eup %8209 }
0x59bf   :  { %v6067_v0 = vadd.f32 1.0, %v8210_v52 }
0x59c1   :  { %8211 = vrcp.f32 %v6067_v0 }
0x59cb   :  { %v8212_v2 = vpop.eup %8211 }
0x59cc   :  { %v6074_v50 = vmul.f32 %v8212_v2, %v6072_v18 }
0x59d0   :  { %v6213_v5 = vpop.permute.xlu0 %6212 }
0x59d1   :  { %7440 = vmatmul.mubr.msk.f32.vlgmr.msra.gmra.mrb[58].mxu0 %vm432_vm4, %v6213_v5 }
0x59d2   :  { %7450 = vmatprep.mubr.msk.f32.mxu0 %vm8562_vm7, %v8563_v14  ;;  %v6203_v14 = vld [vmem:[%s9981_s19] sm:$0xff] }
0x59d3   :  { %v7796_v57 = vpack.c.bf16 %v6204_v22, %v6203_v14 }
0x59d5   :  { %7797 = vmatpush3.bf16.msra.mxu0 %v7796_v57 }
0x59d6   :  { %7798 = vmatprep.subr.bf16.mxu0 %v8561_v6 }
0x59d9   :  { %7800 = vmatpush3.bf16.msra.mxu0 %v7799_v39 }
0x5a2f   :  { %v6077_v62 = vpop.permute.xlu1 %6076 }
0x5a30   :  { %v6079_v54 = vmul.f32 %v8212_v2, %v6077_v62 }
0x5a32   :  { %6081 = vrot.lane.b32.xlu1 %v6079_v54, %s8560_s17 }
0x5aa4   :  { %v6082_v8 = vpop.permute.xlu1 %6081  ;;  %v6282_v55 = vpop.f32.mrb[58].mxu0 }
0x5aa5   :  { %v6084_v36 = vadd.f32 %v6082_v8, %v6074_v50  ;;  %v7441_v31 = vpop.f32.mrb[59].mxu0 }
0x5aa7   :  { %8213 = vtanh.f32 %v6084_v36 }
0x5ab1   :  { %v8214_v49 = vpop.eup %8213 }
0x5ab2   :  { %6087 = vrot.lane.b32.xlu1 %v8214_v49, %s8564_s7 }
0x5b24   :  { %v6088_v38 = vpop.permute.xlu1 %6087 }
0x5b25   :  { %v6090_v13 = vmul.f32 %v8212_v2, %v6088_v38 }
0x5b27   :  { %v6287_v63 = vrot.slane %v6090_v13, 6 }
0x5b29   :  { %6288 = vrot.lane.b32.xlu1 %v6287_v63, %s8560_s17 }
0x5b9b   :  { %v6289_v15 = vpop.permute.xlu1 %6288 }
0x5b9c   :  { %7451 = vmatmul.mubr.msk.f32.vlgmr.msra.gmra.mrb[60].mxu0 %vm432_vm4, %v6289_v15 }
0x5c6f   :  { %v6358_v11 = vpop.f32.mrb[60].mxu0 }
0x5c70   :  { %v6359_v21 = vadd.f32 %v6358_v11, %v6282_v55  ;;  %v7452_v29 = vpop.f32.mrb[61].mxu0 }
0x5c72   :  { %v6369_v9 = vadd.f32 %v6516_v40, %v6359_v21 }
0x5c74   :  { %v6517_v53 = vmul.f32 -1.442695, %v6369_v9 }
0x5c76   :  { %8215 = vpow2.f32 %v6517_v53 }
0x5c80   :  { %v8216_v6 = vpop.eup %8215 }
0x5c81   :  { %v6373_v34 = vadd.f32 1.0, %v8216_v6 }
0x5c83   :  { %8217 = vrcp.f32 %v6373_v34 }
0x5c8d   :  { %v8218_v23 = vpop.eup %8217 }
0x5c8e   :  { %6377 = vst.msk [vmem:[%s9983_s21] sm:$0x3] %vm6376_vm1, %v8218_v23 }
0x5c8f   :  { %6382 = vsyncpa [#allocation5], 1 }
0x5c90   :  { %6383 = vsyncpa [#allocation7], 1 }
0x5c91   :  { %6384 = vsyncpa [#allocation10], 1 }
0x5c92   :  { %6385 = vsyncpa [#allocation13], 1 }
0x5c93   :  { %6386 = vsyncpa [#allocation16], 1 }
0x5c94   :  { %6387 = vsyncpa [#allocation19], 1 }
0x5c95   :  { %6388 = vsyncpa [#allocation22], 1 }
0x5c96   :  { %6389 = vsyncpa [#allocation25], 1 }

</bundles_post_ra>
